<compile_context>
chip_gen: v6e
topology: v6e:2x2x1
jax: 0.10.0
libtpu: 0.0.40
codegen_flags: <defaults>
</compile_context>

<pallas_src>
import functools

import jax
import jax.numpy as jnp
from jax.experimental import pallas as pl
from jax.experimental.pallas import tpu as pltpu

# ---------------------------- model dimensions ------------------------------
NUM_INPUTS = 8             # forced by Linear(9*20, hidden): conv out length = 9
C_OUT, K, PAD = 20, 8, 4
L_OUT = NUM_INPUTS + 2 * PAD - K + 1       # 9
L_PAD = NUM_INPUTS + 2 * PAD               # 16
FLAT = C_OUT * L_OUT                       # 180
FLAT_PAD = 256                             # FLAT zero-padded to a lane multiple
HIDDEN = 512                               # matches module default hidden_size
NUM_ACTIONS = 4
NUM_DISCRETE = 64                          # chosen so policy splits into 128-lane halves
POLICY = NUM_ACTIONS * NUM_DISCRETE        # 256
HALF = POLICY // 2                         # 128
PACKED_OUT = POLICY + 128                  # [mu | sigma | value + zero pad] -> 384 lanes
BIAS_W = FLAT_PAD + HIDDEN + PACKED_OUT    # 1152
STD_BIAS = 0.5
MAX_TILE_B = 512                           # MXU-occupancy sweet spot; ~4 MiB VMEM/tile


# ------------------------------ Pallas kernel -------------------------------
def _gcac_kernel(x_ref,        # (TB, NUM_INPUTS) f32
                 a_ref,        # (NUM_INPUTS, FLAT_PAD) bf16  Toeplitz conv matrix
                 bias_ref,     # (1, BIAS_W) f32  [bconv | b1 | packed head bias]
                 w1_ref,       # (FLAT_PAD, HIDDEN) bf16
                 wap_ref,      # (HIDDEN, PACKED_OUT) bf16  [actor | critic col | 0]
                 out_ref):     # out (TB, PACKED_OUT) f32   [mu | sigma | value | 0]
    # Conv1d + ReLU as a Toeplitz matmul on the MXU (channel-major flatten).
    xb = x_ref[...].astype(jnp.bfloat16)
    flat = jnp.dot(xb, a_ref[...], preferred_element_type=jnp.float32)
    flat = jnp.maximum(flat + bias_ref[:, :FLAT_PAD], 0.0)            # (TB, 256)

    # common Linear + ReLU
    hidden = jnp.dot(flat.astype(jnp.bfloat16), w1_ref[...],
                     preferred_element_type=jnp.float32)
    hidden = jnp.maximum(hidden + bias_ref[:, FLAT_PAD:FLAT_PAD + HIDDEN], 0.0)

    # actor + critic heads fused into one MXU matmul -> packed 384-wide row.
    head = jnp.dot(hidden.astype(jnp.bfloat16), wap_ref[...],
                   preferred_element_type=jnp.float32)
    head = head + bias_ref[:, FLAT_PAD + HIDDEN:]                     # (TB, 384)

    # sigma = softplus(policy_sigma - std_bias); std_bias is pre-folded into the
    # bias row, so only the numerically-stable softplus remains (EUP exp/log1p).
    s = head[:, HALF:POLICY]
    sigma = jnp.maximum(s, 0.0) + jnp.log1p(jnp.exp(-jnp.abs(s)))

    # lane-dense 128-aligned stores: [mu | sigma | value + zero pad]
    out_ref[:, :HALF] = head[:, :HALF]
    out_ref[:, HALF:POLICY] = sigma
    out_ref[:, POLICY:] = head[:, POLICY:]


# ----------------------- one-time parameter preprocessing --------------------
def _toeplitz_conv_matrix(w_conv):
    """A[l+k, c*L_OUT + l] = w_conv[c, 0, k]  (flatten is channel-major)."""
    l = jnp.arange(L_OUT)
    k = jnp.arange(K)
    c = jnp.arange(C_OUT)
    rows = jnp.broadcast_to((l[:, None] + k[None, :])[None], (C_OUT, L_OUT, K))
    cols = jnp.broadcast_to((c[:, None] * L_OUT + l[None, :])[:, :, None],
                            (C_OUT, L_OUT, K))
    vals = jnp.broadcast_to(w_conv[:, 0, :][:, None, :], (C_OUT, L_OUT, K))
    A = jnp.zeros((L_PAD, FLAT), jnp.float32)
    return A.at[rows.reshape(-1), cols.reshape(-1)].set(vals.reshape(-1))


def prepare_params(params, std_bias=STD_BIAS):
    """Hoisted, parameter-only preprocessing. Call ONCE; reuse across steps."""
    w_conv, b_conv, w1, b1, wc, bc, wa, ba = params

    A_full = _toeplitz_conv_matrix(w_conv.astype(jnp.float32))        # (16, 180)
    # Rows that only ever multiply the zero input padding contribute nothing.
    A_core = A_full[PAD:PAD + NUM_INPUTS]                             # (8, 180)
    A_core = jnp.pad(A_core, ((0, 0), (0, FLAT_PAD - FLAT)))          # (8, 256)

    # One coalesced f32 bias row: [conv bias | hidden bias | packed head bias].
    bconv_row = jnp.pad(jnp.repeat(b_conv, L_OUT), (0, FLAT_PAD - FLAT))
    ba_packed = jnp.concatenate([
        ba[:HALF],                                   # mu bias
        ba[HALF:] - std_bias,                        # sigma bias, std_bias folded in
        bc,                                          # critic bias
        jnp.zeros((PACKED_OUT - POLICY - 1,), jnp.float32)])
    bias_row = jnp.concatenate([bconv_row, b1, ba_packed]).reshape(1, BIAS_W)

    w1p = jnp.pad(w1.T, ((0, FLAT_PAD - FLAT), (0, 0)))               # (256, H)
    # Fold critic column into actor weights -> single packed head matmul.
    wc_cols = jnp.pad(wc.T, ((0, 0), (0, PACKED_OUT - POLICY - 1)))   # (H, 128)
    wap = jnp.concatenate([wa.T, wc_cols], axis=1)                    # (H, 384)

    return (A_core.astype(jnp.bfloat16),
            bias_row.astype(jnp.float32),
            w1p.astype(jnp.bfloat16),
            wap.astype(jnp.bfloat16))


# ------------------------------- forward wrapper ------------------------------
def _round_up(x, m):
    return ((x + m - 1) // m) * m


def _batch_tiling(batch):
    """One grid step when the batch fits a tile (v5e/v6e: 1 TC, no benefit from
    more steps); otherwise >=2 equal tiles so v7x's 2 TensorCores share work."""
    bp = _round_up(batch, 8)
    if bp <= MAX_TILE_B:
        return bp, 1
    tiles = max(2, -(-bp // MAX_TILE_B))
    tile = _round_up(-(-bp // tiles), 8)
    return tile, tiles


def gcac_forward(states, prep):
    """states: (B, NUM_INPUTS) f32.  Returns (value (B,1), musig (2, B, HALF))."""
    A_core, bias_row, w1p, wap = prep
    B = states.shape[0]
    tile_b, n_tiles = _batch_tiling(B)
    Bp = tile_b * n_tiles
    x = states.astype(jnp.float32)
    if Bp != B:
        x = jnp.pad(x, ((0, Bp - B), (0, 0)))

    def const2d(arr):   # whole-array block; VMEM-resident across grid steps
        return pl.BlockSpec(arr.shape, lambda i: (0, 0))

    packed = pl.pallas_call(
        _gcac_kernel,
        out_shape=jax.ShapeDtypeStruct((Bp, PACKED_OUT), jnp.float32),
        grid=(n_tiles,),
        in_specs=[pl.BlockSpec((tile_b, NUM_INPUTS), lambda i: (i, 0)),
                  const2d(A_core), const2d(bias_row),
                  const2d(w1p), const2d(wap)],
        out_specs=pl.BlockSpec((tile_b, PACKED_OUT), lambda i: (i, 0)),
        compiler_params=pltpu.CompilerParams(
            dimension_semantics=("parallel",)),
    )(x, A_core, bias_row, w1p, wap)

    value = packed[:B, POLICY:POLICY + 1]
    # match torch.stack((mu, sigma)) layout: (2, B, HALF)
    musig = jnp.stack((packed[:B, :HALF], packed[:B, HALF:POLICY]))
    return value, musig


# ------------------------------ pure-JAX reference ---------------------------
def reference(states, params, std_bias=STD_BIAS):
    """Module semantics with the kernel's bf16 weight/activation storage mirrored.
    (An f32 PyTorch module would differ at ~1e-3 due to the bf16 MXU matmuls.)"""
    w_conv, b_conv, w1, b1, wc, bc, wa, ba = params
    B = states.shape[0]
    x = states.astype(jnp.bfloat16).reshape(B, 1, NUM_INPUTS)         # NCL
    conv = jax.lax.conv_general_dilated(
        x, w_conv.astype(jnp.bfloat16), window_strides=(1,),
        padding=[(PAD, PAD)], dimension_numbers=("NCH", "OIH", "NCH"),
        preferred_element_type=jnp.float32)
    conv = jnp.maximum(conv + b_conv[None, :, None], 0.0)             # (B, 20, 9)
    flat = conv.reshape(B, FLAT)                                      # channel-major
    hidden = jnp.dot(flat.astype(jnp.bfloat16), w1.T.astype(jnp.bfloat16),
                     preferred_element_type=jnp.float32) + b1[None, :]
    hidden = jnp.maximum(hidden, 0.0)
    hb = hidden.astype(jnp.bfloat16)
    value = jnp.dot(hb, wc.T.astype(jnp.bfloat16),
                    preferred_element_type=jnp.float32) + bc[None, :]
    policy = jnp.dot(hb, wa.T.astype(jnp.bfloat16),
                     preferred_element_type=jnp.float32) + ba[None, :]
    mu, s = policy[:, :HALF], policy[:, HALF:] - std_bias
    sigma = jnp.maximum(s, 0.0) + jnp.log1p(jnp.exp(-jnp.abs(s)))
    return value, jnp.stack((mu, sigma))


# ------------------------------------ main -----------------------------------
if __name__ == "__main__":
    key = jax.random.PRNGKey(0)
    ks = jax.random.split(key, 10)
    params = (
        0.1 * jax.random.normal(ks[0], (C_OUT, 1, K), jnp.float32),     # conv w
        0.1 * jax.random.normal(ks[1], (C_OUT,), jnp.float32),          # conv b
        0.1 * jax.random.normal(ks[2], (HIDDEN, FLAT), jnp.float32),    # linear1 w
        0.1 * jax.random.normal(ks[3], (HIDDEN,), jnp.float32),         # linear1 b
        0.1 * jax.random.normal(ks[4], (1, HIDDEN), jnp.float32),       # critic w
        0.1 * jax.random.normal(ks[5], (1,), jnp.float32),              # critic b
        0.1 * jax.random.normal(ks[6], (POLICY, HIDDEN), jnp.float32),  # actor w
        0.1 * jax.random.normal(ks[7], (POLICY,), jnp.float32),         # actor b
    )

    prep = prepare_params(params)                        # one-time, hoisted
    fwd = jax.jit(gcac_forward)

    # B=300: single grid step (padded to 304).  B=1000: two parallel tiles of
    # 504 rows (padded to 1008) -> exercises the multi-tile / v7x path.
    for B, kidx in ((300, 8), (1000, 9)):
        states = jax.random.normal(ks[kidx], (B, NUM_INPUTS), jnp.float32)
        value, musig = fwd(states, prep)
        jax.block_until_ready((value, musig))

        v_ref, ms_ref = reference(states, params)
        assert value.shape == (B, 1) and musig.shape == (2, B, HALF)
        assert jnp.allclose(value, v_ref, atol=5e-3, rtol=5e-3), \
            float(jnp.max(jnp.abs(value - v_ref)))
        assert jnp.allclose(musig, ms_ref, atol=5e-3, rtol=5e-3), \
            float(jnp.max(jnp.abs(musig - ms_ref)))

    # TODO(synk): the torch NaN-check/raise is host-side control flow with no
    # in-kernel equivalent; callers can jnp.isnan the outputs if needed.
    print("KERNEL_OK")
</pallas_src>

<mosaic_0001>
module attributes {stable_mosaic.version = 11 : i64} {
  func.func @_gcac_kernel(%arg0: i32, %arg1: memref<304x8xf32, #tpu.memory_space<vmem>>, %arg2: memref<8x256xbf16, #tpu.memory_space<vmem>>, %arg3: memref<1x1152xf32, #tpu.memory_space<vmem>>, %arg4: memref<256x512xbf16, #tpu.memory_space<vmem>>, %arg5: memref<512x384xbf16, #tpu.memory_space<vmem>>, %arg6: memref<304x384xf32, #tpu.memory_space<vmem>>) attributes {dimension_semantics = [#tpu.dimension_semantics<parallel>], iteration_bounds = array<i64: 1>, scalar_prefetch = 0 : i64, scratch_operands = 0 : i64, tpu.core_type = #tpu.core_type<tc>, window_params = [{transform_indices = @transform_0, window_bounds = array<i64: 304, 8>}, {pipeline_mode = #tpu.pipeline_mode<synchronous>, transform_indices = @transform_1, window_bounds = array<i64: 8, 256>}, {pipeline_mode = #tpu.pipeline_mode<synchronous>, transform_indices = @transform_2, window_bounds = array<i64: 1, 1152>}, {pipeline_mode = #tpu.pipeline_mode<synchronous>, transform_indices = @transform_3, window_bounds = array<i64: 256, 512>}, {pipeline_mode = #tpu.pipeline_mode<synchronous>, transform_indices = @transform_4, window_bounds = array<i64: 512, 384>}, {transform_indices = @transform_5, window_bounds = array<i64: 304, 384>}]} {
    %c0 = arith.constant 0 : index
    %c0_0 = arith.constant 0 : index
    %0 = vector.load %arg1[%c0, %c0_0] : memref<304x8xf32, #tpu.memory_space<vmem>>, vector<304x8xf32>
    %1 = arith.truncf %0 : vector<304x8xf32> to vector<304x8xbf16>
    %c0_1 = arith.constant 0 : index
    %c0_2 = arith.constant 0 : index
    %2 = vector.load %arg2[%c0_1, %c0_2] : memref<8x256xbf16, #tpu.memory_space<vmem>>, vector<8x256xbf16>
    %cst = arith.constant dense<0.000000e+00> : vector<304x256xf32>
    %3 = tpu.matmul %1, %2, %cst {dimension_numbers = #tpu.dot_dimension_numbers<[1], [0], [0], [1], [0, 0, 1, 1], [], []>} : vector<304x8xbf16>, vector<8x256xbf16>, vector<304x256xf32> -> vector<304x256xf32>
    %c0_3 = arith.constant 0 : index
    %c0_4 = arith.constant 0 : index
    %4 = vector.load %arg3[%c0_3, %c0_4] : memref<1x1152xf32, #tpu.memory_space<vmem>>, vector<1x256xf32>
    %5 = vector.broadcast %4 : vector<1x256xf32> to vector<304x256xf32>
    %6 = arith.addf %3, %5 : vector<304x256xf32>
    %cst_5 = arith.constant 0.000000e+00 : f32
    %7 = vector.broadcast %cst_5 : f32 to vector<304x256xf32>
    %8 = arith.maximumf %6, %7 : vector<304x256xf32>
    %9 = arith.truncf %8 : vector<304x256xf32> to vector<304x256xbf16>
    %c0_6 = arith.constant 0 : index
    %c0_7 = arith.constant 0 : index
    %10 = vector.load %arg4[%c0_6, %c0_7] : memref<256x512xbf16, #tpu.memory_space<vmem>>, vector<256x512xbf16>
    %cst_8 = arith.constant dense<0.000000e+00> : vector<304x512xf32>
    %11 = tpu.matmul %9, %10, %cst_8 {dimension_numbers = #tpu.dot_dimension_numbers<[1], [0], [0], [1], [0, 0, 1, 1], [], []>} : vector<304x256xbf16>, vector<256x512xbf16>, vector<304x512xf32> -> vector<304x512xf32>
    %c0_9 = arith.constant 0 : index
    %c256 = arith.constant 256 : index
    %12 = vector.load %arg3[%c0_9, %c256] : memref<1x1152xf32, #tpu.memory_space<vmem>>, vector<1x512xf32>
    %13 = vector.broadcast %12 : vector<1x512xf32> to vector<304x512xf32>
    %14 = arith.addf %11, %13 : vector<304x512xf32>
    %cst_10 = arith.constant 0.000000e+00 : f32
    %15 = vector.broadcast %cst_10 : f32 to vector<304x512xf32>
    %16 = arith.maximumf %14, %15 : vector<304x512xf32>
    %17 = arith.truncf %16 : vector<304x512xf32> to vector<304x512xbf16>
    %c0_11 = arith.constant 0 : index
    %c0_12 = arith.constant 0 : index
    %18 = vector.load %arg5[%c0_11, %c0_12] : memref<512x384xbf16, #tpu.memory_space<vmem>>, vector<512x384xbf16>
    %cst_13 = arith.constant dense<0.000000e+00> : vector<304x384xf32>
    %19 = tpu.matmul %17, %18, %cst_13 {dimension_numbers = #tpu.dot_dimension_numbers<[1], [0], [0], [1], [0, 0, 1, 1], [], []>} : vector<304x512xbf16>, vector<512x384xbf16>, vector<304x384xf32> -> vector<304x384xf32>
    %c0_14 = arith.constant 0 : index
    %c768 = arith.constant 768 : index
    %20 = vector.load %arg3[%c0_14, %c768] : memref<1x1152xf32, #tpu.memory_space<vmem>>, vector<1x384xf32>
    %21 = vector.broadcast %20 : vector<1x384xf32> to vector<304x384xf32>
    %22 = arith.addf %19, %21 : vector<304x384xf32>
    %23 = vector.extract_strided_slice %22 {offsets = [0, 128], sizes = [304, 128], strides = [1, 1]} : vector<304x384xf32> to vector<304x128xf32>
    %cst_15 = arith.constant 0.000000e+00 : f32
    %24 = vector.broadcast %cst_15 : f32 to vector<304x128xf32>
    %25 = arith.maximumf %23, %24 : vector<304x128xf32>
    %26 = math.absf %23 : vector<304x128xf32>
    %cst_16 = arith.constant 0.000000e+00 : f32
    %27 = vector.broadcast %cst_16 : f32 to vector<304x128xf32>
    %28 = arith.subf %27, %26 : vector<304x128xf32>
    %29 = math.exp %28 : vector<304x128xf32>
    %30 = math.log1p %29 : vector<304x128xf32>
    %31 = arith.addf %25, %30 : vector<304x128xf32>
    %32 = vector.extract_strided_slice %22 {offsets = [0, 0], sizes = [304, 128], strides = [1, 1]} : vector<304x384xf32> to vector<304x128xf32>
    %c0_17 = arith.constant 0 : index
    %c0_18 = arith.constant 0 : index
    %33 = vector.load %arg6[%c0_17, %c0_18] : memref<304x384xf32, #tpu.memory_space<vmem>>, vector<304x128xf32>
    tpu.vector_store %arg6[%c0_17, %c0_18], %32 {strides = array<i32>} : memref<304x384xf32, #tpu.memory_space<vmem>>, vector<304x128xf32>,
    %c0_19 = arith.constant 0 : index
    %c128 = arith.constant 128 : index
    %34 = vector.load %arg6[%c0_19, %c128] : memref<304x384xf32, #tpu.memory_space<vmem>>, vector<304x128xf32>
    tpu.vector_store %arg6[%c0_19, %c128], %31 {strides = array<i32>} : memref<304x384xf32, #tpu.memory_space<vmem>>, vector<304x128xf32>,
    %35 = vector.extract_strided_slice %22 {offsets = [0, 256], sizes = [304, 128], strides = [1, 1]} : vector<304x384xf32> to vector<304x128xf32>
    %c0_20 = arith.constant 0 : index
    %c256_21 = arith.constant 256 : index
    %36 = vector.load %arg6[%c0_20, %c256_21] : memref<304x384xf32, #tpu.memory_space<vmem>>, vector<304x128xf32>
    tpu.vector_store %arg6[%c0_20, %c256_21], %35 {strides = array<i32>} : memref<304x384xf32, #tpu.memory_space<vmem>>, vector<304x128xf32>,
    return
  }
  func.func @transform_0(%arg0: i32) -> (i32, i32) {
    %c0_i32 = arith.constant 0 : i32
    %c0_i32_0 = arith.constant 0 : i32
    return %arg0, %c0_i32 : i32, i32
  }
  func.func @transform_1(%arg0: i32) -> (i32, i32) {
    %c0_i32 = arith.constant 0 : i32
    %c0_i32_0 = arith.constant 0 : i32
    %c0_i32_1 = arith.constant 0 : i32
    return %c0_i32, %c0_i32_0 : i32, i32
  }
  func.func @transform_2(%arg0: i32) -> (i32, i32) {
    %c0_i32 = arith.constant 0 : i32
    %c0_i32_0 = arith.constant 0 : i32
    %c0_i32_1 = arith.constant 0 : i32
    return %c0_i32, %c0_i32_0 : i32, i32
  }
  func.func @transform_3(%arg0: i32) -> (i32, i32) {
    %c0_i32 = arith.constant 0 : i32
    %c0_i32_0 = arith.constant 0 : i32
    %c0_i32_1 = arith.constant 0 : i32
    return %c0_i32, %c0_i32_0 : i32, i32
  }
  func.func @transform_4(%arg0: i32) -> (i32, i32) {
    %c0_i32 = arith.constant 0 : i32
    %c0_i32_0 = arith.constant 0 : i32
    %c0_i32_1 = arith.constant 0 : i32
    return %c0_i32, %c0_i32_0 : i32, i32
  }
  func.func @transform_5(%arg0: i32) -> (i32, i32) {
    %c0_i32 = arith.constant 0 : i32
    %c0_i32_0 = arith.constant 0 : i32
    return %arg0, %c0_i32 : i32, i32
  }
}

</mosaic_0001>

<bundles_post_ra>
// kernel: gcac_forward.1
= control target key start
LH: loop header
LB: loop body
LE: loop exit
PB: predicated region body
PF: predicated region fallthrough
CT: control target
= control target key end

     0   :  { %10 = vsyncpa [#allocation3], 0  ;;  %s4343_s18 = smov [#allocation2]   ;;  %s6808_s0 = inlined_call_operand.vmem [shape: f32[304,8], index: 0, kind: input, shape index: {}]   ;;  %s6809_s1 = inlined_call_operand.vmem [shape: bf16[8,256], index: 1, kind: input, shape index: {}]   ;;  %s6810_s2 = inlined_call_operand.vmem [shape: f32[1,1152], index: 2, kind: input, shape index: {}]   ;;  %s6811_s3 = inlined_call_operand.hbm [shape: bf16[256,512], index: 3, kind: input, shape index: {}]   ;;  %s6812_s4 = inlined_call_operand.vmem [shape: bf16[512,384], index: 4, kind: input, shape index: {}]   ;;  %s6813_s5 = inlined_call_operand.vmem [shape: f32[304,384], index: 5, kind: output, shape index: {}]  }
   0x1   :  { %s22_s19 = sshll.u32 %s4343_s18, 4  ;;  %s23_s19 = int_to_ptr.vmem [resolvable:$true] %s22_s19 }
   0x2   :  { %s4329_s20 = scalar_lea.vmem %s23_s19, 8192  ;;  %p4334_p1 = scmp.lt.s32.totalorder %s23_s19, %s23_s19 }
   0x3   :  { %p4330_p0 = scmp.ne.s32.totalorder %s23_s19, %s4329_s20  ;;  %p4335_p2 = scmp.lt.s32.totalorder %s4329_s20, %s4329_s20 }
   0x5   :  { %p4336_p3 = por %p4335_p2, %p4334_p1 }
   0x7   :  { %p4337_p4 = pnand %p4336_p3, %p4330_p0 }
   0x9   :  { %4340 = shalt.err (!%p4337_p4)
}
   0xa   :  { %s4344_s21 = smov 256   ;;  %s4345_s22 = smov 16  }
   0xb   :  { %28 = dma.hbm_to_vmem [thread:$0]  %s6811_s3, 8192, %s23_s19, [#allocation3], %s4344_s21, %s4344_s21, %s4345_s22  }
   0xc   :  { %4341 = dma.done.wait [#allocation3], 8192  }
   0xd   :  { %4342 = vsyncadd [#allocation3], 4294959104  ;;  %v4346_v0 = vmov 0   ;;  %v92_v1 = vld [vmem:[%s6809_s1] sm:$0xff]  ;;  %vm168_vm0 = vcmask 1043456   ;;  %v36_v3 = vld [vmem:[%s6808_s0 + $0x8] sm:$0xff] }
   0xe   :  { %207 = vmatprep.mubr.bf16.mxu0 %v4346_v0  ;;  %307 = vmatprep.mubr.bf16.mxu1 %v4346_v0  ;;  %v35_v2 = vld [vmem:[%s6808_s0] sm:$0xff]  ;;  %v3755_v4 = vcombine.high %v92_v1, %v92_v1  ;;  %v3754_v5 = vcombine.low %v92_v1, %v92_v1  ;;  %vm110_vm1 = vcmask 64512   ;;  %v56_v9 = vld [vmem:[%s6808_s0 + $0xa8] sm:$0xff]  ;;  %v37_v10 = vld [vmem:[%s6808_s0 + $0x10] sm:$0xff] }
   0xf   :  { %v73_v7 = vpack.c.bf16 %v36_v3, %v35_v2  ;;  %v55_v8 = vld [vmem:[%s6808_s0 + $0xa0] sm:$0xff]  ;;  %v38_v11 = vld [vmem:[%s6808_s0 + $0x18] sm:$0xff]  ;;  %v57_v14 = vld [vmem:[%s6808_s0 + $0xb0] sm:$0xff] }
  0x10   :  { %3756 = vmatprep.subr.msk.bf16.mxu0 %vm168_vm0, %v3755_v4  ;;  %v170_v6 = vsel %vm168_vm0, %v3754_v5, 0  ;;  %3936 = vmatprep.subr.msk.bf16.mxu1 %vm168_vm0, %v3755_v4  ;;  %v83_v12 = vpack.c.bf16 %v56_v9, %v55_v8  ;;  %v74_v13 = vpack.c.bf16 %v38_v11, %v37_v10  ;;  %v58_v15 = vld [vmem:[%s6808_s0 + $0xb8] sm:$0xff]  ;;  %v39_v18 = vld [vmem:[%s6808_s0 + $0x20] sm:$0xff]  ;;  %v40_v19 = vld [vmem:[%s6808_s0 + $0x28] sm:$0xff] }
  0x11   :  { %190 = vmatpush1.bf16.msra.mxu0 %v170_v6  ;;  %3937 = vmatpush1.bf16.msra.mxu1 %v170_v6  ;;  %v3944_v16 = vld [vmem:[#allocation2 + $0xe8] ss:$16 sps:$4 sm:$0xff]   ;;  %v3946_v17 = vld [vmem:[#allocation2 + $0xec] ss:$16 sps:$4 sm:$0xff]   ;;  %v84_v20 = vpack.c.bf16 %v58_v15, %v57_v14  ;;  %v3950_v23 = vld [vmem:[#allocation2 + $0xe0] ss:$16 sps:$4 sm:$0xff]   ;;  %v75_v28 = vpack.c.bf16 %v40_v19, %v39_v18 }
  0x12   :  { %1141 = vmatprep.subr.bf16.mxu0 %v3946_v17  ;;  %v3947_v21 = vld [vmem:[#allocation2 + $0xc8] ss:$16 sps:$4 sm:$0xff]   ;;  %v3949_v22 = vld [vmem:[#allocation2 + $0xcc] ss:$16 sps:$4 sm:$0xff]   ;;  %v3952_v24 = vld [vmem:[#allocation2 + $0xe4] ss:$16 sps:$4 sm:$0xff]  }
  0x13   :  { %v59_v25 = vld [vmem:[%s6808_s0 + $0xc0] sm:$0xff]  ;;  %v3955_v26 = vld [vmem:[#allocation2 + $0xac] ss:$16 sps:$4 sm:$0xff]   ;;  %918 = vmatprep.subr.bf16.mxu1 %v3952_v24  ;;  %v3953_v31 = vld [vmem:[#allocation2 + $0xa8] ss:$16 sps:$4 sm:$0xff]  }
  0x14   :  { %3757 = vmatmul.mubr.msk.bf16.vlgmr.msra.gmra.mxu0 %vm110_vm1, %v73_v7  ;;  %3767 = vmatmul.mubr.msk.bf16.vlgmr.msra.gmra.mxu1 %vm110_vm1, %v83_v12  ;;  %v60_v27 = vld [vmem:[%s6808_s0 + $0xc8] sm:$0xff]  ;;  %v3956_v29 = vld [vmem:[#allocation2 + $0xc0] ss:$16 sps:$4 sm:$0xff]   ;;  %v3958_v30 = vld [vmem:[#allocation2 + $0xc4] ss:$16 sps:$4 sm:$0xff]  }
  0x15   :  { %217 = vmatprep.mubr.bf16.mxu0 %v4346_v0  ;;  %317 = vmatprep.mubr.bf16.mxu1 %v4346_v0  ;;  %v3961_v32 = vld [vmem:[#allocation2 + $0xa4] ss:$16 sps:$4 sm:$0xff]   ;;  %v85_v34 = vpack.c.bf16 %v60_v27, %v59_v25  ;;  %v3964_v35 = vld [vmem:[#allocation2 + $0x8c] ss:$16 sps:$4 sm:$0xff]   ;;  %v3959_v37 = vld [vmem:[#allocation2 + $0xa0] ss:$16 sps:$4 sm:$0xff]  }
  0x16   :  { %1142 = vmatpush1.bf16.msra.mxu0 %v3944_v16  ;;  %919 = vmatpush1.bf16.msra.mxu1 %v3950_v23  ;;  %v41_v33 = vld [vmem:[%s6808_s0 + $0x30] sm:$0xff]  ;;  %v42_v36 = vld [vmem:[%s6808_s0 + $0x38] sm:$0xff]  ;;  %v43_v48 = vld [vmem:[%s6808_s0 + $0x40] sm:$0xff] }
  0x17   :  { %1143 = vmatprep.subr.bf16.mxu0 %v3949_v22  ;;  %920 = vmatprep.subr.bf16.mxu1 %v3958_v30  ;;  %v3962_v38 = vld [vmem:[#allocation2 + $0x88] ss:$16 sps:$4 sm:$0xff]   ;;  %v3967_v39 = vld [vmem:[#allocation2 + $0x84] ss:$16 sps:$4 sm:$0xff]   ;;  %v3970_v40 = vld [vmem:[#allocation2 + $0x6c] ss:$16 sps:$4 sm:$0xff]   ;;  %v76_v42 = vpack.c.bf16 %v42_v36, %v41_v33 }
  0x18   :  { %v61_v41 = vld [vmem:[%s6808_s0 + $0xd0] sm:$0xff]  ;;  %v62_v43 = vld [vmem:[%s6808_s0 + $0xd8] sm:$0xff]  ;;  %v44_v50 = vld [vmem:[%s6808_s0 + $0x48] sm:$0xff] }
  0x19   :  { %v3965_v44 = vld [vmem:[#allocation2 + $0x80] ss:$16 sps:$4 sm:$0xff]   ;;  %v3968_v45 = vld [vmem:[#allocation2 + $0x68] ss:$16 sps:$4 sm:$0xff]   ;;  %v3973_v46 = vld [vmem:[#allocation2 + $0x64] ss:$16 sps:$4 sm:$0xff]   ;;  %v86_v49 = vpack.c.bf16 %v62_v43, %v61_v41  ;;  %v77_v56 = vpack.c.bf16 %v44_v50, %v43_v48 }
  0x1a   :  { %1144 = vmatpush1.bf16.msra.mxu0 %v3947_v21  ;;  %921 = vmatpush1.bf16.msra.mxu1 %v3956_v29  ;;  %v3976_v47 = vld [vmem:[#allocation2 + $0x4c] ss:$16 sps:$4 sm:$0xff]   ;;  %v3971_v51 = vld [vmem:[#allocation2 + $0x60] ss:$16 sps:$4 sm:$0xff]   ;;  %v3974_v52 = vld [vmem:[#allocation2 + $0x48] ss:$16 sps:$4 sm:$0xff]  }
  0x1b   :  { %1145 = vmatprep.subr.bf16.mxu0 %v3955_v26  ;;  %922 = vmatprep.subr.bf16.mxu1 %v3961_v32  ;;  %v3979_v53 = vld [vmem:[#allocation2 + $0x44] ss:$16 sps:$4 sm:$0xff]   ;;  %v3982_v54 = vld [vmem:[#allocation2 + $0x2c] ss:$16 sps:$4 sm:$0xff]   ;;  %v3977_v58 = vld [vmem:[#allocation2 + $0x40] ss:$16 sps:$4 sm:$0xff]  }
  0x1c   :  { %3758 = vmatmul.mubr.msk.bf16.gmra.mxu0 %vm110_vm1, %v74_v13  ;;  %3768 = vmatmul.mubr.msk.bf16.gmra.mxu1 %vm110_vm1, %v84_v20  ;;  %v63_v55 = vld [vmem:[%s6808_s0 + $0xe0] sm:$0xff]  ;;  %v64_v57 = vld [vmem:[%s6808_s0 + $0xe8] sm:$0xff]  ;;  %v45_v62 = vld [vmem:[%s6808_s0 + $0x50] sm:$0xff] }
  0x1d   :  { %227 = vmatprep.mubr.bf16.mxu0 %v4346_v0  ;;  %327 = vmatprep.mubr.bf16.mxu1 %v4346_v0  ;;  %v3980_v59 = vld [vmem:[#allocation2 + $0x28] ss:$16 sps:$4 sm:$0xff]   ;;  %v3985_v60 = vld [vmem:[#allocation2 + $0x24] ss:$16 sps:$4 sm:$0xff]   ;;  %v3988_v61 = vld [vmem:[#allocation2 + $0xc] ss:$16 sps:$4 sm:$0xff]   ;;  %v87_v63 = vpack.c.bf16 %v64_v57, %v63_v55 }
  0x1e   :  { %1146 = vmatpush1.bf16.msra.mxu0 %v3953_v31  ;;  %923 = vmatpush1.bf16.msra.mxu1 %v3959_v37  ;;  %v46_v1 = vld [vmem:[%s6808_s0 + $0x58] sm:$0xff]  ;;  %v3983_v2 = vld [vmem:[#allocation2 + $0x20] ss:$16 sps:$4 sm:$0xff]   ;;  %v3991_v4 = vld [vmem:[#allocation2 + $0x4] ss:$16 sps:$4 sm:$0xff]  }
  0x1f   :  { %1147 = vmatprep.subr.bf16.mxu0 %v3964_v35  ;;  %924 = vmatprep.subr.bf16.mxu1 %v3967_v39  ;;  %v3986_v3 = vld [vmem:[#allocation2 + $0x8] ss:$16 sps:$4 sm:$0xff]   ;;  %v3994_v5 = vld [vmem:[#allocation2 + $0x1ec] ss:$16 sps:$4 sm:$0xff]   ;;  %v65_v6 = vld [vmem:[%s6808_s0 + $0xf0] sm:$0xff]  ;;  %v78_v7 = vpack.c.bf16 %v46_v1, %v45_v62 }
  0x20   :  { %v66_v8 = vld [vmem:[%s6808_s0 + $0xf8] sm:$0xff]  ;;  %v3989_v9 = vld [vmem:[#allocation2] ss:$16 sps:$4 sm:$0xff]   ;;  %v3997_v11 = vld [vmem:[#allocation2 + $0x1e4] ss:$16 sps:$4 sm:$0xff]  }
  0x21   :  { %v3992_v10 = vld [vmem:[#allocation2 + $0x1e8] ss:$16 sps:$4 sm:$0xff]   ;;  %v4000_v12 = vld [vmem:[#allocation2 + $0x1cc] ss:$16 sps:$4 sm:$0xff]   ;;  %v47_v13 = vld [vmem:[%s6808_s0 + $0x60] sm:$0xff]  ;;  %v88_v15 = vpack.c.bf16 %v66_v8, %v65_v6 }
  0x22   :  { %1148 = vmatpush1.bf16.msra.mxu0 %v3962_v38  ;;  %925 = vmatpush1.bf16.msra.mxu1 %v3965_v44  ;;  %v48_v14 = vld [vmem:[%s6808_s0 + $0x68] sm:$0xff]  ;;  %v3995_v16 = vld [vmem:[#allocation2 + $0x1e0] ss:$16 sps:$4 sm:$0xff]   ;;  %v4003_v18 = vld [vmem:[#allocation2 + $0x1c4] ss:$16 sps:$4 sm:$0xff]  }
  0x23   :  { %1149 = vmatprep.subr.bf16.mxu0 %v3970_v40  ;;  %926 = vmatprep.subr.bf16.mxu1 %v3973_v46  ;;  %v3998_v17 = vld [vmem:[#allocation2 + $0x1c8] ss:$16 sps:$4 sm:$0xff]   ;;  %v4006_v19 = vld [vmem:[#allocation2 + $0x1ac] ss:$16 sps:$4 sm:$0xff]   ;;  %v67_v20 = vld [vmem:[%s6808_s0 + $0x100] sm:$0xff]  ;;  %v79_v24 = vpack.c.bf16 %v48_v14, %v47_v13 }
  0x24   :  { %3759 = vmatmul.mubr.msk.bf16.gmra.mxu0 %vm110_vm1, %v75_v28  ;;  %3769 = vmatmul.mubr.msk.bf16.gmra.mxu1 %vm110_vm1, %v85_v34  ;;  %v68_v21 = vld [vmem:[%s6808_s0 + $0x108] sm:$0xff]  ;;  %v4001_v22 = vld [vmem:[#allocation2 + $0x1c0] ss:$16 sps:$4 sm:$0xff]   ;;  %v4009_v23 = vld [vmem:[#allocation2 + $0x1a4] ss:$16 sps:$4 sm:$0xff]  }
  0x25   :  { %237 = vmatprep.mubr.bf16.mxu0 %v4346_v0  ;;  %337 = vmatprep.mubr.bf16.mxu1 %v4346_v0  ;;  %v4004_v25 = vld [vmem:[#allocation2 + $0x1a8] ss:$16 sps:$4 sm:$0xff]   ;;  %v4012_v26 = vld [vmem:[#allocation2 + $0x18c] ss:$16 sps:$4 sm:$0xff]   ;;  %v4007_v27 = vld [vmem:[#allocation2 + $0x1a0] ss:$16 sps:$4 sm:$0xff]   ;;  %v89_v30 = vpack.c.bf16 %v68_v21, %v67_v20 }
  0x26   :  { %1150 = vmatpush1.bf16.msra.mxu0 %v3968_v45  ;;  %927 = vmatpush1.bf16.msra.mxu1 %v3971_v51  ;;  %v49_v28 = vld [vmem:[%s6808_s0 + $0x70] sm:$0xff]  ;;  %v50_v29 = vld [vmem:[%s6808_s0 + $0x78] sm:$0xff]  ;;  %v51_v41 = vld [vmem:[%s6808_s0 + $0x80] sm:$0xff] }
  0x27   :  { %1151 = vmatprep.subr.bf16.mxu0 %v3976_v47  ;;  %928 = vmatprep.subr.bf16.mxu1 %v3979_v53  ;;  %v4015_v31 = vld [vmem:[#allocation2 + $0x184] ss:$16 sps:$4 sm:$0xff]   ;;  %v4010_v32 = vld [vmem:[#allocation2 + $0x188] ss:$16 sps:$4 sm:$0xff]   ;;  %v4021_v33 = vld [vmem:[#allocation2 + $0x16c] ss:$16 sps:$4 sm:$0xff]   ;;  %v80_v38 = vpack.c.bf16 %v50_v29, %v49_v28 }
  0x28   :  { %v69_v34 = vld [vmem:[%s6808_s0 + $0x110] sm:$0xff]  ;;  %v70_v35 = vld [vmem:[%s6808_s0 + $0x118] sm:$0xff]  ;;  %v71_v44 = vld [vmem:[%s6808_s0 + $0x120] sm:$0xff] }
  0x29   :  { %v4013_v36 = vld [vmem:[#allocation2 + $0x180] ss:$16 sps:$4 sm:$0xff]   ;;  %v4018_v37 = vld [vmem:[#allocation2 + $0x164] ss:$16 sps:$4 sm:$0xff]   ;;  %v4019_v39 = vld [vmem:[#allocation2 + $0x168] ss:$16 sps:$4 sm:$0xff]   ;;  %v90_v43 = vpack.c.bf16 %v70_v35, %v69_v34 }
  0x2a   :  { %1152 = vmatpush1.bf16.msra.mxu0 %v3974_v52  ;;  %929 = vmatpush1.bf16.msra.mxu1 %v3977_v58  ;;  %v4016_v40 = vld [vmem:[#allocation2 + $0x160] ss:$16 sps:$4 sm:$0xff]   ;;  %v72_v45 = vld [vmem:[%s6808_s0 + $0x128] sm:$0xff]  ;;  %v54_v48 = vld [vmem:[%s6808_s0 + $0x98] sm:$0xff] }
  0x2b   :  { %1153 = vmatprep.subr.bf16.mxu0 %v3982_v54  ;;  %930 = vmatprep.subr.bf16.mxu1 %v3985_v60  ;;  %v53_v47 = vld [vmem:[%s6808_s0 + $0x90] sm:$0xff]  ;;  %v4027_v51 = vld [vmem:[#allocation2 + $0x14c] ss:$16 sps:$4 sm:$0xff]   ;;  %v4025_v53 = vld [vmem:[#allocation2 + $0x148] ss:$16 sps:$4 sm:$0xff]  }
  0x2c   :  { %3760 = vmatmul.mubr.msk.bf16.gmra.mxu0 %vm110_vm1, %v76_v42  ;;  %3770 = vmatmul.mubr.msk.bf16.gmra.mxu1 %vm110_vm1, %v86_v49  ;;  %v52_v42 = vld [vmem:[%s6808_s0 + $0x88] sm:$0xff]  ;;  %v91_v49 = vpack.c.bf16 %v72_v45, %v71_v44  ;;  %v4024_v50 = vld [vmem:[#allocation2 + $0x144] ss:$16 sps:$4 sm:$0xff]   ;;  %v4022_v52 = vld [vmem:[#allocation2 + $0x140] ss:$16 sps:$4 sm:$0xff]   ;;  %v82_v54 = vpack.c.bf16 %v54_v48, %v53_v47 }
  0x2d   :  { %247 = vmatprep.mubr.bf16.mxu0 %v4346_v0  ;;  %347 = vmatprep.mubr.bf16.mxu1 %v4346_v0  ;;  %v81_v46 = vpack.c.bf16 %v52_v42, %v51_v41  ;;  %v4030_v55 = vld [vmem:[#allocation2 + $0x124] ss:$16 sps:$4 sm:$0xff]   ;;  %v4028_v57 = vld [vmem:[#allocation2 + $0x120] ss:$16 sps:$4 sm:$0xff]   ;;  %v4031_v58 = vld [vmem:[#allocation2 + $0x128] ss:$16 sps:$4 sm:$0xff]  }
  0x2e   :  { %1154 = vmatpush1.bf16.msra.mxu0 %v3980_v59  ;;  %931 = vmatpush1.bf16.msra.mxu1 %v3983_v2  ;;  %v4036_v59 = vld [vmem:[#allocation2 + $0x104] ss:$16 sps:$4 sm:$0xff]   ;;  %v4039_v60 = vld [vmem:[#allocation2 + $0x10c] ss:$16 sps:$4 sm:$0xff]   ;;  %v4037_v62 = vld [vmem:[#allocation2 + $0x108] ss:$16 sps:$4 sm:$0xff]   ;;  %v95_v2 = vlaneseq }
  0x2f   :  { %1155 = vmatprep.subr.bf16.mxu0 %v3988_v61  ;;  %932 = vmatprep.subr.bf16.mxu1 %v3991_v4  ;;  %v4034_v61 = vld [vmem:[#allocation2 + $0x100] ss:$16 sps:$4 sm:$0xff]   ;;  %v4045_v1 = vld [vmem:[%s6812_s4 + $0x22c] ss:$12 sps:$4 sm:$0xff]   ;;  %v4040_v28 = vld [vmem:[%s6812_s4 + $0xa8] ss:$12 sps:$4 sm:$0xff]  }
  0x30   :  { %v93_v6 = vld [vmem:[%s6810_s2] sm:$0x3]  ;;  %v4043_v29 = vld [vmem:[%s6812_s4 + $0x228] ss:$12 sps:$4 sm:$0xff]   ;;  %v4049_v41 = vld [vmem:[%s6812_s4 + $0x210] ss:$12 sps:$4 sm:$0xff]  }
  0x31   :  { %v4054_v45 = vld [vmem:[%s6812_s4 + $0x7c] ss:$12 sps:$4 sm:$0xff]  }
  0x32   :  { %1156 = vmatpush1.bf16.msra.mxu0 %v3986_v3  ;;  %933 = vmatpush1.bf16.msra.mxu1 %v3989_v9  ;;  %v4541_v3 = vshrl.u32 %v95_v2, 7  ;;  %v4061_v2 = vld [vmem:[%s6812_s4 + $0x1e0] ss:$12 sps:$4 sm:$0xff]  }
  0x33   :  { %1157 = vmatprep.subr.bf16.mxu0 %v3994_v5  ;;  %934 = vmatprep.subr.bf16.mxu1 %v3997_v11 }
  0x34   :  { %3761 = vmatmul.mubr.msk.bf16.gmra.mxu0 %vm110_vm1, %v77_v56  ;;  %3771 = vmatmul.mubr.msk.bf16.gmra.mxu1 %vm110_vm1, %v87_v63  ;;  %v4033_v56 = vld [vmem:[#allocation2 + $0x12c] ss:$16 sps:$4 sm:$0xff]   ;;  %6851 = vst [vmem:[#allocation5_spill] sm:$0xff] %v4541_v3  ;;  %v4544_v4 = vsub.s32 1, %v4541_v3  ;;  %v4547_v5 = vsub.s32 0, %v4541_v3 }
  0x35   :  { %257 = vmatprep.mubr.bf16.mxu0 %v4346_v0  ;;  %357 = vmatprep.mubr.bf16.mxu1 %v4346_v0  ;;  %v4042_v63 = vld [vmem:[%s6812_s4 + $0xac] ss:$12 sps:$4 sm:$0xff]  }
  0x36   :  { %1158 = vmatpush2.bf16.msra.mxu0 %v3992_v10  ;;  %935 = vmatpush2.bf16.msra.mxu1 %v3995_v16  ;;  %v4553_v8 = vrot.slane %v93_v6, %v4544_v4  ;;  %v4556_v9 = vrot.slane %v93_v6, %v4547_v5 }
  0x37   :  { %1159 = vmatprep.subr.bf16.mxu0 %v4000_v12  ;;  %936 = vmatprep.subr.bf16.mxu1 %v4003_v18 }
  0x3a   :  { %1160 = vmatpush2.bf16.msra.mxu0 %v3998_v17  ;;  %937 = vmatpush2.bf16.msra.mxu1 %v4001_v22 }
  0x3b   :  { %1161 = vmatprep.subr.bf16.mxu0 %v4006_v19  ;;  %938 = vmatprep.subr.bf16.mxu1 %v4009_v23 }
  0x3c   :  { %3762 = vmatmul.mubr.msk.bf16.gmra.mxu0 %vm110_vm1, %v78_v7  ;;  %3772 = vmatmul.mubr.msk.bf16.gmra.mxu1 %vm110_vm1, %v88_v15 }
  0x3d   :  { %267 = vmatprep.mubr.bf16.mxu0 %v4346_v0  ;;  %367 = vmatprep.mubr.bf16.mxu1 %v4346_v0 }
  0x3e   :  { %1162 = vmatpush2.bf16.msra.mxu0 %v4004_v25  ;;  %939 = vmatpush2.bf16.msra.mxu1 %v4007_v27 }
  0x3f   :  { %1163 = vmatprep.subr.bf16.mxu0 %v4012_v26  ;;  %940 = vmatprep.subr.bf16.mxu1 %v4015_v31 }
  0x42   :  { %1164 = vmatpush2.bf16.msra.mxu0 %v4010_v32  ;;  %941 = vmatpush2.bf16.msra.mxu1 %v4013_v36  ;;  %v4048_v32 = vld [vmem:[%s6812_s4 + $0x94] ss:$12 sps:$4 sm:$0xff]  }
  0x43   :  { %1165 = vmatprep.subr.bf16.mxu0 %v4021_v33  ;;  %942 = vmatprep.subr.bf16.mxu1 %v4018_v37  ;;  %v4051_v33 = vld [vmem:[%s6812_s4 + $0x214] ss:$12 sps:$4 sm:$0xff]  }
  0x44   :  { %3763 = vmatmul.mubr.msk.bf16.gmra.mxu0 %vm110_vm1, %v79_v24  ;;  %3773 = vmatmul.mubr.msk.bf16.gmra.mxu1 %vm110_vm1, %v89_v30 }
  0x45   :  { %277 = vmatprep.mubr.bf16.mxu0 %v4346_v0  ;;  %377 = vmatprep.mubr.bf16.mxu1 %v4346_v0 }
  0x46   :  { %1166 = vmatpush2.bf16.msra.mxu0 %v4019_v39  ;;  %943 = vmatpush2.bf16.msra.mxu1 %v4016_v40  ;;  %v4046_v40 = vld [vmem:[%s6812_s4 + $0x90] ss:$12 sps:$4 sm:$0xff]  }
  0x47   :  { %944 = vmatprep.subr.bf16.mxu1 %v4024_v50  ;;  %1167 = vmatprep.subr.bf16.mxu0 %v4027_v51 }
  0x4a   :  { %1168 = vmatpush2.bf16.msra.mxu0 %v4025_v53  ;;  %945 = vmatpush2.bf16.msra.mxu1 %v4022_v52  ;;  %v4052_v52 = vld [vmem:[%s6812_s4 + $0x78] ss:$12 sps:$4 sm:$0xff]  }
  0x4b   :  { %946 = vmatprep.subr.bf16.mxu1 %v4030_v55  ;;  %1169 = vmatprep.subr.bf16.mxu0 %v4033_v56  ;;  %v4055_v53 = vld [vmem:[%s6812_s4 + $0x1f8] ss:$12 sps:$4 sm:$0xff]  }
  0x4c   :  { %3764 = vmatmul.mubr.msk.bf16.gmra.mxu0 %vm110_vm1, %v80_v38  ;;  %3774 = vmatmul.mubr.msk.bf16.gmra.mxu1 %vm110_vm1, %v90_v43 }
  0x4d   :  { %287 = vmatprep.mubr.bf16.mxu0 %v4346_v0  ;;  %387 = vmatprep.mubr.bf16.mxu1 %v4346_v0 }
  0x4e   :  { %1170 = vmatpush2.bf16.msra.mxu0 %v4031_v58  ;;  %947 = vmatpush2.bf16.msra.mxu1 %v4028_v57  ;;  %v4060_v57 = vld [vmem:[%s6812_s4 + $0x64] ss:$12 sps:$4 sm:$0xff]  }
  0x4f   :  { %948 = vmatprep.subr.bf16.mxu1 %v4036_v59  ;;  %1171 = vmatprep.subr.bf16.mxu0 %v4039_v60  ;;  %v4063_v58 = vld [vmem:[%s6812_s4 + $0x1e4] ss:$12 sps:$4 sm:$0xff]  }
  0x52   :  { %1172 = vmatpush2.bf16.msra.mxu0 %v4037_v62  ;;  %949 = vmatpush2.bf16.msra.mxu1 %v4034_v61 }
  0x53   :  { %2249 = vmatprep.subr.bf16.mxu1 %v4042_v63  ;;  %2472 = vmatprep.subr.bf16.mxu0 %v4045_v1  ;;  %v4058_v1 = vld [vmem:[%s6812_s4 + $0x60] ss:$12 sps:$4 sm:$0xff]  }
  0x54   :  { %3765 = vmatmul.mubr.msk.bf16.gmra.mxu0 %vm110_vm1, %v81_v46  ;;  %3775 = vmatmul.mubr.msk.bf16.gmra.mxu1 %vm110_vm1, %v91_v49  ;;  %v4057_v46 = vld [vmem:[%s6812_s4 + $0x1fc] ss:$12 sps:$4 sm:$0xff]  }
  0x55   :  { %297 = vmatprep.mubr.bf16.mxu0 %v4346_v0 }
  0x5c   :  { %3766 = vmatmul.mubr.msk.bf16.gmra.mxu0 %vm110_vm1, %v82_v54 }
  0xd4   :  { %v209_v7 = vpop.f32.mrf.mxu0  ;;  %v4558_v11 = vpop.f32.mrf.mxu1 }
  0xd5   :  { %v210_v16 = vadd.f32 %v209_v7, %v4556_v9 }
  0xd6   :  { %v211_v10 = vpop.f32.mrf.mxu0  ;;  %v4562_v15 = vpop.f32.mrf.mxu1 }
  0xd7   :  { %v212_v13 = vadd.f32 %v211_v10, %v4553_v8  ;;  %v398_v25 = vmax.f32 %v210_v16, 0.0 }
  0xd8   :  { %v213_v12 = vpop.f32.mrf.mxu0  ;;  %v4566_v19 = vpop.f32.mrf.mxu1 }
  0xd9   :  { %v214_v14 = vadd.f32 %v213_v12, %v4556_v9  ;;  %v399_v22 = vmax.f32 %v212_v13, 0.0  ;;  %v4066_v12 = vld [vmem:[%s6812_s4 + $0x4c] ss:$12 sps:$4 sm:$0xff]  }
  0xda   :  { %v215_v17 = vpop.f32.mrf.mxu0  ;;  %v4568_v24 = vpop.f32.mrf.mxu1  ;;  %v4069_v13 = vld [vmem:[%s6812_s4 + $0x1cc] ss:$12 sps:$4 sm:$0xff]  }
  0xdb   :  { %v216_v18 = vadd.f32 %v215_v17, %v4553_v8  ;;  %v400_v20 = vmax.f32 %v214_v14, 0.0 }
  0xdc   :  { %v219_v21 = vpop.f32.mrf.mxu0  ;;  %v4582_v34 = vpop.f32.mrf.mxu1 }
  0xdd   :  { %v401_v23 = vmax.f32 %v216_v18, 0.0  ;;  %v474_v30 = vpack.c.bf16 %v400_v20, %v398_v25  ;;  %v220_v37 = vadd.f32 %v219_v21, %v4556_v9  ;;  %v4064_v21 = vld [vmem:[%s6812_s4 + $0x48] ss:$12 sps:$4 sm:$0xff]  }
  0xde   :  { %v221_v26 = vpop.f32.mrf.mxu0  ;;  %v4594_v44 = vpop.f32.mrf.mxu1 }
  0xdf   :  { %v475_v27 = vpack.c.bf16 %v401_v23, %v399_v22  ;;  %v222_v35 = vadd.f32 %v221_v26, %v4553_v8  ;;  %v402_v49 = vmax.f32 %v220_v37, 0.0  ;;  %v4067_v22 = vld [vmem:[%s6812_s4 + $0x1c8] ss:$12 sps:$4 sm:$0xff]  }
  0xe0   :  { %v223_v31 = vpop.f32.mrf.mxu0  ;;  %v4608_v56 = vpop.f32.mrf.mxu1 }
  0xe1   :  { %v224_v36 = vadd.f32 %v223_v31, %v4556_v9  ;;  %950 = vmatprep.mubr.bf16.mxu1 %v475_v27  ;;  %1173 = vmatprep.mubr.bf16.mxu0 %v475_v27  ;;  %v403_v47 = vmax.f32 %v222_v35, 0.0  ;;  %v4072_v27 = vld [vmem:[%s6812_s4 + $0x34] ss:$12 sps:$4 sm:$0xff]   ;;  %v4070_v35 = vld [vmem:[%s6812_s4 + $0x30] ss:$12 sps:$4 sm:$0xff]  }
  0xe2   :  { %v225_v38 = vpop.f32.mrf.mxu0  ;;  %951 = vmatmul.mubr.bf16.vlgmr.msra.gmra.mxu1 %v474_v30  ;;  %1174 = vmatmul.mubr.bf16.vlgmr.msra.gmra.mxu0 %v474_v30  ;;  %v4626_v10 = vpop.f32.mrf.mxu1 }
  0xe3   :  { %v226_v39 = vadd.f32 %v225_v38, %v4553_v8  ;;  %2250 = vmatpush1.bf16.msra.mxu1 %v4040_v28  ;;  %2473 = vmatpush1.bf16.msra.mxu0 %v4043_v29  ;;  %v404_v42 = vmax.f32 %v224_v36, 0.0  ;;  %v4075_v28 = vld [vmem:[%s6812_s4 + $0x1b4] ss:$12 sps:$4 sm:$0xff]   ;;  %v4073_v36 = vld [vmem:[%s6812_s4 + $0x1b0] ss:$12 sps:$4 sm:$0xff]  }
  0xe4   :  { %v229_v43 = vpop.f32.mrf.mxu0  ;;  %2251 = vmatprep.subr.bf16.mxu1 %v4048_v32  ;;  %2474 = vmatprep.subr.bf16.mxu0 %v4051_v33  ;;  %v4640_v26 = vpop.f32.mrf.mxu1 }
  0xe5   :  { %v405_v48 = vmax.f32 %v226_v39, 0.0  ;;  %v476_v54 = vpack.c.bf16 %v404_v42, %v402_v49  ;;  %v230_v61 = vadd.f32 %v229_v43, %v4556_v9  ;;  %v4079_v49 = vld [vmem:[%s6812_s4 + $0x198] ss:$12 sps:$4 sm:$0xff]  }
  0xe6   :  { %v231_v50 = vpop.f32.mrf.mxu0  ;;  %v4658_v39 = vpop.f32.mrf.mxu1 }
  0xe7   :  { %v477_v51 = vpack.c.bf16 %v405_v48, %v403_v47  ;;  %2252 = vmatpush1.bf16.msra.mxu1 %v4046_v40  ;;  %2475 = vmatpush1.bf16.msra.mxu0 %v4049_v41  ;;  %v232_v59 = vadd.f32 %v231_v50, %v4553_v8  ;;  %v406_v17 = vmax.f32 %v230_v61, 0.0  ;;  %v4078_v40 = vld [vmem:[%s6812_s4 + $0x1c] ss:$12 sps:$4 sm:$0xff]   ;;  %v4076_v48 = vld [vmem:[%s6812_s4 + $0x18] ss:$12 sps:$4 sm:$0xff]  }
  0xe8   :  { %v233_v55 = vpop.f32.mrf.mxu0  ;;  %2253 = vmatprep.subr.bf16.mxu1 %v4054_v45  ;;  %2476 = vmatprep.subr.bf16.mxu0 %v4057_v46  ;;  %v4081_v41 = vld [vmem:[%s6812_s4 + $0x19c] ss:$12 sps:$4 sm:$0xff]   ;;  %v4082_v61 = vld [vmem:[%s6812_s4] ss:$12 sps:$4 sm:$0xff]  }
  0xe9   :  { %v234_v60 = vadd.f32 %v233_v55, %v4556_v9  ;;  %960 = vmatprep.mubr.bf16.mxu1 %v477_v51  ;;  %1183 = vmatprep.mubr.bf16.mxu0 %v477_v51  ;;  %v407_v14 = vmax.f32 %v232_v59, 0.0 }
  0xea   :  { %v235_v62 = vpop.f32.mrf.mxu0  ;;  %961 = vmatmul.mubr.bf16.gmra.mxu1 %v476_v54  ;;  %1184 = vmatmul.mubr.bf16.gmra.mxu0 %v476_v54  ;;  %v4087_v54 = vld [vmem:[%s6812_s4 + $0x184] ss:$12 sps:$4 sm:$0xff]  }
  0xeb   :  { %v236_v63 = vadd.f32 %v235_v62, %v4553_v8  ;;  %2254 = vmatpush1.bf16.msra.mxu1 %v4052_v52  ;;  %2477 = vmatpush1.bf16.msra.mxu0 %v4055_v53  ;;  %v408_v6 = vmax.f32 %v234_v60, 0.0  ;;  %v4672_v52 = vpop.f32.mrf.mxu1  ;;  %v4084_v53 = vld [vmem:[%s6812_s4 + $0x4] ss:$12 sps:$4 sm:$0xff]   ;;  %v4085_v62 = vld [vmem:[%s6812_s4 + $0x180] ss:$12 sps:$4 sm:$0xff]  }
  0xec   :  { %v239_v7 = vpop.f32.mrf.mxu0  ;;  %2255 = vmatprep.subr.bf16.mxu1 %v4060_v57  ;;  %2478 = vmatprep.subr.bf16.mxu0 %v4063_v58 }
  0xed   :  { %v409_v16 = vmax.f32 %v236_v63, 0.0  ;;  %v478_v23 = vpack.c.bf16 %v408_v6, %v406_v17  ;;  %v240_v31 = vadd.f32 %v239_v7, %v4556_v9  ;;  %v4090_v6 = vld [vmem:[%s6812_s4 + $0x16c] ss:$12 sps:$4 sm:$0xff]  }
  0xee   :  { %v241_v18 = vpop.f32.mrf.mxu0  ;;  %v4093_v7 = vld [vmem:[%s6812_s4 + $0x2ec] ss:$12 sps:$4 sm:$0xff]  }
  0xef   :  { %v479_v20 = vpack.c.bf16 %v409_v16, %v407_v14  ;;  %2256 = vmatpush1.bf16.msra.mxu1 %v4058_v1  ;;  %2479 = vmatpush1.bf16.msra.mxu0 %v4061_v2  ;;  %v242_v29 = vadd.f32 %v241_v18, %v4553_v8  ;;  %v410_v45 = vmax.f32 %v240_v31, 0.0  ;;  %v4690_v2 = vpop.f32.mrf.mxu1  ;;  %v4088_v18 = vld [vmem:[%s6812_s4 + $0x168] ss:$12 sps:$4 sm:$0xff]  }
  0xf0   :  { %v243_v25 = vpop.f32.mrf.mxu0  ;;  %2257 = vmatprep.subr.bf16.mxu1 %v4066_v12  ;;  %2480 = vmatprep.subr.bf16.mxu0 %v4069_v13 }
  0xf1   :  { %v244_v30 = vadd.f32 %v243_v25, %v4556_v9  ;;  %970 = vmatprep.mubr.bf16.mxu1 %v479_v20  ;;  %1193 = vmatprep.mubr.bf16.mxu0 %v479_v20  ;;  %v411_v42 = vmax.f32 %v242_v29, 0.0  ;;  %v4091_v20 = vld [vmem:[%s6812_s4 + $0x2e8] ss:$12 sps:$4 sm:$0xff]  }
  0xf2   :  { %v245_v32 = vpop.f32.mrf.mxu0  ;;  %971 = vmatmul.mubr.bf16.gmra.mxu1 %v478_v23  ;;  %1194 = vmatmul.mubr.bf16.gmra.mxu0 %v478_v23  ;;  %v4704_v23 = vpop.f32.mrf.mxu1  ;;  %v4096_v25 = vld [vmem:[%s6812_s4 + $0x154] ss:$12 sps:$4 sm:$0xff]  }
  0xf3   :  { %v246_v33 = vadd.f32 %v245_v32, %v4553_v8  ;;  %2258 = vmatpush1.bf16.msra.mxu1 %v4064_v21  ;;  %2481 = vmatpush1.bf16.msra.mxu0 %v4067_v22  ;;  %v412_v37 = vmax.f32 %v244_v30, 0.0 }
  0xf4   :  { %v249_v38 = vpop.f32.mrf.mxu0  ;;  %2259 = vmatprep.subr.bf16.mxu1 %v4072_v27  ;;  %2482 = vmatprep.subr.bf16.mxu0 %v4075_v28  ;;  %v4099_v27 = vld [vmem:[%s6812_s4 + $0x2d4] ss:$12 sps:$4 sm:$0xff]  }
  0xf5   :  { %v413_v43 = vmax.f32 %v246_v33, 0.0  ;;  %v480_v50 = vpack.c.bf16 %v412_v37, %v410_v45  ;;  %v250_v58 = vadd.f32 %v249_v38, %v4556_v9  ;;  %v4094_v33 = vld [vmem:[%s6812_s4 + $0x150] ss:$12 sps:$4 sm:$0xff]   ;;  %v4722_v38 = vpop.f32.mrf.mxu1 }
  0xf6   :  { %v251_v46 = vpop.f32.mrf.mxu0 }
  0xf7   :  { %v481_v47 = vpack.c.bf16 %v413_v43, %v411_v42  ;;  %2260 = vmatpush1.bf16.msra.mxu1 %v4070_v35  ;;  %2483 = vmatpush1.bf16.msra.mxu0 %v4073_v36  ;;  %v252_v55 = vadd.f32 %v251_v46, %v4553_v8  ;;  %v414_v14 = vmax.f32 %v250_v58, 0.0  ;;  %v4097_v35 = vld [vmem:[%s6812_s4 + $0x2d0] ss:$12 sps:$4 sm:$0xff]  }
  0xf8   :  { %v253_v51 = vpop.f32.mrf.mxu0  ;;  %2261 = vmatprep.subr.bf16.mxu1 %v4078_v40  ;;  %2484 = vmatprep.subr.bf16.mxu0 %v4081_v41  ;;  %v4102_v40 = vld [vmem:[%s6812_s4 + $0x13c] ss:$12 sps:$4 sm:$0xff]  }
  0xf9   :  { %v254_v57 = vadd.f32 %v253_v51, %v4556_v9  ;;  %980 = vmatprep.mubr.bf16.mxu1 %v481_v47  ;;  %1203 = vmatprep.mubr.bf16.mxu0 %v481_v47  ;;  %v415_v12 = vmax.f32 %v252_v55, 0.0  ;;  %v4105_v41 = vld [vmem:[%s6812_s4 + $0x2bc] ss:$12 sps:$4 sm:$0xff]   ;;  %v4111_v55 = vld [vmem:[%s6812_s4 + $0x2a4] ss:$12 sps:$4 sm:$0xff]  }
  0xfa   :  { %v255_v59 = vpop.f32.mrf.mxu0  ;;  %981 = vmatmul.mubr.bf16.gmra.mxu1 %v480_v50  ;;  %1204 = vmatmul.mubr.bf16.gmra.mxu0 %v480_v50 }
  0xfb   :  { %v256_v60 = vadd.f32 %v255_v59, %v4553_v8  ;;  %2262 = vmatpush1.bf16.msra.mxu1 %v4076_v48  ;;  %2485 = vmatpush1.bf16.msra.mxu0 %v4079_v49  ;;  %v416_v63 = vmax.f32 %v254_v57, 0.0  ;;  %v4100_v48 = vld [vmem:[%s6812_s4 + $0x138] ss:$12 sps:$4 sm:$0xff]  }
  0xfc   :  { %v259_v1 = vpop.f32.mrf.mxu0  ;;  %2263 = vmatprep.subr.bf16.mxu1 %v4084_v53  ;;  %2486 = vmatprep.subr.bf16.mxu0 %v4087_v54  ;;  %v4103_v49 = vld [vmem:[%s6812_s4 + $0x2b8] ss:$12 sps:$4 sm:$0xff]   ;;  %v4736_v53 = vpop.f32.mrf.mxu1 }
  0xfd   :  { %v417_v13 = vmax.f32 %v256_v60, 0.0  ;;  %v482_v21 = vpack.c.bf16 %v416_v63, %v414_v14  ;;  %v260_v30 = vadd.f32 %v259_v1, %v4556_v9  ;;  %v4108_v54 = vld [vmem:[%s6812_s4 + $0x124] ss:$12 sps:$4 sm:$0xff]   ;;  %v4109_v63 = vld [vmem:[%s6812_s4 + $0x2a0] ss:$12 sps:$4 sm:$0xff]  }
  0xfe   :  { %v261_v16 = vpop.f32.mrf.mxu0 }
  0xff   :  { %v483_v17 = vpack.c.bf16 %v417_v13, %v415_v12  ;;  %2264 = vmatpush1.bf16.msra.mxu1 %v4082_v61  ;;  %2487 = vmatpush1.bf16.msra.mxu0 %v4085_v62  ;;  %v262_v28 = vadd.f32 %v261_v16, %v4553_v8  ;;  %v418_v45 = vmax.f32 %v260_v30, 0.0  ;;  %v4106_v62 = vld [vmem:[%s6812_s4 + $0x120] ss:$12 sps:$4 sm:$0xff]  }
 0x100   :  { %v263_v22 = vpop.f32.mrf.mxu0  ;;  %2265 = vmatprep.subr.bf16.mxu1 %v4090_v6  ;;  %2488 = vmatprep.subr.bf16.mxu0 %v4093_v7  ;;  %v4754_v7 = vpop.f32.mrf.mxu1  ;;  %v4114_v12 = vld [vmem:[%s6812_s4 + $0x10c] ss:$12 sps:$4 sm:$0xff]   ;;  %v4123_v30 = vld [vmem:[%s6812_s4 + $0x274] ss:$12 sps:$4 sm:$0xff]  }
 0x101   :  { %v264_v29 = vadd.f32 %v263_v22, %v4556_v9  ;;  %990 = vmatprep.mubr.bf16.mxu1 %v483_v17  ;;  %1213 = vmatprep.mubr.bf16.mxu0 %v483_v17  ;;  %v419_v42 = vmax.f32 %v262_v28, 0.0  ;;  %v4117_v13 = vld [vmem:[%s6812_s4 + $0x28c] ss:$12 sps:$4 sm:$0xff]   ;;  %v4115_v22 = vld [vmem:[%s6812_s4 + $0x288] ss:$12 sps:$4 sm:$0xff]  }
 0x102   :  { %v265_v31 = vpop.f32.mrf.mxu0  ;;  %991 = vmatmul.mubr.bf16.gmra.mxu1 %v482_v21  ;;  %1214 = vmatmul.mubr.bf16.gmra.mxu0 %v482_v21  ;;  %v4112_v21 = vld [vmem:[%s6812_s4 + $0x108] ss:$12 sps:$4 sm:$0xff]   ;;  %v4768_v28 = vpop.f32.mrf.mxu1 }
 0x103   :  { %v266_v32 = vadd.f32 %v265_v31, %v4553_v8  ;;  %2266 = vmatpush2.bf16.msra.mxu1 %v4088_v18  ;;  %2489 = vmatpush2.bf16.msra.mxu0 %v4091_v20  ;;  %v420_v36 = vmax.f32 %v264_v29, 0.0  ;;  %v4120_v29 = vld [vmem:[%s6812_s4 + $0xf4] ss:$12 sps:$4 sm:$0xff]  }
 0x104   :  { %v269_v37 = vpop.f32.mrf.mxu0  ;;  %2267 = vmatprep.subr.bf16.mxu1 %v4096_v25  ;;  %2490 = vmatprep.subr.bf16.mxu0 %v4099_v27 }
 0x105   :  { %v421_v43 = vmax.f32 %v266_v32, 0.0  ;;  %v484_v50 = vpack.c.bf16 %v420_v36, %v418_v45  ;;  %v270_v59 = vadd.f32 %v269_v37, %v4556_v9  ;;  %v4118_v37 = vld [vmem:[%s6812_s4 + $0xf0] ss:$12 sps:$4 sm:$0xff]  }
 0x106   :  { %v271_v46 = vpop.f32.mrf.mxu0  ;;  %v4126_v45 = vld [vmem:[%s6812_s4 + $0xdc] ss:$12 sps:$4 sm:$0xff]  }
 0x107   :  { %v485_v47 = vpack.c.bf16 %v421_v43, %v419_v42  ;;  %2268 = vmatpush2.bf16.msra.mxu1 %v4094_v33  ;;  %2491 = vmatpush2.bf16.msra.mxu0 %v4097_v35  ;;  %v272_v57 = vadd.f32 %v271_v46, %v4553_v8  ;;  %v422_v17 = vmax.f32 %v270_v59, 0.0  ;;  %v4786_v43 = vpop.f32.mrf.mxu1  ;;  %v4129_v46 = vld [vmem:[%s6812_s4 + $0x25c] ss:$12 sps:$4 sm:$0xff]  }
 0x108   :  { %v273_v51 = vpop.f32.mrf.mxu0  ;;  %2269 = vmatprep.subr.bf16.mxu1 %v4102_v40  ;;  %2492 = vmatprep.subr.bf16.mxu0 %v4105_v41  ;;  %v4121_v40 = vld [vmem:[%s6812_s4 + $0x270] ss:$12 sps:$4 sm:$0xff]  }
 0x109   :  { %v274_v58 = vadd.f32 %v273_v51, %v4556_v9  ;;  %1000 = vmatprep.mubr.bf16.mxu1 %v485_v47  ;;  %1223 = vmatprep.mubr.bf16.mxu0 %v485_v47  ;;  %v423_v14 = vmax.f32 %v272_v57, 0.0  ;;  %v4800_v59 = vpop.f32.mrf.mxu1 }
 0x10a   :  { %v275_v60 = vpop.f32.mrf.mxu0  ;;  %1001 = vmatmul.mubr.bf16.gmra.mxu1 %v484_v50  ;;  %1224 = vmatmul.mubr.bf16.gmra.mxu0 %v484_v50 }
 0x10b   :  { %v276_v61 = vadd.f32 %v275_v60, %v4553_v8  ;;  %2270 = vmatpush2.bf16.msra.mxu1 %v4100_v48  ;;  %2493 = vmatpush2.bf16.msra.mxu0 %v4103_v49  ;;  %v424_v1 = vmax.f32 %v274_v58, 0.0 }
 0x10c   :  { %v279_v6 = vpop.f32.mrf.mxu0  ;;  %2271 = vmatprep.subr.bf16.mxu1 %v4108_v54  ;;  %2494 = vmatprep.subr.bf16.mxu0 %v4111_v55  ;;  %v4124_v54 = vld [vmem:[%s6812_s4 + $0xd8] ss:$12 sps:$4 sm:$0xff]  }
 0x10d   :  { %v425_v16 = vmax.f32 %v276_v61, 0.0  ;;  %v486_v25 = vpack.c.bf16 %v424_v1, %v422_v17  ;;  %v280_v33 = vadd.f32 %v279_v6, %v4556_v9  ;;  %v4127_v55 = vld [vmem:[%s6812_s4 + $0x258] ss:$12 sps:$4 sm:$0xff]  }
 0x10e   :  { %v281_v18 = vpop.f32.mrf.mxu0 }
 0x10f   :  { %v487_v20 = vpack.c.bf16 %v425_v16, %v423_v14  ;;  %2272 = vmatpush2.bf16.msra.mxu1 %v4106_v62  ;;  %2495 = vmatpush2.bf16.msra.mxu0 %v4109_v63  ;;  %v282_v31 = vadd.f32 %v281_v18, %v4553_v8  ;;  %v426_v49 = vmax.f32 %v280_v33, 0.0 }
 0x110   :  { %v283_v27 = vpop.f32.mrf.mxu0  ;;  %2273 = vmatprep.subr.bf16.mxu1 %v4114_v12  ;;  %2496 = vmatprep.subr.bf16.mxu0 %v4117_v13  ;;  %v4806_v13 = vpop.f32.mrf.mxu1 }
 0x111   :  { %v284_v32 = vadd.f32 %v283_v27, %v4556_v9  ;;  %1010 = vmatprep.mubr.bf16.mxu1 %v487_v20  ;;  %1233 = vmatprep.mubr.bf16.mxu0 %v487_v20  ;;  %v427_v47 = vmax.f32 %v282_v31, 0.0  ;;  %v312_v20 = vadd.f32 %v4562_v15, %v4553_v8 }
 0x112   :  { %v285_v35 = vpop.f32.mrf.mxu0  ;;  %1011 = vmatmul.mubr.bf16.gmra.mxu1 %v486_v25  ;;  %1234 = vmatmul.mubr.bf16.gmra.mxu0 %v486_v25 }
 0x113   :  { %v286_v36 = vadd.f32 %v285_v35, %v4553_v8  ;;  %2274 = vmatpush2.bf16.msra.mxu1 %v4112_v21  ;;  %2497 = vmatpush2.bf16.msra.mxu0 %v4115_v22  ;;  %v428_v41 = vmax.f32 %v284_v32, 0.0  ;;  %v316_v22 = vadd.f32 %v4568_v24, %v4553_v8  ;;  %v439_v15 = vmax.f32 %v312_v20, 0.0 }
 0x114   :  { %v289_v42 = vpop.f32.mrf.mxu0  ;;  %2275 = vmatprep.subr.bf16.mxu1 %v4120_v29  ;;  %2498 = vmatprep.subr.bf16.mxu0 %v4123_v30  ;;  %v4812_v29 = vpop.f32.mrf.mxu1 }
 0x115   :  { %v429_v48 = vmax.f32 %v286_v36, 0.0  ;;  %v488_v57 = vpack.c.bf16 %v428_v41, %v426_v49  ;;  %v290_v62 = vadd.f32 %v289_v42, %v4556_v9  ;;  %v441_v36 = vmax.f32 %v316_v22, 0.0 }
 0x116   :  { %v291_v50 = vpop.f32.mrf.mxu0  ;;  %v310_v49 = vadd.f32 %v4558_v11, %v4556_v9 }
 0x117   :  { %v489_v51 = vpack.c.bf16 %v429_v48, %v427_v47  ;;  %2276 = vmatpush2.bf16.msra.mxu1 %v4118_v37  ;;  %2499 = vmatpush2.bf16.msra.mxu0 %v4121_v40  ;;  %v292_v60 = vadd.f32 %v291_v50, %v4553_v8  ;;  %v430_v17 = vmax.f32 %v290_v62, 0.0  ;;  %v4818_v37 = vpop.f32.mrf.mxu1  ;;  %v495_v47 = vpack.c.bf16 %v441_v36, %v439_v15 }
 0x118   :  { %v293_v58 = vpop.f32.mrf.mxu0  ;;  %2277 = vmatprep.subr.bf16.mxu1 %v4126_v45  ;;  %2500 = vmatprep.subr.bf16.mxu0 %v4129_v46  ;;  %v322_v45 = vadd.f32 %v4594_v44, %v4553_v8  ;;  %v326_v48 = vadd.f32 %v4626_v10, %v4553_v8  ;;  %v4132_v44 = vld [vmem:[%s6812_s4 + $0xc4] ss:$12 sps:$4 sm:$0xff]   ;;  %v332_v62 = vadd.f32 %v4658_v39, %v4553_v8 }
 0x119   :  { %v294_v61 = vadd.f32 %v293_v58, %v4556_v9  ;;  %1020 = vmatprep.mubr.bf16.mxu1 %v489_v51  ;;  %1243 = vmatprep.mubr.bf16.mxu0 %v489_v51  ;;  %v431_v14 = vmax.f32 %v292_v60, 0.0  ;;  %v314_v51 = vadd.f32 %v4566_v19, %v4556_v9  ;;  %v4135_v10 = vld [vmem:[%s6812_s4 + $0x244] ss:$12 sps:$4 sm:$0xff]   ;;  %v4130_v19 = vld [vmem:[%s6812_s4 + $0xc0] ss:$12 sps:$4 sm:$0xff]   ;;  %v438_v58 = vmax.f32 %v310_v49, 0.0 }
 0x11a   :  { %v295_v63 = vpop.f32.mrf.mxu0  ;;  %1021 = vmatmul.mubr.bf16.gmra.mxu1 %v488_v57  ;;  %1244 = vmatmul.mubr.bf16.gmra.mxu0 %v488_v57  ;;  %v445_v11 = vmax.f32 %v326_v48, 0.0  ;;  %v4133_v57 = vld [vmem:[%s6812_s4 + $0x240] ss:$12 sps:$4 sm:$0xff]   ;;  %v354_v49 = vadd.f32 %v4800_v59, %v4556_v9 }
 0x11b   :  { %v296_v1 = vadd.f32 %v295_v63, %v4553_v8  ;;  %2278 = vmatpush2.bf16.msra.mxu1 %v4124_v54  ;;  %2501 = vmatpush2.bf16.msra.mxu0 %v4127_v55  ;;  %v432_v6 = vmax.f32 %v294_v61, 0.0  ;;  %v4828_v54 = vpop.f32.mrf.mxu1  ;;  %v443_v55 = vmax.f32 %v322_v45, 0.0  ;;  %v440_v60 = vmax.f32 %v314_v51, 0.0 }
 0x11c   :  { %v299_v12 = vpop.f32.mrf.mxu0  ;;  %2279 = vmatprep.subr.bf16.mxu1 %v4132_v44  ;;  %2502 = vmatprep.subr.bf16.mxu0 %v4135_v10  ;;  %v364_v59 = vadd.f32 %v4828_v54, %v4556_v9 }
 0x11d   :  { %v433_v16 = vmax.f32 %v296_v1, 0.0  ;;  %v490_v25 = vpack.c.bf16 %v432_v6, %v430_v17  ;;  %v300_v32 = vadd.f32 %v299_v12, %v4556_v9  ;;  %v365_v61 = vpop.f32.mrf.mxu1  ;;  %v497_v63 = vpack.c.bf16 %v445_v11, %v443_v55 }
 0x11e   :  { %v301_v18 = vpop.f32.mrf.mxu0  ;;  %v336_v1 = vadd.f32 %v4690_v2, %v4553_v8  ;;  %v494_v6 = vpack.c.bf16 %v440_v60, %v438_v58  ;;  %v320_v12 = vadd.f32 %v4582_v34, %v4556_v9  ;;  %v447_v17 = vmax.f32 %v332_v62, 0.0 }
 0x11f   :  { %v491_v21 = vpack.c.bf16 %v433_v16, %v431_v14  ;;  %v302_v30 = vadd.f32 %v301_v18, %v4553_v8  ;;  %v434_v42 = vmax.f32 %v300_v32, 0.0  ;;  %2280 = vmatpush2.bf16.msra.mxu1 %v4130_v19  ;;  %2503 = vmatpush2.bf16.msra.mxu0 %v4133_v57  ;;  %v324_v14 = vadd.f32 %v4608_v56, %v4556_v9  ;;  %v4852_v16 = vpop.f32.mrf.mxu1 }
 0x120   :  { %v303_v27 = vpop.f32.mrf.mxu0  ;;  %2695 = vmatprep.subr.bf16.mxu1 %v4346_v0  ;;  %2880 = vmatprep.subr.bf16.mxu0 %v4346_v0  ;;  %v449_v18 = vmax.f32 %v336_v1, 0.0  ;;  %v442_v39 = vmax.f32 %v320_v12, 0.0  ;;  %v342_v2 = vadd.f32 %v4722_v38, %v4553_v8  ;;  %v346_v34 = vadd.f32 %v4754_v7, %v4553_v8 }
 0x121   :  { %v304_v31 = vadd.f32 %v303_v27, %v4556_v9  ;;  %1030 = vmatprep.mubr.bf16.mxu1 %v491_v21  ;;  %1253 = vmatprep.mubr.bf16.mxu0 %v491_v21  ;;  %v435_v40 = vmax.f32 %v302_v30, 0.0  ;;  %v444_v20 = vmax.f32 %v324_v14, 0.0  ;;  %v371_v21 = vpop.f32.mrf.mxu1  ;;  %v330_v56 = vadd.f32 %v4640_v26, %v4556_v9 }
 0x122   :  { %v305_v33 = vpop.f32.mrf.mxu0  ;;  %1031 = vmatmul.mubr.bf16.gmra.mxu1 %v490_v25  ;;  %1254 = vmatmul.mubr.bf16.gmra.mxu0 %v490_v25  ;;  %v499_v22 = vpack.c.bf16 %v449_v18, %v447_v17  ;;  %v334_v27 = vadd.f32 %v4672_v52, %v4556_v9  ;;  %v453_v32 = vmax.f32 %v346_v34, 0.0  ;;  %v352_v7 = vadd.f32 %v4786_v43, %v4553_v8 }
 0x123   :  { %v306_v35 = vadd.f32 %v305_v33, %v4553_v8  ;;  %v436_v24 = vmax.f32 %v304_v31, 0.0  ;;  %v496_v25 = vpack.c.bf16 %v444_v20, %v442_v39  ;;  %v4862_v30 = vpop.f32.mrf.mxu1  ;;  %v451_v31 = vmax.f32 %v342_v2, 0.0 }
 0x124   :  { %v446_v38 = vmax.f32 %v330_v56, 0.0  ;;  %v448_v33 = vmax.f32 %v334_v27, 0.0  ;;  %v356_v26 = vadd.f32 %v4806_v13, %v4553_v8  ;;  %v340_v52 = vadd.f32 %v4704_v23, %v4556_v9 }
 0x125   :  { %v437_v41 = vmax.f32 %v306_v35, 0.0  ;;  %v492_v50 = vpack.c.bf16 %v436_v24, %v434_v42  ;;  %v375_v15 = vpop.f32.mrf.mxu1  ;;  %v501_v35 = vpack.c.bf16 %v453_v32, %v451_v31  ;;  %v344_v24 = vadd.f32 %v4736_v53, %v4556_v9 }
 0x126   :  { %v498_v36 = vpack.c.bf16 %v448_v33, %v446_v38  ;;  %v457_v42 = vmax.f32 %v356_v26, 0.0  ;;  %v450_v45 = vmax.f32 %v340_v52, 0.0  ;;  %v362_v13 = vadd.f32 %v4818_v37, %v4553_v8 }
 0x127   :  { %v493_v46 = vpack.c.bf16 %v437_v41, %v435_v40  ;;  %v379_v40 = vpop.f32.mrf.mxu1  ;;  %v455_v41 = vmax.f32 %v352_v7, 0.0  ;;  %v452_v43 = vmax.f32 %v344_v24, 0.0  ;;  %v366_v48 = vadd.f32 %v365_v61, %v4553_v8 }
 0x128   :  { %v350_v53 = vadd.f32 %v4768_v28, %v4556_v9  ;;  %v459_v51 = vmax.f32 %v362_v13, 0.0  ;;  %v456_v55 = vmax.f32 %v354_v49, 0.0  ;;  %v372_v11 = vadd.f32 %v371_v21, %v4553_v8 }
 0x129   :  { %1040 = vmatprep.mubr.bf16.mxu1 %v493_v46  ;;  %1263 = vmatprep.mubr.bf16.mxu0 %v493_v46  ;;  %v381_v46 = vpop.f32.mrf.mxu1  ;;  %v500_v23 = vpack.c.bf16 %v452_v43, %v450_v45  ;;  %v461_v44 = vmax.f32 %v366_v48, 0.0  ;;  %v376_v57 = vadd.f32 %v375_v15, %v4553_v8  ;;  %v360_v28 = vadd.f32 %v4812_v29, %v4556_v9 }
 0x12a   :  { %1041 = vmatmul.mubr.bf16.gmra.mxu1 %v492_v50  ;;  %1264 = vmatmul.mubr.bf16.gmra.mxu0 %v492_v50  ;;  %v454_v10 = vmax.f32 %v350_v53, 0.0  ;;  %v463_v61 = vmax.f32 %v372_v11, 0.0  ;;  %v460_v1 = vmax.f32 %v364_v59, 0.0  ;;  %v382_v12 = vadd.f32 %v381_v46, %v4553_v8 }
 0x12b   :  { %1050 = vmatprep.mubr.bf16.mxu1 %v495_v47  ;;  %1273 = vmatprep.mubr.bf16.mxu0 %v495_v47  ;;  %v503_v47 = vpack.c.bf16 %v457_v42, %v455_v41  ;;  %v383_v50 = vpop.f32.mrf.mxu1  ;;  %v505_v19 = vpack.c.bf16 %v461_v44, %v459_v51  ;;  %v465_v62 = vmax.f32 %v376_v57, 0.0  ;;  %v370_v29 = vadd.f32 %v4852_v16, %v4556_v9  ;;  %v576_v42 = vld [vmem:[%s6810_s2 + $0x2] sm:$0xf] }
 0x12c   :  { %v502_v58 = vpack.c.bf16 %v456_v55, %v454_v10  ;;  %v374_v54 = vadd.f32 %v4862_v30, %v4556_v9  ;;  %v467_v20 = vmax.f32 %v382_v12, 0.0  ;;  %v380_v16 = vadd.f32 %v379_v40, %v4556_v9 }
 0x12d   :  { %v385_v37 = vpop.f32.mrf.mxu1  ;;  %v507_v14 = vpack.c.bf16 %v465_v62, %v463_v61  ;;  %v462_v2 = vmax.f32 %v370_v29, 0.0  ;;  %v384_v30 = vadd.f32 %v383_v50, %v4556_v9  ;;  %v592_v40 = vsub.s32 3, %v4541_v3 }
 0x12e   :  { %v386_v17 = vadd.f32 %v385_v37, %v4553_v8  ;;  %v466_v33 = vmax.f32 %v380_v16, 0.0  ;;  %v6814_v41 = vsub.s32 2, %v4541_v3  ;;  %v4908_v13 = vrot.slane %v576_v42, %v4547_v5 }
 0x12f   :  { %v389_v60 = vpop.f32.mrf.mxu1  ;;  %v468_v15 = vmax.f32 %v384_v30, 0.0  ;;  %v4905_v46 = vrot.slane %v576_v42, %v592_v40 }
 0x130   :  { %v469_v21 = vmax.f32 %v386_v17, 0.0  ;;  %v390_v26 = vadd.f32 %v389_v60, %v4556_v9 }
 0x132   :  { %1051 = vmatmul.mubr.bf16.gmra.mxu1 %v494_v6  ;;  %1274 = vmatmul.mubr.bf16.gmra.mxu0 %v494_v6  ;;  %v391_v6 = vpop.f32.mrf.mxu1  ;;  %v509_v56 = vpack.c.bf16 %v469_v21, %v467_v20  ;;  %v4137_v20 = vld [vmem:[%s6812_s4 + $0x230] ss:$12 sps:$4 sm:$0xff]  }
 0x133   :  { %1060 = vmatprep.mubr.bf16.mxu1 %v497_v63  ;;  %1283 = vmatprep.mubr.bf16.mxu0 %v497_v63  ;;  %v458_v63 = vmax.f32 %v360_v28, 0.0 }
 0x134   :  { %v393_v39 = vpop.f32.mrf.mxu1 }
 0x135   :  { %v504_v18 = vpack.c.bf16 %v460_v1, %v458_v63 }
 0x136   :  { %v395_v34 = vpop.f32.mrf.mxu1 }
 0x137   :  { %v396_v27 = vadd.f32 %v395_v34, %v4553_v8 }
 0x139   :  { %v473_v38 = vmax.f32 %v396_v27, 0.0 }
 0x13a   :  { %1061 = vmatmul.mubr.bf16.gmra.mxu1 %v496_v25  ;;  %1284 = vmatmul.mubr.bf16.gmra.mxu0 %v496_v25  ;;  %v392_v25 = vadd.f32 %v391_v6, %v4553_v8  ;;  %v470_v8 = vmax.f32 %v390_v26, 0.0 }
 0x13b   :  { %1070 = vmatprep.mubr.bf16.mxu1 %v499_v22  ;;  %1293 = vmatprep.mubr.bf16.mxu0 %v499_v22  ;;  %v464_v22 = vmax.f32 %v374_v54, 0.0 }
 0x13c   :  { %v471_v32 = vmax.f32 %v392_v25, 0.0 }
 0x13d   :  { %v506_v31 = vpack.c.bf16 %v464_v22, %v462_v2 }
 0x13e   :  { %v511_v7 = vpack.c.bf16 %v473_v38, %v471_v32 }
 0x142   :  { %1071 = vmatmul.mubr.bf16.gmra.mxu1 %v498_v36  ;;  %1294 = vmatmul.mubr.bf16.gmra.mxu0 %v498_v36  ;;  %v394_v36 = vadd.f32 %v393_v39, %v4556_v9  ;;  %v4903_v9 = vrot.slane %v576_v42, %v4544_v4  ;;  %v4136_v39 = vld [vmem:[%s6812_s4 + $0xb0] ss:$12 sps:$4 sm:$0xff]  }
 0x143   :  { %1080 = vmatprep.mubr.bf16.mxu1 %v501_v35  ;;  %1303 = vmatprep.mubr.bf16.mxu0 %v501_v35  ;;  %v508_v35 = vpack.c.bf16 %v468_v15, %v466_v33 }
 0x144   :  { %v472_v52 = vmax.f32 %v394_v36, 0.0 }
 0x146   :  { %v510_v24 = vpack.c.bf16 %v472_v52, %v470_v8  ;;  %v4139_v52 = vld [vmem:[%s6812_s4 + $0x218] ss:$12 sps:$4 sm:$0xff]  }
 0x14a   :  { %1081 = vmatmul.mubr.bf16.gmra.mxu1 %v500_v23  ;;  %1304 = vmatmul.mubr.bf16.gmra.mxu0 %v500_v23 }
 0x14b   :  { %1090 = vmatprep.mubr.bf16.mxu1 %v503_v47  ;;  %1313 = vmatprep.mubr.bf16.mxu0 %v503_v47  ;;  %v4912_v47 = vrot.slane %v576_v42, %v6814_v41 }
 0x152   :  { %1091 = vmatmul.mubr.bf16.gmra.mxu1 %v502_v58  ;;  %1314 = vmatmul.mubr.bf16.gmra.mxu0 %v502_v58 }
 0x153   :  { %1100 = vmatprep.mubr.bf16.mxu1 %v505_v19  ;;  %1323 = vmatprep.mubr.bf16.mxu0 %v505_v19 }
 0x15a   :  { %1101 = vmatmul.mubr.bf16.gmra.mxu1 %v504_v18  ;;  %1324 = vmatmul.mubr.bf16.gmra.mxu0 %v504_v18 }
 0x15b   :  { %1110 = vmatprep.mubr.bf16.mxu1 %v507_v14  ;;  %1333 = vmatprep.mubr.bf16.mxu0 %v507_v14 }
 0x162   :  { %1111 = vmatmul.mubr.bf16.gmra.mxu1 %v506_v31  ;;  %1334 = vmatmul.mubr.bf16.gmra.mxu0 %v506_v31 }
 0x163   :  { %1120 = vmatprep.mubr.bf16.mxu1 %v509_v56  ;;  %1343 = vmatprep.mubr.bf16.mxu0 %v509_v56 }
 0x16a   :  { %1121 = vmatmul.mubr.bf16.gmra.mxu1 %v508_v35  ;;  %1344 = vmatmul.mubr.bf16.gmra.mxu0 %v508_v35 }
 0x16b   :  { %1130 = vmatprep.mubr.bf16.mxu1 %v511_v7  ;;  %1353 = vmatprep.mubr.bf16.mxu0 %v511_v7  ;;  %v4138_v7 = vld [vmem:[%s6812_s4 + $0x98] ss:$12 sps:$4 sm:$0xff]  }
 0x172   :  { %1131 = vmatmul.mubr.bf16.gmra.mxu1 %v510_v24  ;;  %1354 = vmatmul.mubr.bf16.gmra.mxu0 %v510_v24 }
 0x1a2   :  { %v952_v45 = vpop.f32.mrf.mxu1  ;;  %v1175_v43 = vpop.f32.mrf.mxu0 }
 0x1a3   :  { %v953_v55 = vadd.f32 %v952_v45, %v4908_v13  ;;  %v1176_v37 = vadd.f32 %v1175_v43, %v4912_v47 }
 0x1a4   :  { %v954_v48 = vpop.f32.mrf.mxu1  ;;  %v1177_v23 = vpop.f32.mrf.mxu0 }
 0x1a5   :  { %v955_v50 = vadd.f32 %v954_v48, %v4903_v9  ;;  %v1178_v51 = vadd.f32 %v1177_v23, %v4905_v46  ;;  %v1364_v12 = vmax.f32 %v953_v55, 0.0  ;;  %v1366_v14 = vmax.f32 %v1176_v37, 0.0 }
 0x1a6   :  { %v956_v53 = vpop.f32.mrf.mxu1  ;;  %v1179_v49 = vpop.f32.mrf.mxu0 }
 0x1a7   :  { %v957_v44 = vadd.f32 %v956_v53, %v4908_v13  ;;  %v1180_v10 = vadd.f32 %v1179_v49, %v4912_v47  ;;  %v1365_v62 = vmax.f32 %v955_v50, 0.0  ;;  %v1367_v63 = vmax.f32 %v1178_v51, 0.0  ;;  %v4140_v51 = vld [vmem:[%s6812_s4 + $0x80] ss:$12 sps:$4 sm:$0xff]  }
 0x1a8   :  { %v958_v11 = vpop.f32.mrf.mxu1  ;;  %v1181_v19 = vpop.f32.mrf.mxu0 }
 0x1a9   :  { %v959_v57 = vadd.f32 %v958_v11, %v4903_v9  ;;  %v1182_v58 = vadd.f32 %v1181_v19, %v4905_v46  ;;  %v1368_v28 = vmax.f32 %v957_v44, 0.0  ;;  %v1370_v59 = vmax.f32 %v1180_v10, 0.0  ;;  %v4141_v19 = vld [vmem:[%s6812_s4 + $0x200] ss:$12 sps:$4 sm:$0xff]  }
 0x1aa   :  { %v962_v60 = vpop.f32.mrf.mxu1  ;;  %v1185_v61 = vpop.f32.mrf.mxu0 }
 0x1ab   :  { %v1369_v1 = vmax.f32 %v959_v57, 0.0  ;;  %v1371_v6 = vmax.f32 %v1182_v58, 0.0  ;;  %v4932_v21 = vpack.c.bf16 %v1368_v28, %v1364_v12  ;;  %v4934_v2 = vpack.c.bf16 %v1370_v59, %v1366_v14 }
 0x1ac   :  { %v964_v17 = vpop.f32.mrf.mxu1  ;;  %v1187_v18 = vpop.f32.mrf.mxu0  ;;  %v963_v16 = vadd.f32 %v962_v60, %v4908_v13  ;;  %v1186_v30 = vadd.f32 %v1185_v61, %v4912_v47 }
 0x1ad   :  { %v4922_v29 = vpack.c.bf16 %v1369_v1, %v1365_v62  ;;  %v4924_v54 = vpack.c.bf16 %v1371_v6, %v1367_v63  ;;  %v965_v22 = vadd.f32 %v964_v17, %v4903_v9  ;;  %v1188_v56 = vadd.f32 %v1187_v18, %v4905_v46  ;;  %v4142_v6 = vld [vmem:[%s6812_s4 + $0x68] ss:$12 sps:$4 sm:$0xff]  }
 0x1ae   :  { %v966_v34 = vpop.f32.mrf.mxu1  ;;  %v1189_v25 = vpop.f32.mrf.mxu0  ;;  %v1372_v43 = vmax.f32 %v963_v16, 0.0  ;;  %v1374_v48 = vmax.f32 %v1186_v30, 0.0 }
 0x1af   :  { %v967_v27 = vadd.f32 %v966_v34, %v4908_v13  ;;  %v1190_v31 = vadd.f32 %v1189_v25, %v4912_v47  ;;  %2281 = vmatprep.mubr.bf16.mxu1 %v4922_v29  ;;  %2504 = vmatprep.mubr.bf16.mxu0 %v4924_v54  ;;  %v1373_v24 = vmax.f32 %v965_v22, 0.0  ;;  %v1375_v40 = vmax.f32 %v1188_v56, 0.0 }
 0x1b0   :  { %v968_v32 = vpop.f32.mrf.mxu1  ;;  %v1191_v38 = vpop.f32.mrf.mxu0  ;;  %2282 = vmatmul.mubr.bf16.vlgmr.msra.gmra.mxu1 %v4932_v21  ;;  %2505 = vmatmul.mubr.bf16.vlgmr.msra.gmra.mxu0 %v4934_v2 }
 0x1b1   :  { %v969_v33 = vadd.f32 %v968_v32, %v4903_v9  ;;  %v1192_v15 = vadd.f32 %v1191_v38, %v4905_v46  ;;  %2696 = vmatpush1.bf16.msra.mxu1 %v4136_v39  ;;  %2881 = vmatpush1.bf16.msra.mxu0 %v4137_v20  ;;  %v1376_v35 = vmax.f32 %v967_v27, 0.0  ;;  %v1378_v26 = vmax.f32 %v1190_v31, 0.0  ;;  %v4143_v39 = vld [vmem:[%s6812_s4 + $0x1e8] ss:$12 sps:$4 sm:$0xff]   ;;  %v4144_v38 = vld [vmem:[%s6812_s4 + $0x50] ss:$12 sps:$4 sm:$0xff]  }
 0x1b2   :  { %v972_v36 = vpop.f32.mrf.mxu1  ;;  %v1195_v8 = vpop.f32.mrf.mxu0  ;;  %2697 = vmatprep.subr.bf16.mxu1 %v4346_v0  ;;  %2882 = vmatprep.subr.bf16.mxu0 %v4346_v0 }
 0x1b3   :  { %v1377_v42 = vmax.f32 %v969_v33, 0.0  ;;  %v1379_v45 = vmax.f32 %v1192_v15, 0.0  ;;  %v4963_v44 = vpack.c.bf16 %v1376_v35, %v1372_v43  ;;  %v4965_v10 = vpack.c.bf16 %v1378_v26, %v1374_v48 }
 0x1b4   :  { %v974_v23 = vpop.f32.mrf.mxu1  ;;  %v1197_v53 = vpop.f32.mrf.mxu0  ;;  %v973_v59 = vadd.f32 %v972_v36, %v4908_v13  ;;  %v1196_v60 = vadd.f32 %v1195_v8, %v4912_v47  ;;  %v4145_v36 = vld [vmem:[%s6812_s4 + $0x1d0] ss:$12 sps:$4 sm:$0xff]  }
 0x1b5   :  { %v4956_v49 = vpack.c.bf16 %v1377_v42, %v1373_v24  ;;  %v4958_v50 = vpack.c.bf16 %v1379_v45, %v1375_v40  ;;  %2698 = vmatpush1.bf16.msra.mxu1 %v4138_v7  ;;  %v975_v55 = vadd.f32 %v974_v23, %v4903_v9  ;;  %2883 = vmatpush1.bf16.msra.mxu0 %v4139_v52 }
 0x1b6   :  { %v976_v37 = vpop.f32.mrf.mxu1  ;;  %v1199_v11 = vpop.f32.mrf.mxu0  ;;  %2699 = vmatprep.subr.bf16.mxu1 %v4346_v0  ;;  %v1198_v57 = vadd.f32 %v1197_v53, %v4905_v46  ;;  %2884 = vmatprep.subr.bf16.mxu0 %v4346_v0  ;;  %v1380_v56 = vmax.f32 %v973_v59, 0.0  ;;  %v1382_v27 = vmax.f32 %v1196_v60, 0.0  ;;  %v4146_v53 = vld [vmem:[%s6812_s4 + $0x38] ss:$12 sps:$4 sm:$0xff]  }
 0x1b7   :  { %v977_v58 = vadd.f32 %v976_v37, %v4908_v13  ;;  %v1200_v28 = vadd.f32 %v1199_v11, %v4912_v47  ;;  %2291 = vmatprep.mubr.bf16.mxu1 %v4956_v49  ;;  %2514 = vmatprep.mubr.bf16.mxu0 %v4958_v50  ;;  %v1381_v20 = vmax.f32 %v975_v55, 0.0 }
 0x1b8   :  { %v978_v61 = vpop.f32.mrf.mxu1  ;;  %v1201_v62 = vpop.f32.mrf.mxu0  ;;  %2292 = vmatmul.mubr.bf16.gmra.mxu1 %v4963_v44  ;;  %2515 = vmatmul.mubr.bf16.gmra.mxu0 %v4965_v10  ;;  %v1383_v22 = vmax.f32 %v1198_v57, 0.0 }
 0x1b9   :  { %v979_v63 = vadd.f32 %v978_v61, %v4903_v9  ;;  %v1202_v1 = vadd.f32 %v1201_v62, %v4905_v46  ;;  %2700 = vmatpush1.bf16.msra.mxu1 %v4140_v51  ;;  %v1384_v12 = vmax.f32 %v977_v58, 0.0  ;;  %v1386_v14 = vmax.f32 %v1200_v28, 0.0  ;;  %2885 = vmatpush1.bf16.msra.mxu0 %v4141_v19  ;;  %v4147_v19 = vld [vmem:[%s6812_s4 + $0x1b8] ss:$12 sps:$4 sm:$0xff]  }
 0x1ba   :  { %v982_v17 = vpop.f32.mrf.mxu1  ;;  %v1205_v18 = vpop.f32.mrf.mxu0  ;;  %2701 = vmatprep.subr.bf16.mxu1 %v4346_v0  ;;  %2886 = vmatprep.subr.bf16.mxu0 %v4346_v0 }
 0x1bb   :  { %v1385_v34 = vmax.f32 %v979_v63, 0.0  ;;  %v1387_v25 = vmax.f32 %v1202_v1, 0.0  ;;  %v4999_v33 = vpack.c.bf16 %v1384_v12, %v1380_v56  ;;  %v5001_v15 = vpack.c.bf16 %v1386_v14, %v1382_v27  ;;  %v4148_v12 = vld [vmem:[%s6812_s4 + $0x20] ss:$12 sps:$4 sm:$0xff]  }
 0x1bc   :  { %v984_v31 = vpop.f32.mrf.mxu1  ;;  %v1207_v16 = vpop.f32.mrf.mxu0  ;;  %v983_v40 = vadd.f32 %v982_v17, %v4908_v13  ;;  %v1206_v42 = vadd.f32 %v1205_v18, %v4912_v47 }
 0x1bd   :  { %v4992_v30 = vpack.c.bf16 %v1385_v34, %v1381_v20  ;;  %v4994_v32 = vpack.c.bf16 %v1387_v25, %v1383_v22  ;;  %2702 = vmatpush1.bf16.msra.mxu1 %v4142_v6  ;;  %v985_v7 = vadd.f32 %v984_v31, %v4903_v9  ;;  %2887 = vmatpush1.bf16.msra.mxu0 %v4143_v39  ;;  %v4149_v22 = vld [vmem:[%s6812_s4 + $0x1a0] ss:$12 sps:$4 sm:$0xff]  }
 0x1be   :  { %v986_v35 = vpop.f32.mrf.mxu1  ;;  %v1209_v26 = vpop.f32.mrf.mxu0  ;;  %2703 = vmatprep.subr.bf16.mxu1 %v4346_v0  ;;  %v1208_v8 = vadd.f32 %v1207_v16, %v4905_v46  ;;  %2888 = vmatprep.subr.bf16.mxu0 %v4346_v0  ;;  %v1388_v60 = vmax.f32 %v983_v40, 0.0  ;;  %v1390_v61 = vmax.f32 %v1206_v42, 0.0  ;;  %v4151_v40 = vld [vmem:[%s6812_s4 + $0x188] ss:$12 sps:$4 sm:$0xff]  }
 0x1bf   :  { %v987_v52 = vadd.f32 %v986_v35, %v4908_v13  ;;  %v1210_v24 = vadd.f32 %v1209_v26, %v4912_v47  ;;  %2301 = vmatprep.mubr.bf16.mxu1 %v4992_v30  ;;  %2524 = vmatprep.mubr.bf16.mxu0 %v4994_v32  ;;  %v1389_v57 = vmax.f32 %v985_v7, 0.0  ;;  %v4150_v26 = vld [vmem:[%s6812_s4 + $0x8] ss:$12 sps:$4 sm:$0xff]  }
 0x1c0   :  { %v988_v45 = vpop.f32.mrf.mxu1  ;;  %v1211_v43 = vpop.f32.mrf.mxu0  ;;  %2302 = vmatmul.mubr.bf16.gmra.mxu1 %v4999_v33  ;;  %2525 = vmatmul.mubr.bf16.gmra.mxu0 %v5001_v15  ;;  %v1391_v58 = vmax.f32 %v1208_v8, 0.0 }
 0x1c1   :  { %v989_v48 = vadd.f32 %v988_v45, %v4903_v9  ;;  %v1212_v23 = vadd.f32 %v1211_v43, %v4905_v46  ;;  %2704 = vmatpush1.bf16.msra.mxu1 %v4144_v38  ;;  %v1392_v51 = vmax.f32 %v987_v52, 0.0  ;;  %v1394_v55 = vmax.f32 %v1210_v24, 0.0  ;;  %2889 = vmatpush1.bf16.msra.mxu0 %v4145_v36 }
 0x1c2   :  { %v992_v37 = vpop.f32.mrf.mxu1  ;;  %v1215_v11 = vpop.f32.mrf.mxu0  ;;  %2705 = vmatprep.subr.bf16.mxu1 %v4346_v0  ;;  %2890 = vmatprep.subr.bf16.mxu0 %v4346_v0 }
 0x1c3   :  { %v1393_v28 = vmax.f32 %v989_v48, 0.0  ;;  %v1395_v59 = vmax.f32 %v1212_v23, 0.0  ;;  %v5035_v14 = vpack.c.bf16 %v1392_v51, %v1388_v60  ;;  %v5037_v17 = vpack.c.bf16 %v1394_v55, %v1390_v61  ;;  %v4153_v61 = vld [vmem:[%s6812_s4 + $0x2f0] ss:$12 sps:$4 sm:$0xff]  }
 0x1c4   :  { %v994_v62 = vpop.f32.mrf.mxu1  ;;  %v1217_v63 = vpop.f32.mrf.mxu0  ;;  %v993_v27 = vadd.f32 %v992_v37, %v4908_v13  ;;  %v1216_v31 = vadd.f32 %v1215_v11, %v4912_v47 }
 0x1c5   :  { %v5028_v1 = vpack.c.bf16 %v1393_v28, %v1389_v57  ;;  %v5030_v6 = vpack.c.bf16 %v1395_v59, %v1391_v58  ;;  %2706 = vmatpush1.bf16.msra.mxu1 %v4146_v53  ;;  %v995_v18 = vadd.f32 %v994_v62, %v4903_v9  ;;  %2891 = vmatpush1.bf16.msra.mxu0 %v4147_v19  ;;  %v4152_v19 = vld [vmem:[%s6812_s4 + $0x170] ss:$12 sps:$4 sm:$0xff]  }
 0x1c6   :  { %v996_v39 = vpop.f32.mrf.mxu1  ;;  %v1219_v20 = vpop.f32.mrf.mxu0  ;;  %2707 = vmatprep.subr.bf16.mxu1 %v4346_v0  ;;  %v1218_v34 = vadd.f32 %v1217_v63, %v4905_v46  ;;  %2892 = vmatprep.subr.bf16.mxu0 %v4346_v0  ;;  %v1396_v23 = vmax.f32 %v993_v27, 0.0  ;;  %v1398_v53 = vmax.f32 %v1216_v31, 0.0 }
 0x1c7   :  { %v997_v25 = vadd.f32 %v996_v39, %v4908_v13  ;;  %v1220_v56 = vadd.f32 %v1219_v20, %v4912_v47  ;;  %2311 = vmatprep.mubr.bf16.mxu1 %v5028_v1  ;;  %2534 = vmatprep.mubr.bf16.mxu0 %v5030_v6  ;;  %v1397_v42 = vmax.f32 %v995_v18, 0.0 }
 0x1c8   :  { %v998_v16 = vpop.f32.mrf.mxu1  ;;  %v1221_v38 = vpop.f32.mrf.mxu0  ;;  %2312 = vmatmul.mubr.bf16.gmra.mxu1 %v5035_v14  ;;  %2535 = vmatmul.mubr.bf16.gmra.mxu0 %v5037_v17  ;;  %v1399_v45 = vmax.f32 %v1218_v34, 0.0 }
 0x1c9   :  { %v999_v7 = vadd.f32 %v998_v16, %v4903_v9  ;;  %v1222_v35 = vadd.f32 %v1221_v38, %v4905_v46  ;;  %2708 = vmatpush1.bf16.msra.mxu1 %v4148_v12  ;;  %v1400_v36 = vmax.f32 %v997_v25, 0.0  ;;  %v1402_v8 = vmax.f32 %v1220_v56, 0.0  ;;  %2893 = vmatpush1.bf16.msra.mxu0 %v4149_v22  ;;  %v4154_v56 = vld [vmem:[%s6812_s4 + $0x158] ss:$12 sps:$4 sm:$0xff]  }
 0x1ca   :  { %v1002_v52 = vpop.f32.mrf.mxu1  ;;  %v1225_v24 = vpop.f32.mrf.mxu0  ;;  %2709 = vmatprep.subr.bf16.mxu1 %v4346_v0  ;;  %2894 = vmatprep.subr.bf16.mxu0 %v4346_v0 }
 0x1cb   :  { %v1401_v43 = vmax.f32 %v999_v7, 0.0  ;;  %v1403_v48 = vmax.f32 %v1222_v35, 0.0  ;;  %v5071_v57 = vpack.c.bf16 %v1400_v36, %v1396_v23  ;;  %v5073_v58 = vpack.c.bf16 %v1402_v8, %v1398_v53  ;;  %v4155_v7 = vld [vmem:[%s6812_s4 + $0x2d8] ss:$12 sps:$4 sm:$0xff]  }
 0x1cc   :  { %v1004_v51 = vpop.f32.mrf.mxu1  ;;  %v1227_v55 = vpop.f32.mrf.mxu0  ;;  %v1003_v18 = vadd.f32 %v1002_v52, %v4908_v13  ;;  %v1226_v39 = vadd.f32 %v1225_v24, %v4912_v47 }
 0x1cd   :  { %v5064_v37 = vpack.c.bf16 %v1401_v43, %v1397_v42  ;;  %v5066_v11 = vpack.c.bf16 %v1403_v48, %v1399_v45  ;;  %2710 = vmatpush1.bf16.msra.mxu1 %v4150_v26  ;;  %v1005_v28 = vadd.f32 %v1004_v51, %v4903_v9  ;;  %2895 = vmatpush1.bf16.msra.mxu0 %v4151_v40  ;;  %v4156_v48 = vld [vmem:[%s6812_s4 + $0x140] ss:$12 sps:$4 sm:$0xff]  }
 0x1ce   :  { %v1006_v59 = vpop.f32.mrf.mxu1  ;;  %v1229_v60 = vpop.f32.mrf.mxu0  ;;  %2711 = vmatprep.subr.bf16.mxu1 %v4346_v0  ;;  %v1228_v62 = vadd.f32 %v1227_v55, %v4905_v46  ;;  %2896 = vmatprep.subr.bf16.mxu0 %v4346_v0  ;;  %v1404_v52 = vmax.f32 %v1003_v18, 0.0  ;;  %v1406_v24 = vmax.f32 %v1226_v39, 0.0 }
 0x1cf   :  { %v1007_v63 = vadd.f32 %v1006_v59, %v4908_v13  ;;  %v1230_v12 = vadd.f32 %v1229_v60, %v4912_v47  ;;  %2321 = vmatprep.mubr.bf16.mxu1 %v5064_v37  ;;  %2544 = vmatprep.mubr.bf16.mxu0 %v5066_v11  ;;  %v1405_v35 = vmax.f32 %v1005_v28, 0.0  ;;  %v4157_v28 = vld [vmem:[%s6812_s4 + $0x2c0] ss:$12 sps:$4 sm:$0xff]  }
 0x1d0   :  { %v1008_v20 = vpop.f32.mrf.mxu1  ;;  %v1231_v22 = vpop.f32.mrf.mxu0  ;;  %2322 = vmatmul.mubr.bf16.gmra.mxu1 %v5071_v57  ;;  %2545 = vmatmul.mubr.bf16.gmra.mxu0 %v5073_v58  ;;  %v1407_v26 = vmax.f32 %v1228_v62, 0.0 }
 0x1d1   :  { %v1009_v34 = vadd.f32 %v1008_v20, %v4903_v9  ;;  %v1232_v25 = vadd.f32 %v1231_v22, %v4905_v46  ;;  %2712 = vmatpush2.bf16.msra.mxu1 %v4152_v19  ;;  %v1408_v27 = vmax.f32 %v1007_v63, 0.0  ;;  %v1410_v31 = vmax.f32 %v1230_v12, 0.0  ;;  %2897 = vmatpush2.bf16.msra.mxu0 %v4153_v61  ;;  %v4158_v22 = vld [vmem:[%s6812_s4 + $0x128] ss:$12 sps:$4 sm:$0xff]  }
 0x1d2   :  { %v1012_v16 = vpop.f32.mrf.mxu1  ;;  %v1235_v38 = vpop.f32.mrf.mxu0  ;;  %2713 = vmatprep.subr.bf16.mxu1 %v4346_v0  ;;  %2898 = vmatprep.subr.bf16.mxu0 %v4346_v0 }
 0x1d3   :  { %v1409_v36 = vmax.f32 %v1009_v34, 0.0  ;;  %v1411_v8 = vmax.f32 %v1232_v25, 0.0  ;;  %v5107_v23 = vpack.c.bf16 %v1408_v27, %v1404_v52  ;;  %v5109_v53 = vpack.c.bf16 %v1410_v31, %v1406_v24  ;;  %v4159_v31 = vld [vmem:[%s6812_s4 + $0x2a8] ss:$12 sps:$4 sm:$0xff]  }
 0x1d4   :  { %v1014_v40 = vpop.f32.mrf.mxu1  ;;  %v1237_v42 = vpop.f32.mrf.mxu0  ;;  %v1013_v62 = vadd.f32 %v1012_v16, %v4908_v13  ;;  %v1236_v63 = vadd.f32 %v1235_v38, %v4912_v47 }
 0x1d5   :  { %v5100_v45 = vpack.c.bf16 %v1409_v36, %v1405_v35  ;;  %v5102_v43 = vpack.c.bf16 %v1411_v8, %v1407_v26  ;;  %2714 = vmatpush2.bf16.msra.mxu1 %v4154_v56  ;;  %v1015_v51 = vadd.f32 %v1014_v40, %v4903_v9  ;;  %2899 = vmatpush2.bf16.msra.mxu0 %v4155_v7 }
 0x1d6   :  { %v1016_v55 = vpop.f32.mrf.mxu1  ;;  %v1239_v19 = vpop.f32.mrf.mxu0  ;;  %2715 = vmatprep.subr.bf16.mxu1 %v4346_v0  ;;  %v1238_v59 = vadd.f32 %v1237_v42, %v4905_v46  ;;  %2900 = vmatprep.subr.bf16.mxu0 %v4346_v0  ;;  %v1412_v26 = vmax.f32 %v1013_v62, 0.0  ;;  %v1414_v36 = vmax.f32 %v1236_v63, 0.0  ;;  %v4160_v42 = vld [vmem:[%s6812_s4 + $0x110] ss:$12 sps:$4 sm:$0xff]  }
 0x1d7   :  { %v1017_v60 = vadd.f32 %v1016_v55, %v4908_v13  ;;  %v1240_v61 = vadd.f32 %v1239_v19, %v4912_v47  ;;  %2331 = vmatprep.mubr.bf16.mxu1 %v5100_v45  ;;  %2554 = vmatprep.mubr.bf16.mxu0 %v5102_v43  ;;  %v1413_v16 = vmax.f32 %v1015_v51, 0.0 }
 0x1d8   :  { %v1018_v12 = vpop.f32.mrf.mxu1  ;;  %v1241_v18 = vpop.f32.mrf.mxu0  ;;  %2332 = vmatmul.mubr.bf16.gmra.mxu1 %v5107_v23  ;;  %2555 = vmatmul.mubr.bf16.gmra.mxu0 %v5109_v53  ;;  %v1415_v38 = vmax.f32 %v1238_v59, 0.0  ;;  %v4161_v59 = vld [vmem:[%s6812_s4 + $0x290] ss:$12 sps:$4 sm:$0xff]  }
 0x1d9   :  { %v1019_v39 = vadd.f32 %v1018_v12, %v4903_v9  ;;  %v1242_v20 = vadd.f32 %v1241_v18, %v4905_v46  ;;  %2716 = vmatpush2.bf16.msra.mxu1 %v4156_v48  ;;  %v1416_v34 = vmax.f32 %v1017_v60, 0.0  ;;  %v1418_v25 = vmax.f32 %v1240_v61, 0.0  ;;  %2901 = vmatpush2.bf16.msra.mxu0 %v4157_v28 }
 0x1da   :  { %v1022_v56 = vpop.f32.mrf.mxu1  ;;  %v1245_v27 = vpop.f32.mrf.mxu0  ;;  %2717 = vmatprep.subr.bf16.mxu1 %v4346_v0  ;;  %2902 = vmatprep.subr.bf16.mxu0 %v4346_v0 }
 0x1db   :  { %v1417_v7 = vmax.f32 %v1019_v39, 0.0  ;;  %v1419_v35 = vmax.f32 %v1242_v20, 0.0  ;;  %v5143_v48 = vpack.c.bf16 %v1416_v34, %v1412_v26  ;;  %v5145_v51 = vpack.c.bf16 %v1418_v25, %v1414_v36  ;;  %v4162_v34 = vld [vmem:[%s6812_s4 + $0xf8] ss:$12 sps:$4 sm:$0xff]  }
 0x1dc   :  { %v1024_v8 = vpop.f32.mrf.mxu1  ;;  %v1247_v52 = vpop.f32.mrf.mxu0  ;;  %v1023_v63 = vadd.f32 %v1022_v56, %v4908_v13  ;;  %v1246_v12 = vadd.f32 %v1245_v27, %v4912_v47 }
 0x1dd   :  { %v5136_v24 = vpack.c.bf16 %v1417_v7, %v1413_v16  ;;  %v5138_v40 = vpack.c.bf16 %v1419_v35, %v1415_v38  ;;  %2718 = vmatpush2.bf16.msra.mxu1 %v4158_v22  ;;  %v1025_v55 = vadd.f32 %v1024_v8, %v4903_v9  ;;  %2903 = vmatpush2.bf16.msra.mxu0 %v4159_v31  ;;  %v4163_v16 = vld [vmem:[%s6812_s4 + $0x278] ss:$12 sps:$4 sm:$0xff]  }
 0x1de   :  { %v1026_v19 = vpop.f32.mrf.mxu1  ;;  %v1249_v28 = vpop.f32.mrf.mxu0  ;;  %2719 = vmatprep.subr.bf16.mxu1 %v4346_v0  ;;  %v1248_v60 = vadd.f32 %v1247_v52, %v4905_v46  ;;  %2904 = vmatprep.subr.bf16.mxu0 %v4346_v0  ;;  %v1420_v36 = vmax.f32 %v1023_v63, 0.0  ;;  %v1422_v8 = vmax.f32 %v1246_v12, 0.0  ;;  %v4165_v12 = vld [vmem:[%s6812_s4 + $0x260] ss:$12 sps:$4 sm:$0xff]  }
 0x1df   :  { %v1027_v61 = vadd.f32 %v1026_v19, %v4908_v13  ;;  %v1250_v62 = vadd.f32 %v1249_v28, %v4912_v47  ;;  %2341 = vmatprep.mubr.bf16.mxu1 %v5136_v24  ;;  %2564 = vmatprep.mubr.bf16.mxu0 %v5138_v40  ;;  %v1421_v38 = vmax.f32 %v1025_v55, 0.0 }
 0x1e0   :  { %v1028_v18 = vpop.f32.mrf.mxu1  ;;  %v1251_v39 = vpop.f32.mrf.mxu0  ;;  %2342 = vmatmul.mubr.bf16.gmra.mxu1 %v5143_v48  ;;  %2565 = vmatmul.mubr.bf16.gmra.mxu0 %v5145_v51  ;;  %v1423_v7 = vmax.f32 %v1248_v60, 0.0 }
 0x1e1   :  { %v1029_v20 = vadd.f32 %v1028_v18, %v4903_v9  ;;  %v1252_v22 = vadd.f32 %v1251_v39, %v4905_v46  ;;  %2720 = vmatpush2.bf16.msra.mxu1 %v4160_v42  ;;  %v1424_v25 = vmax.f32 %v1027_v61, 0.0  ;;  %v1426_v56 = vmax.f32 %v1250_v62, 0.0  ;;  %2905 = vmatpush2.bf16.msra.mxu0 %v4161_v59  ;;  %v4164_v59 = vld [vmem:[%s6812_s4 + $0xe0] ss:$12 sps:$4 sm:$0xff]  }
 0x1e2   :  { %v1032_v27 = vpop.f32.mrf.mxu1  ;;  %v1255_v31 = vpop.f32.mrf.mxu0  ;;  %2721 = vmatprep.subr.bf16.mxu1 %v4346_v0  ;;  %2906 = vmatprep.subr.bf16.mxu0 %v4346_v0 }
 0x1e3   :  { %v1425_v35 = vmax.f32 %v1029_v20, 0.0  ;;  %v1427_v26 = vmax.f32 %v1252_v22, 0.0  ;;  %v5179_v61 = vpack.c.bf16 %v1424_v25, %v1420_v36  ;;  %v5181_v55 = vpack.c.bf16 %v1426_v56, %v1422_v8  ;;  %v4167_v36 = vld [vmem:[%s6812_s4 + $0x248] ss:$12 sps:$4 sm:$0xff]  }
 0x1e4   :  { %v1034_v52 = vpop.f32.mrf.mxu1  ;;  %v1257_v42 = vpop.f32.mrf.mxu0  ;;  %v1033_v22 = vadd.f32 %v1032_v27, %v4908_v13 }
 0x1e5   :  { %v5172_v19 = vpack.c.bf16 %v1425_v35, %v1421_v38  ;;  %v5174_v28 = vpack.c.bf16 %v1427_v26, %v1423_v7  ;;  %2722 = vmatpush2.bf16.msra.mxu1 %v4162_v34  ;;  %v1035_v60 = vadd.f32 %v1034_v52, %v4903_v9  ;;  %2907 = vmatpush2.bf16.msra.mxu0 %v4163_v16  ;;  %v4166_v7 = vld [vmem:[%s6812_s4 + $0xc8] ss:$12 sps:$4 sm:$0xff]  }
 0x1e6   :  { %v1036_v62 = vpop.f32.mrf.mxu1  ;;  %v1259_v63 = vpop.f32.mrf.mxu0  ;;  %2723 = vmatprep.subr.bf16.mxu1 %v4346_v0  ;;  %v1258_v18 = vadd.f32 %v1257_v42, %v4905_v46  ;;  %v1256_v34 = vadd.f32 %v1255_v31, %v4912_v47  ;;  %2908 = vmatprep.subr.bf16.mxu0 %v4346_v0 }
 0x1e7   :  { %v1037_v39 = vadd.f32 %v1036_v62, %v4908_v13  ;;  %v1260_v20 = vadd.f32 %v1259_v63, %v4912_v47  ;;  %2351 = vmatprep.mubr.bf16.mxu1 %v5172_v19  ;;  %2574 = vmatprep.mubr.bf16.mxu0 %v5174_v28  ;;  %v1429_v8 = vmax.f32 %v1035_v60, 0.0  ;;  %v1428_v62 = vmax.f32 %v1033_v22, 0.0 }
 0x1e8   :  { %v1038_v25 = vpop.f32.mrf.mxu1  ;;  %v1261_v56 = vpop.f32.mrf.mxu0  ;;  %2352 = vmatmul.mubr.bf16.gmra.mxu1 %v5179_v61  ;;  %2575 = vmatmul.mubr.bf16.gmra.mxu0 %v5181_v55  ;;  %v1431_v52 = vmax.f32 %v1258_v18, 0.0  ;;  %v1430_v63 = vmax.f32 %v1256_v34, 0.0 }
 0x1e9   :  { %v1039_v16 = vadd.f32 %v1038_v25, %v4903_v9  ;;  %v1262_v38 = vadd.f32 %v1261_v56, %v4905_v46  ;;  %2724 = vmatpush2.bf16.msra.mxu1 %v4164_v59  ;;  %v1432_v27 = vmax.f32 %v1037_v39, 0.0  ;;  %v1434_v35 = vmax.f32 %v1260_v20, 0.0  ;;  %2909 = vmatpush2.bf16.msra.mxu0 %v4165_v12 }
 0x1ea   :  { %v1042_v31 = vpop.f32.mrf.mxu1  ;;  %v1265_v26 = vpop.f32.mrf.mxu0  ;;  %2725 = vmatprep.subr.bf16.mxu1 %v4346_v0  ;;  %2910 = vmatprep.subr.bf16.mxu0 %v4346_v0 }
 0x1eb   :  { %v1433_v42 = vmax.f32 %v1039_v16, 0.0  ;;  %v1435_v59 = vmax.f32 %v1262_v38, 0.0  ;;  %v5212_v12 = vpack.c.bf16 %v1432_v27, %v1428_v62  ;;  %v5214_v41 = vpack.c.bf16 %v1434_v35, %v1430_v63 }
 0x1ec   :  { %v1044_v25 = vpop.f32.mrf.mxu1  ;;  %v1267_v39 = vpop.f32.mrf.mxu0  ;;  %v1043_v38 = vadd.f32 %v1042_v31, %v4908_v13 }
 0x1ed   :  { %v5208_v20 = vpack.c.bf16 %v1433_v42, %v1429_v8  ;;  %v5210_v56 = vpack.c.bf16 %v1435_v59, %v1431_v52  ;;  %2726 = vmatpush2.bf16.msra.mxu1 %v4166_v7  ;;  %6853 = vst [vmem:[#allocation7_spill] sm:$0xff] %v5212_v12  ;;  %6854 = vst [vmem:[#allocation8_spill] sm:$0xff] %v5214_v41  ;;  %v1045_v60 = vadd.f32 %v1044_v25, %v4903_v9 }
 0x1ee   :  { %v1046_v18 = vpop.f32.mrf.mxu1  ;;  %v1269_v16 = vpop.f32.mrf.mxu0  ;;  %2911 = vmatpush2.bf16.msra.mxu0 %v4167_v36  ;;  %v1268_v0 = vadd.f32 %v1267_v39, %v4905_v46  ;;  %v1266_v7 = vadd.f32 %v1265_v26, %v4912_v47 }
 0x1ef   :  { %6852 = vst [vmem:[#allocation6_spill] sm:$0xff] %v5210_v56  ;;  %v1047_v22 = vadd.f32 %v1046_v18, %v4908_v13  ;;  %v1270_v34 = vadd.f32 %v1269_v16, %v4912_v47  ;;  %2361 = vmatprep.mubr.bf16.mxu1 %v5208_v20  ;;  %2584 = vmatprep.mubr.bf16.mxu0 %v5210_v56  ;;  %v1437_v63 = vmax.f32 %v1045_v60, 0.0  ;;  %v1436_v18 = vmax.f32 %v1043_v38, 0.0 }
 0x1f0   :  { %v1048_v27 = vpop.f32.mrf.mxu1  ;;  %v1271_v35 = vpop.f32.mrf.mxu0  ;;  %2362 = vmatmul.mubr.bf16.gmra.mxu1 %v5212_v12  ;;  %2585 = vmatmul.mubr.bf16.gmra.mxu0 %v5214_v41  ;;  %v1439_v25 = vmax.f32 %v1268_v0, 0.0  ;;  %v1438_v26 = vmax.f32 %v1266_v7, 0.0 }
 0x1f1   :  { %v1049_v36 = vadd.f32 %v1048_v27, %v4903_v9  ;;  %v1272_v8 = vadd.f32 %v1271_v35, %v4905_v46  ;;  %v1440_v52 = vmax.f32 %v1047_v22, 0.0  ;;  %v1442_v42 = vmax.f32 %v1270_v34, 0.0 }
 0x1f2   :  { %v1052_v59 = vpop.f32.mrf.mxu1  ;;  %v1275_v62 = vpop.f32.mrf.mxu0 }
 0x1f3   :  { %v1441_v39 = vmax.f32 %v1049_v36, 0.0  ;;  %v1443_v31 = vmax.f32 %v1272_v8, 0.0  ;;  %v5232_v41 = vpack.c.bf16 %v1440_v52, %v1436_v18  ;;  %v5234_v27 = vpack.c.bf16 %v1442_v42, %v1438_v26 }
 0x1f4   :  { %v1054_v16 = vpop.f32.mrf.mxu1  ;;  %v1277_v3 = vpop.f32.mrf.mxu0  ;;  %v1053_v7 = vadd.f32 %v1052_v59, %v4908_v13  ;;  %v1276_v36 = vadd.f32 %v1275_v62, %v4912_v47 }
 0x1f5   :  { %v5228_v56 = vpack.c.bf16 %v1441_v39, %v1437_v63  ;;  %v5230_v12 = vpack.c.bf16 %v1443_v31, %v1439_v25  ;;  %6857 = vst [vmem:[#allocation11_spill] sm:$0xff] %v5232_v41  ;;  %6858 = vst [vmem:[#allocation12_spill] sm:$0xff] %v5234_v27  ;;  %v1055_v22 = vadd.f32 %v1054_v16, %v4903_v9 }
 0x1f6   :  { %v1056_v34 = vpop.f32.mrf.mxu1  ;;  %v1279_v35 = vpop.f32.mrf.mxu0  ;;  %v1278_v60 = vadd.f32 %v1277_v3, %v4905_v46  ;;  %v1446_v62 = vmax.f32 %v1276_v36, 0.0 }
 0x1f7   :  { %6855 = vst [vmem:[#allocation9_spill] sm:$0xff] %v5228_v56  ;;  %6856 = vst [vmem:[#allocation10_spill] sm:$0xff] %v5230_v12  ;;  %v1057_v0 = vadd.f32 %v1056_v34, %v4908_v13  ;;  %v1280_v38 = vadd.f32 %v1279_v35, %v4912_v47  ;;  %2371 = vmatprep.mubr.bf16.mxu1 %v5228_v56  ;;  %2594 = vmatprep.mubr.bf16.mxu0 %v5230_v12  ;;  %v1445_v18 = vmax.f32 %v1055_v22, 0.0 }
 0x1f8   :  { %v1058_v8 = vpop.f32.mrf.mxu1  ;;  %v1281_v52 = vpop.f32.mrf.mxu0  ;;  %2372 = vmatmul.mubr.bf16.gmra.mxu1 %v5232_v41  ;;  %2595 = vmatmul.mubr.bf16.gmra.mxu0 %v5234_v27  ;;  %v1447_v26 = vmax.f32 %v1278_v60, 0.0  ;;  %v1444_v34 = vmax.f32 %v1053_v7, 0.0 }
 0x1f9   :  { %v1059_v3 = vadd.f32 %v1058_v8, %v4903_v9  ;;  %v1282_v42 = vadd.f32 %v1281_v52, %v4905_v46  ;;  %v1448_v63 = vmax.f32 %v1057_v0, 0.0  ;;  %v1450_v25 = vmax.f32 %v1280_v38, 0.0 }
 0x1fa   :  { %v1062_v39 = vpop.f32.mrf.mxu1  ;;  %v1285_v31 = vpop.f32.mrf.mxu0 }
 0x1fb   :  { %v1449_v16 = vmax.f32 %v1059_v3, 0.0  ;;  %v1451_v59 = vmax.f32 %v1282_v42, 0.0  ;;  %v5252_v27 = vpack.c.bf16 %v1448_v63, %v1444_v34  ;;  %v5254_v8 = vpack.c.bf16 %v1450_v25, %v1446_v62 }
 0x1fc   :  { %v1064_v35 = vpop.f32.mrf.mxu1  ;;  %v1287_v12 = vpop.f32.mrf.mxu0  ;;  %v1063_v36 = vadd.f32 %v1062_v39, %v4908_v13  ;;  %v1286_v3 = vadd.f32 %v1285_v31, %v4912_v47 }
 0x1fd   :  { %v5248_v56 = vpack.c.bf16 %v1449_v16, %v1445_v18  ;;  %v5250_v41 = vpack.c.bf16 %v1451_v59, %v1447_v26  ;;  %6861 = vst [vmem:[#allocation15_spill] sm:$0xff] %v5252_v27  ;;  %6862 = vst [vmem:[#allocation16_spill] sm:$0xff] %v5254_v8  ;;  %v1065_v0 = vadd.f32 %v1064_v35, %v4903_v9 }
 0x1fe   :  { %v1066_v38 = vpop.f32.mrf.mxu1  ;;  %v1289_v52 = vpop.f32.mrf.mxu0  ;;  %v1288_v22 = vadd.f32 %v1287_v12, %v4905_v46  ;;  %v1454_v31 = vmax.f32 %v1286_v3, 0.0 }
 0x1ff   :  { %6859 = vst [vmem:[#allocation13_spill] sm:$0xff] %v5248_v56  ;;  %6860 = vst [vmem:[#allocation14_spill] sm:$0xff] %v5250_v41  ;;  %v1067_v60 = vadd.f32 %v1066_v38, %v4908_v13  ;;  %v1290_v7 = vadd.f32 %v1289_v52, %v4912_v47  ;;  %2381 = vmatprep.mubr.bf16.mxu1 %v5248_v56  ;;  %2604 = vmatprep.mubr.bf16.mxu0 %v5250_v41  ;;  %v1453_v34 = vmax.f32 %v1065_v0, 0.0 }
 0x200   :  { %v1068_v42 = vpop.f32.mrf.mxu1  ;;  %v1291_v63 = vpop.f32.mrf.mxu0  ;;  %2382 = vmatmul.mubr.bf16.gmra.mxu1 %v5252_v27  ;;  %2605 = vmatmul.mubr.bf16.gmra.mxu0 %v5254_v8  ;;  %v1455_v62 = vmax.f32 %v1288_v22, 0.0  ;;  %v1452_v38 = vmax.f32 %v1063_v36, 0.0 }
 0x201   :  { %v1069_v12 = vadd.f32 %v1068_v42, %v4903_v9  ;;  %v1292_v25 = vadd.f32 %v1291_v63, %v4905_v46  ;;  %v1456_v18 = vmax.f32 %v1067_v60, 0.0  ;;  %v1458_v26 = vmax.f32 %v1290_v7, 0.0 }
 0x202   :  { %v1072_v16 = vpop.f32.mrf.mxu1  ;;  %v1295_v59 = vpop.f32.mrf.mxu0 }
 0x203   :  { %v1457_v35 = vmax.f32 %v1069_v12, 0.0  ;;  %v1459_v39 = vmax.f32 %v1292_v25, 0.0  ;;  %v5272_v8 = vpack.c.bf16 %v1456_v18, %v1452_v38  ;;  %v5274_v42 = vpack.c.bf16 %v1458_v26, %v1454_v31 }
 0x204   :  { %v1074_v52 = vpop.f32.mrf.mxu1  ;;  %v1297_v41 = vpop.f32.mrf.mxu0  ;;  %v1073_v3 = vadd.f32 %v1072_v16, %v4908_v13  ;;  %v1296_v12 = vadd.f32 %v1295_v59, %v4912_v47 }
 0x205   :  { %v5268_v56 = vpack.c.bf16 %v1457_v35, %v1453_v34  ;;  %v5270_v27 = vpack.c.bf16 %v1459_v39, %v1455_v62  ;;  %6865 = vst [vmem:[#allocation19_spill] sm:$0xff] %v5272_v8  ;;  %6866 = vst [vmem:[#allocation20_spill] sm:$0xff] %v5274_v42  ;;  %v1075_v60 = vadd.f32 %v1074_v52, %v4903_v9 }
 0x206   :  { %v1076_v7 = vpop.f32.mrf.mxu1  ;;  %v1299_v63 = vpop.f32.mrf.mxu0  ;;  %v1298_v0 = vadd.f32 %v1297_v41, %v4905_v46  ;;  %v1462_v59 = vmax.f32 %v1296_v12, 0.0 }
 0x207   :  { %6863 = vst [vmem:[#allocation17_spill] sm:$0xff] %v5268_v56  ;;  %6864 = vst [vmem:[#allocation18_spill] sm:$0xff] %v5270_v27  ;;  %v1077_v22 = vadd.f32 %v1076_v7, %v4908_v13  ;;  %v1300_v36 = vadd.f32 %v1299_v63, %v4912_v47  ;;  %2391 = vmatprep.mubr.bf16.mxu1 %v5268_v56  ;;  %2614 = vmatprep.mubr.bf16.mxu0 %v5270_v27  ;;  %v1461_v38 = vmax.f32 %v1075_v60, 0.0 }
 0x208   :  { %v1078_v25 = vpop.f32.mrf.mxu1  ;;  %v1301_v18 = vpop.f32.mrf.mxu0  ;;  %2392 = vmatmul.mubr.bf16.gmra.mxu1 %v5272_v8  ;;  %2615 = vmatmul.mubr.bf16.gmra.mxu0 %v5274_v42  ;;  %v1463_v31 = vmax.f32 %v1298_v0, 0.0  ;;  %v1460_v7 = vmax.f32 %v1073_v3, 0.0 }
 0x209   :  { %v1079_v41 = vadd.f32 %v1078_v25, %v4903_v9  ;;  %v1302_v26 = vadd.f32 %v1301_v18, %v4905_v46  ;;  %v1464_v34 = vmax.f32 %v1077_v22, 0.0  ;;  %v1466_v62 = vmax.f32 %v1300_v36, 0.0 }
 0x20a   :  { %v1082_v35 = vpop.f32.mrf.mxu1  ;;  %v1305_v39 = vpop.f32.mrf.mxu0 }
 0x20b   :  { %v1465_v52 = vmax.f32 %v1079_v41, 0.0  ;;  %v1467_v16 = vmax.f32 %v1302_v26, 0.0  ;;  %v5292_v42 = vpack.c.bf16 %v1464_v34, %v1460_v7  ;;  %v5294_v25 = vpack.c.bf16 %v1466_v62, %v1462_v59 }
 0x20c   :  { %v1084_v63 = vpop.f32.mrf.mxu1  ;;  %v1307_v27 = vpop.f32.mrf.mxu0  ;;  %v1083_v12 = vadd.f32 %v1082_v35, %v4908_v13  ;;  %v1306_v41 = vadd.f32 %v1305_v39, %v4912_v47 }
 0x20d   :  { %v5288_v56 = vpack.c.bf16 %v1465_v52, %v1461_v38  ;;  %v5290_v8 = vpack.c.bf16 %v1467_v16, %v1463_v31  ;;  %6869 = vst [vmem:[#allocation23_spill] sm:$0xff] %v5292_v42  ;;  %6870 = vst [vmem:[#allocation24_spill] sm:$0xff] %v5294_v25  ;;  %v1085_v22 = vadd.f32 %v1084_v63, %v4903_v9 }
 0x20e   :  { %v1086_v36 = vpop.f32.mrf.mxu1  ;;  %v1309_v18 = vpop.f32.mrf.mxu0  ;;  %v1308_v60 = vadd.f32 %v1307_v27, %v4905_v46  ;;  %v1470_v39 = vmax.f32 %v1306_v41, 0.0 }
 0x20f   :  { %6867 = vst [vmem:[#allocation21_spill] sm:$0xff] %v5288_v56  ;;  %6868 = vst [vmem:[#allocation22_spill] sm:$0xff] %v5290_v8  ;;  %v1087_v0 = vadd.f32 %v1086_v36, %v4908_v13  ;;  %v1310_v3 = vadd.f32 %v1309_v18, %v4912_v47  ;;  %2401 = vmatprep.mubr.bf16.mxu1 %v5288_v56  ;;  %2624 = vmatprep.mubr.bf16.mxu0 %v5290_v8  ;;  %v1469_v7 = vmax.f32 %v1085_v22, 0.0 }
 0x210   :  { %v1088_v26 = vpop.f32.mrf.mxu1  ;;  %v1311_v34 = vpop.f32.mrf.mxu0  ;;  %2402 = vmatmul.mubr.bf16.gmra.mxu1 %v5292_v42  ;;  %2625 = vmatmul.mubr.bf16.gmra.mxu0 %v5294_v25  ;;  %v1471_v59 = vmax.f32 %v1308_v60, 0.0  ;;  %v1468_v36 = vmax.f32 %v1083_v12, 0.0 }
 0x211   :  { %v1089_v27 = vadd.f32 %v1088_v26, %v4903_v9  ;;  %v1312_v62 = vadd.f32 %v1311_v34, %v4905_v46  ;;  %v1472_v38 = vmax.f32 %v1087_v0, 0.0  ;;  %v1474_v31 = vmax.f32 %v1310_v3, 0.0 }
 0x212   :  { %v1092_v52 = vpop.f32.mrf.mxu1  ;;  %v1315_v16 = vpop.f32.mrf.mxu0 }
 0x213   :  { %v1473_v63 = vmax.f32 %v1089_v27, 0.0  ;;  %v1475_v35 = vmax.f32 %v1312_v62, 0.0  ;;  %v5312_v25 = vpack.c.bf16 %v1472_v38, %v1468_v36  ;;  %v5314_v26 = vpack.c.bf16 %v1474_v31, %v1470_v39 }
 0x214   :  { %v1094_v18 = vpop.f32.mrf.mxu1  ;;  %v1317_v8 = vpop.f32.mrf.mxu0  ;;  %v1093_v41 = vadd.f32 %v1092_v52, %v4908_v13  ;;  %v1316_v27 = vadd.f32 %v1315_v16, %v4912_v47 }
 0x215   :  { %v5308_v56 = vpack.c.bf16 %v1473_v63, %v1469_v7  ;;  %v5310_v42 = vpack.c.bf16 %v1475_v35, %v1471_v59  ;;  %6873 = vst [vmem:[#allocation27_spill] sm:$0xff] %v5312_v25  ;;  %6874 = vst [vmem:[#allocation28_spill] sm:$0xff] %v5314_v26  ;;  %v1095_v0 = vadd.f32 %v1094_v18, %v4903_v9 }
 0x216   :  { %v1096_v3 = vpop.f32.mrf.mxu1  ;;  %v1319_v34 = vpop.f32.mrf.mxu0  ;;  %v1318_v22 = vadd.f32 %v1317_v8, %v4905_v46  ;;  %v1478_v16 = vmax.f32 %v1316_v27, 0.0 }
 0x217   :  { %6871 = vst [vmem:[#allocation25_spill] sm:$0xff] %v5308_v56  ;;  %6872 = vst [vmem:[#allocation26_spill] sm:$0xff] %v5310_v42  ;;  %v1097_v60 = vadd.f32 %v1096_v3, %v4908_v13  ;;  %v1320_v12 = vadd.f32 %v1319_v34, %v4912_v47  ;;  %2411 = vmatprep.mubr.bf16.mxu1 %v5308_v56  ;;  %2634 = vmatprep.mubr.bf16.mxu0 %v5310_v42  ;;  %v1477_v36 = vmax.f32 %v1095_v0, 0.0 }
 0x218   :  { %v1098_v62 = vpop.f32.mrf.mxu1  ;;  %v1321_v38 = vpop.f32.mrf.mxu0  ;;  %2412 = vmatmul.mubr.bf16.gmra.mxu1 %v5312_v25  ;;  %2635 = vmatmul.mubr.bf16.gmra.mxu0 %v5314_v26  ;;  %v1479_v39 = vmax.f32 %v1318_v22, 0.0  ;;  %v1476_v3 = vmax.f32 %v1093_v41, 0.0 }
 0x219   :  { %v1099_v8 = vadd.f32 %v1098_v62, %v4903_v9  ;;  %v1322_v31 = vadd.f32 %v1321_v38, %v4905_v46  ;;  %v1480_v7 = vmax.f32 %v1097_v60, 0.0  ;;  %v1482_v59 = vmax.f32 %v1320_v12, 0.0 }
 0x21a   :  { %v1102_v63 = vpop.f32.mrf.mxu1  ;;  %v1325_v35 = vpop.f32.mrf.mxu0 }
 0x21b   :  { %v1481_v18 = vmax.f32 %v1099_v8, 0.0  ;;  %v1483_v52 = vmax.f32 %v1322_v31, 0.0  ;;  %v5332_v26 = vpack.c.bf16 %v1480_v7, %v1476_v3  ;;  %v5334_v62 = vpack.c.bf16 %v1482_v59, %v1478_v16 }
 0x21c   :  { %v1104_v34 = vpop.f32.mrf.mxu1  ;;  %v1327_v42 = vpop.f32.mrf.mxu0  ;;  %v1103_v27 = vadd.f32 %v1102_v63, %v4908_v13  ;;  %v1326_v8 = vadd.f32 %v1325_v35, %v4912_v47 }
 0x21d   :  { %v5328_v56 = vpack.c.bf16 %v1481_v18, %v1477_v36  ;;  %v5330_v25 = vpack.c.bf16 %v1483_v52, %v1479_v39  ;;  %6877 = vst [vmem:[#allocation31_spill] sm:$0xff] %v5332_v26  ;;  %6878 = vst [vmem:[#allocation32_spill] sm:$0xff] %v5334_v62  ;;  %v1105_v60 = vadd.f32 %v1104_v34, %v4903_v9 }
 0x21e   :  { %v1106_v12 = vpop.f32.mrf.mxu1  ;;  %v1329_v38 = vpop.f32.mrf.mxu0  ;;  %v1328_v0 = vadd.f32 %v1327_v42, %v4905_v46  ;;  %v1486_v35 = vmax.f32 %v1326_v8, 0.0 }
 0x21f   :  { %6875 = vst [vmem:[#allocation29_spill] sm:$0xff] %v5328_v56  ;;  %6876 = vst [vmem:[#allocation30_spill] sm:$0xff] %v5330_v25  ;;  %v1107_v22 = vadd.f32 %v1106_v12, %v4908_v13  ;;  %v1330_v41 = vadd.f32 %v1329_v38, %v4912_v47  ;;  %2421 = vmatprep.mubr.bf16.mxu1 %v5328_v56  ;;  %2644 = vmatprep.mubr.bf16.mxu0 %v5330_v25  ;;  %v1485_v3 = vmax.f32 %v1105_v60, 0.0 }
 0x220   :  { %v1108_v31 = vpop.f32.mrf.mxu1  ;;  %v1331_v7 = vpop.f32.mrf.mxu0  ;;  %2422 = vmatmul.mubr.bf16.gmra.mxu1 %v5332_v26  ;;  %2645 = vmatmul.mubr.bf16.gmra.mxu0 %v5334_v62  ;;  %v1487_v16 = vmax.f32 %v1328_v0, 0.0  ;;  %v1484_v12 = vmax.f32 %v1103_v27, 0.0 }
 0x221   :  { %v1109_v42 = vadd.f32 %v1108_v31, %v4903_v9  ;;  %v1332_v59 = vadd.f32 %v1331_v7, %v4905_v46  ;;  %v1488_v36 = vmax.f32 %v1107_v22, 0.0  ;;  %v1490_v39 = vmax.f32 %v1330_v41, 0.0 }
 0x222   :  { %v1112_v18 = vpop.f32.mrf.mxu1  ;;  %v1335_v52 = vpop.f32.mrf.mxu0 }
 0x223   :  { %v1489_v34 = vmax.f32 %v1109_v42, 0.0  ;;  %v1491_v63 = vmax.f32 %v1332_v59, 0.0  ;;  %v5352_v62 = vpack.c.bf16 %v1488_v36, %v1484_v12  ;;  %v5354_v31 = vpack.c.bf16 %v1490_v39, %v1486_v35 }
 0x224   :  { %v1114_v38 = vpop.f32.mrf.mxu1  ;;  %v1337_v25 = vpop.f32.mrf.mxu0  ;;  %v1113_v8 = vadd.f32 %v1112_v18, %v4908_v13  ;;  %v1336_v42 = vadd.f32 %v1335_v52, %v4912_v47 }
 0x225   :  { %v5348_v56 = vpack.c.bf16 %v1489_v34, %v1485_v3  ;;  %v5350_v26 = vpack.c.bf16 %v1491_v63, %v1487_v16  ;;  %6881 = vst [vmem:[#allocation35_spill] sm:$0xff] %v5352_v62  ;;  %6882 = vst [vmem:[#allocation36_spill] sm:$0xff] %v5354_v31  ;;  %v1115_v22 = vadd.f32 %v1114_v38, %v4903_v9 }
 0x226   :  { %v1116_v41 = vpop.f32.mrf.mxu1  ;;  %v1339_v7 = vpop.f32.mrf.mxu0  ;;  %v1338_v60 = vadd.f32 %v1337_v25, %v4905_v46  ;;  %v1494_v52 = vmax.f32 %v1336_v42, 0.0 }
 0x227   :  { %6879 = vst [vmem:[#allocation33_spill] sm:$0xff] %v5348_v56  ;;  %6880 = vst [vmem:[#allocation34_spill] sm:$0xff] %v5350_v26  ;;  %v1117_v0 = vadd.f32 %v1116_v41, %v4908_v13  ;;  %v1340_v27 = vadd.f32 %v1339_v7, %v4912_v47  ;;  %2431 = vmatprep.mubr.bf16.mxu1 %v5348_v56  ;;  %2654 = vmatprep.mubr.bf16.mxu0 %v5350_v26  ;;  %v1493_v12 = vmax.f32 %v1115_v22, 0.0 }
 0x228   :  { %v1118_v59 = vpop.f32.mrf.mxu1  ;;  %v1341_v36 = vpop.f32.mrf.mxu0  ;;  %2432 = vmatmul.mubr.bf16.gmra.mxu1 %v5352_v62  ;;  %2655 = vmatmul.mubr.bf16.gmra.mxu0 %v5354_v31  ;;  %v1495_v35 = vmax.f32 %v1338_v60, 0.0  ;;  %v1492_v41 = vmax.f32 %v1113_v8, 0.0 }
 0x229   :  { %v1119_v25 = vadd.f32 %v1118_v59, %v4903_v9  ;;  %v1342_v39 = vadd.f32 %v1341_v36, %v4905_v46  ;;  %v1496_v3 = vmax.f32 %v1117_v0, 0.0  ;;  %v1498_v16 = vmax.f32 %v1340_v27, 0.0 }
 0x22a   :  { %v1122_v34 = vpop.f32.mrf.mxu1  ;;  %v1345_v63 = vpop.f32.mrf.mxu0 }
 0x22b   :  { %v1497_v38 = vmax.f32 %v1119_v25, 0.0  ;;  %v1499_v18 = vmax.f32 %v1342_v39, 0.0  ;;  %v5372_v31 = vpack.c.bf16 %v1496_v3, %v1492_v41  ;;  %v5374_v59 = vpack.c.bf16 %v1498_v16, %v1494_v52 }
 0x22c   :  { %v1124_v7 = vpop.f32.mrf.mxu1  ;;  %v1347_v26 = vpop.f32.mrf.mxu0  ;;  %v1123_v42 = vadd.f32 %v1122_v34, %v4908_v13  ;;  %v1346_v25 = vadd.f32 %v1345_v63, %v4912_v47 }
 0x22d   :  { %v5368_v56 = vpack.c.bf16 %v1497_v38, %v1493_v12  ;;  %v5370_v62 = vpack.c.bf16 %v1499_v18, %v1495_v35  ;;  %6885 = vst [vmem:[#allocation39_spill] sm:$0xff] %v5372_v31  ;;  %6886 = vst [vmem:[#allocation40_spill] sm:$0xff] %v5374_v59  ;;  %v1125_v0 = vadd.f32 %v1124_v7, %v4903_v9 }
 0x22e   :  { %v1126_v27 = vpop.f32.mrf.mxu1  ;;  %v1349_v36 = vpop.f32.mrf.mxu0  ;;  %v1348_v22 = vadd.f32 %v1347_v26, %v4905_v46  ;;  %v1502_v63 = vmax.f32 %v1346_v25, 0.0 }
 0x22f   :  { %6883 = vst [vmem:[#allocation37_spill] sm:$0xff] %v5368_v56  ;;  %6884 = vst [vmem:[#allocation38_spill] sm:$0xff] %v5370_v62  ;;  %v1127_v60 = vadd.f32 %v1126_v27, %v4908_v13  ;;  %v1350_v8 = vadd.f32 %v1349_v36, %v4912_v47  ;;  %2441 = vmatprep.mubr.bf16.mxu1 %v5368_v56  ;;  %2664 = vmatprep.mubr.bf16.mxu0 %v5370_v62  ;;  %v1501_v41 = vmax.f32 %v1125_v0, 0.0 }
 0x230   :  { %v1128_v39 = vpop.f32.mrf.mxu1  ;;  %v1351_v3 = vpop.f32.mrf.mxu0  ;;  %2442 = vmatmul.mubr.bf16.gmra.mxu1 %v5372_v31  ;;  %2665 = vmatmul.mubr.bf16.gmra.mxu0 %v5374_v59  ;;  %v1503_v52 = vmax.f32 %v1348_v22, 0.0  ;;  %v1500_v27 = vmax.f32 %v1123_v42, 0.0 }
 0x231   :  { %v1129_v26 = vadd.f32 %v1128_v39, %v4903_v9  ;;  %v1352_v16 = vadd.f32 %v1351_v3, %v4905_v46  ;;  %v1504_v12 = vmax.f32 %v1127_v60, 0.0  ;;  %v1506_v35 = vmax.f32 %v1350_v8, 0.0 }
 0x232   :  { %v1132_v38 = vpop.f32.mrf.mxu1  ;;  %v1355_v18 = vpop.f32.mrf.mxu0 }
 0x233   :  { %v1505_v7 = vmax.f32 %v1129_v26, 0.0  ;;  %v1507_v34 = vmax.f32 %v1352_v16, 0.0  ;;  %v5392_v59 = vpack.c.bf16 %v1504_v12, %v1500_v27  ;;  %v5394_v39 = vpack.c.bf16 %v1506_v35, %v1502_v63 }
 0x234   :  { %v1134_v36 = vpop.f32.mrf.mxu1  ;;  %v1357_v62 = vpop.f32.mrf.mxu0  ;;  %v1133_v25 = vadd.f32 %v1132_v38, %v4908_v13  ;;  %v1356_v26 = vadd.f32 %v1355_v18, %v4912_v47 }
 0x235   :  { %v5388_v56 = vpack.c.bf16 %v1505_v7, %v1501_v41  ;;  %v5390_v31 = vpack.c.bf16 %v1507_v34, %v1503_v52  ;;  %v1135_v60 = vadd.f32 %v1134_v36, %v4903_v9  ;;  %v1358_v0 = vadd.f32 %v1357_v62, %v4905_v46 }
 0x236   :  { %v1136_v8 = vpop.f32.mrf.mxu1  ;;  %v1359_v3 = vpop.f32.mrf.mxu0  ;;  %v1508_v36 = vmax.f32 %v1133_v25, 0.0 }
 0x237   :  { %v1137_v22 = vadd.f32 %v1136_v8, %v4908_v13  ;;  %v1360_v42 = vadd.f32 %v1359_v3, %v4912_v47  ;;  %2451 = vmatprep.mubr.bf16.mxu1 %v5388_v56  ;;  %2674 = vmatprep.mubr.bf16.mxu0 %v5390_v31  ;;  %v1509_v7 = vmax.f32 %v1135_v60, 0.0  ;;  %v1511_v34 = vmax.f32 %v1358_v0, 0.0 }
 0x238   :  { %v1138_v16 = vpop.f32.mrf.mxu1  ;;  %v1361_v12 = vpop.f32.mrf.mxu0  ;;  %2452 = vmatmul.mubr.bf16.gmra.mxu1 %v5392_v59  ;;  %2675 = vmatmul.mubr.bf16.gmra.mxu0 %v5394_v39  ;;  %v1510_v13 = vmax.f32 %v1356_v26, 0.0 }
 0x239   :  { %v1139_v62 = vadd.f32 %v1138_v16, %v4903_v9  ;;  %v1362_v35 = vadd.f32 %v1361_v12, %v4905_v46  ;;  %v1512_v41 = vmax.f32 %v1137_v22, 0.0  ;;  %v1514_v52 = vmax.f32 %v1360_v42, 0.0  ;;  %v1720_v9 = vld [vmem:[%s6810_s2 + $0x6] sm:$0x7] }
 0x23a   :  { %v5446_v46 = vrot.slane %v1720_v9, %v4547_v5 }
 0x23b   :  { %v1513_v27 = vmax.f32 %v1139_v62, 0.0  ;;  %v1515_v63 = vmax.f32 %v1362_v35, 0.0  ;;  %v5412_v18 = vpack.c.bf16 %v1512_v41, %v1508_v36  ;;  %v5414_v8 = vpack.c.bf16 %v1514_v52, %v1510_v13  ;;  %v6887_v41 = vld [vmem:[#allocation6_spill] sm:$0xff] }
 0x23d   :  { %v5408_v38 = vpack.c.bf16 %v1513_v27, %v1509_v7  ;;  %v5410_v47 = vpack.c.bf16 %v1515_v63, %v1511_v34 }
 0x23f   :  { %2461 = vmatprep.mubr.bf16.mxu1 %v5408_v38  ;;  %2684 = vmatprep.mubr.bf16.mxu0 %v5410_v47 }
 0x240   :  { %2462 = vmatmul.mubr.bf16.gmra.mxu1 %v5412_v18  ;;  %2685 = vmatmul.mubr.bf16.gmra.mxu0 %v5414_v8 }
 0x241   :  { %2727 = vmatprep.mubr.bf16.mxu1 %v4922_v29  ;;  %2912 = vmatprep.mubr.bf16.mxu0 %v4924_v54  ;;  %v5449_v29 = vrot.slane %v1720_v9, %v4544_v4 }
 0x248   :  { %2728 = vmatmul.mubr.bf16.vlgmr.msra.gmra.mxu1 %v4932_v21  ;;  %2913 = vmatmul.mubr.bf16.vlgmr.msra.gmra.mxu0 %v4934_v2 }
 0x249   :  { %2735 = vmatprep.mubr.bf16.mxu1 %v4956_v49  ;;  %2920 = vmatprep.mubr.bf16.mxu0 %v4958_v50 }
 0x250   :  { %2736 = vmatmul.mubr.bf16.gmra.mxu1 %v4963_v44  ;;  %2921 = vmatmul.mubr.bf16.gmra.mxu0 %v4965_v10 }
 0x251   :  { %2743 = vmatprep.mubr.bf16.mxu1 %v4992_v30  ;;  %2928 = vmatprep.mubr.bf16.mxu0 %v4994_v32 }
 0x258   :  { %2744 = vmatmul.mubr.bf16.gmra.mxu1 %v4999_v33  ;;  %2929 = vmatmul.mubr.bf16.gmra.mxu0 %v5001_v15 }
 0x259   :  { %2751 = vmatprep.mubr.bf16.mxu1 %v5028_v1  ;;  %2936 = vmatprep.mubr.bf16.mxu0 %v5030_v6 }
 0x260   :  { %2752 = vmatmul.mubr.bf16.gmra.mxu1 %v5035_v14  ;;  %2937 = vmatmul.mubr.bf16.gmra.mxu0 %v5037_v17 }
 0x261   :  { %2759 = vmatprep.mubr.bf16.mxu1 %v5064_v37  ;;  %2944 = vmatprep.mubr.bf16.mxu0 %v5066_v11 }
 0x268   :  { %2760 = vmatmul.mubr.bf16.gmra.mxu1 %v5071_v57  ;;  %2945 = vmatmul.mubr.bf16.gmra.mxu0 %v5073_v58 }
 0x269   :  { %2767 = vmatprep.mubr.bf16.mxu1 %v5100_v45  ;;  %2952 = vmatprep.mubr.bf16.mxu0 %v5102_v43 }
 0x270   :  { %v2283_v54 = vpop.f32.mrf.mxu1  ;;  %v2506_v21 = vpop.f32.mrf.mxu0  ;;  %2768 = vmatmul.mubr.bf16.gmra.mxu1 %v5107_v23  ;;  %2953 = vmatmul.mubr.bf16.gmra.mxu0 %v5109_v53 }
 0x271   :  { %v2284_v2 = vadd.f32 %v2283_v54, %v5446_v46  ;;  %2775 = vmatprep.mubr.bf16.mxu1 %v5136_v24  ;;  %2960 = vmatprep.mubr.bf16.mxu0 %v5138_v40 }
 0x272   :  { %v2285_v49 = vpop.f32.mrf.mxu1  ;;  %v2508_v50 = vpop.f32.mrf.mxu0 }
 0x273   :  { %v2507_v44 = vadd.f32 %v2506_v21, %v2284_v2  ;;  %v2286_v5 = vadd.f32 %v2285_v49, %v5449_v29 }
 0x274   :  { %v2287_v10 = vpop.f32.mrf.mxu1  ;;  %v2510_v4 = vpop.f32.mrf.mxu0 }
 0x275   :  { %3635 = vst [vmem:[%s6813_s5] sm:$0xff] %v2507_v44  ;;  %v5460_v30 = vadd.f32 %v2508_v50, %v2286_v5  ;;  %v2288_v32 = vadd.f32 %v2287_v10, %v5446_v46 }
 0x276   :  { %v2289_v33 = vpop.f32.mrf.mxu1  ;;  %v2512_v15 = vpop.f32.mrf.mxu0 }
 0x277   :  { %v3103_v1 = vand.u32 2147483647, %v5460_v30  ;;  %v2511_v6 = vadd.f32 %v2510_v4, %v2288_v32  ;;  %v2290_v14 = vadd.f32 %v2289_v33, %v5449_v29  ;;  %v6888_v32 = vld [vmem:[#allocation7_spill] sm:$0xff]  ;;  %v6889_v33 = vld [vmem:[#allocation8_spill] sm:$0xff] }
 0x278   :  { %v2293_v17 = vpop.f32.mrf.mxu1  ;;  %v2516_v37 = vpop.f32.mrf.mxu0  ;;  %2776 = vmatmul.mubr.bf16.gmra.mxu1 %v5143_v48  ;;  %2961 = vmatmul.mubr.bf16.gmra.mxu0 %v5145_v51 }
 0x279   :  { %v3141_v11 = vsub.f32 0.0, %v3103_v1  ;;  %3636 = vst [vmem:[%s6813_s5 + $0x18] sm:$0xff] %v2511_v6  ;;  %v5470_v57 = vadd.f32 %v2512_v15, %v2290_v14  ;;  %v2294_v58 = vadd.f32 %v2293_v17, %v5446_v46  ;;  %2783 = vmatprep.mubr.bf16.mxu1 %v5172_v19  ;;  %2968 = vmatprep.mubr.bf16.mxu0 %v5174_v28  ;;  %v6890_v6 = vld [vmem:[#allocation9_spill] sm:$0xff]  ;;  %v6891_v14 = vld [vmem:[#allocation10_spill] sm:$0xff] }
 0x27a   :  { %v2295_v45 = vpop.f32.mrf.mxu1  ;;  %v2518_v43 = vpop.f32.mrf.mxu0 }
 0x27b   :  { %v3179_v23 = vmul.f32 1.442695, %v3141_v11  ;;  %v3104_v53 = vand.u32 2147483647, %v5470_v57  ;;  %v2517_v24 = vadd.f32 %v2516_v37, %v2294_v58  ;;  %v2296_v40 = vadd.f32 %v2295_v45, %v5449_v29 }
 0x27c   :  { %v2297_v48 = vpop.f32.mrf.mxu1  ;;  %v2520_v51 = vpop.f32.mrf.mxu0 }
 0x27d   :  { %4168 = vpow2.f32 %v3179_v23  ;;  %v3142_v60 = vsub.f32 0.0, %v3104_v53  ;;  %3637 = vst [vmem:[%s6813_s5 + $0x30] sm:$0xff] %v2517_v24  ;;  %v2298_v19 = vadd.f32 %v2297_v48, %v5446_v46  ;;  %v5481_v3 = vadd.f32 %v2518_v43, %v2296_v40 }
 0x27e   :  { %v2299_v28 = vpop.f32.mrf.mxu1  ;;  %v2522_v0 = vpop.f32.mrf.mxu0 }
 0x27f   :  { %v3181_v22 = vmul.f32 1.442695, %v3142_v60  ;;  %v2521_v42 = vadd.f32 %v2520_v51, %v2298_v19  ;;  %v2300_v25 = vadd.f32 %v2299_v28, %v5449_v29  ;;  %v3105_v26 = vand.u32 2147483647, %v5481_v3 }
 0x280   :  { %v2303_v16 = vpop.f32.mrf.mxu1  ;;  %v2526_v12 = vpop.f32.mrf.mxu0  ;;  %2784 = vmatmul.mubr.bf16.gmra.mxu1 %v5179_v61  ;;  %2969 = vmatmul.mubr.bf16.gmra.mxu0 %v5181_v55 }
 0x281   :  { %4170 = vpow2.f32 %v3181_v22  ;;  %3638 = vst [vmem:[%s6813_s5 + $0x48] sm:$0xff] %v2521_v42  ;;  %v5490_v62 = vadd.f32 %v2522_v0, %v2300_v25  ;;  %v2304_v35 = vadd.f32 %v2303_v16, %v5446_v46  ;;  %2791 = vmatprep.mubr.bf16.mxu1 %v5208_v20  ;;  %2976 = vmatprep.mubr.bf16.mxu0 %v6887_v41  ;;  %v3143_v52 = vsub.f32 0.0, %v3105_v26  ;;  %v6892_v41 = vld [vmem:[#allocation11_spill] sm:$0xff] }
 0x282   :  { %v2305_v7 = vpop.f32.mrf.mxu1  ;;  %v2528_v34 = vpop.f32.mrf.mxu0 }
 0x283   :  { %v3106_v61 = vand.u32 2147483647, %v5490_v62  ;;  %v2527_v27 = vadd.f32 %v2526_v12, %v2304_v35  ;;  %v2306_v55 = vadd.f32 %v2305_v7, %v5449_v29  ;;  %v3183_v63 = vmul.f32 1.442695, %v3143_v52  ;;  %v6893_v52 = vld [vmem:[#allocation12_spill] sm:$0xff] }
 0x284   :  { %v2307_v36 = vpop.f32.mrf.mxu1  ;;  %v2530_v13 = vpop.f32.mrf.mxu0 }
 0x285   :  { %v3144_v9 = vsub.f32 0.0, %v3106_v61  ;;  %3639 = vst [vmem:[%s6813_s5 + $0x60] sm:$0xff] %v2527_v27  ;;  %v5500_v54 = vadd.f32 %v2528_v34, %v2306_v55  ;;  %v2308_v20 = vadd.f32 %v2307_v36, %v5446_v46  ;;  %4172 = vpow2.f32 %v3183_v63  ;;  %v6894_v34 = vld [vmem:[#allocation13_spill] sm:$0xff]  ;;  %v6895_v61 = vld [vmem:[#allocation14_spill] sm:$0xff] }
 0x286   :  { %v2309_v21 = vpop.f32.mrf.mxu1  ;;  %v2532_v2 = vpop.f32.mrf.mxu0 }
 0x287   :  { %v3185_v49 = vmul.f32 1.442695, %v3144_v9  ;;  %v3107_v50 = vand.u32 2147483647, %v5500_v54  ;;  %v2531_v44 = vadd.f32 %v2530_v13, %v2308_v20  ;;  %v2310_v5 = vadd.f32 %v2309_v21, %v5449_v29 }
 0x288   :  { %v2313_v10 = vpop.f32.mrf.mxu1  ;;  %v2536_v4 = vpop.f32.mrf.mxu0  ;;  %2792 = vmatmul.mubr.bf16.gmra.mxu1 %v6888_v32  ;;  %2977 = vmatmul.mubr.bf16.gmra.mxu0 %v6889_v33 }
 0x289   :  { %4174 = vpow2.f32 %v3185_v49  ;;  %v3145_v15 = vsub.f32 0.0, %v3107_v50  ;;  %3640 = vst [vmem:[%s6813_s5 + $0x78] sm:$0xff] %v2531_v44  ;;  %v2314_v1 = vadd.f32 %v2313_v10, %v5446_v46  ;;  %2799 = vmatprep.mubr.bf16.mxu1 %v6890_v6  ;;  %2984 = vmatprep.mubr.bf16.mxu0 %v6891_v14  ;;  %v5515_v37 = vadd.f32 %v2532_v2, %v2310_v5 }
 0x28a   :  { %v5513_v17 = vpop.eup %4168  ;;  %v2315_v11 = vpop.f32.mrf.mxu1  ;;  %v3065_v2 = vmax.f32 %v5460_v30, 0.0  ;;  %v3067_v6 = vmax.f32 %v5481_v3, 0.0  ;;  %v3068_v30 = vmax.f32 %v5490_v62, 0.0  ;;  %v6909_v3 = vld [vmem:[#allocation24_spill] sm:$0xff] }
 0x28b   :  { %v2538_v58 = vpop.f32.mrf.mxu0  ;;  %v3255_v45 = vadd.f32 1.0, %v5513_v17  ;;  %v3187_v43 = vmul.f32 1.442695, %v3145_v15  ;;  %v3108_v23 = vand.u32 2147483647, %v5515_v37  ;;  %v2537_v53 = vadd.f32 %v2536_v4, %v2314_v1 }
 0x28c   :  { %v2316_v24 = vadd.f32 %v2315_v11, %v5449_v29  ;;  %v2317_v40 = vpop.f32.mrf.mxu1  ;;  %v3258_v9 = vmul.f32 -0.5, %v5513_v17  ;;  %v3066_v4 = vmax.f32 %v5470_v57, 0.0 }
 0x28d   :  { %v2540_v48 = vpop.f32.mrf.mxu0  ;;  %4176 = vlog2.f32 %v3255_v45  ;;  %v2318_v51 = vadd.f32 %v2317_v40, %v5446_v46  ;;  %v3146_v19 = vsub.f32 0.0, %v3108_v23  ;;  %3641 = vst [vmem:[%s6813_s5 + $0x90] sm:$0xff] %v2537_v53 }
 0x28e   :  { %v5521_v60 = vpop.eup %4170  ;;  %4178 = vpow2.f32 %v3187_v43  ;;  %v5526_v28 = vadd.f32 %v2538_v58, %v2316_v24  ;;  %v2319_v0 = vpop.f32.mrf.mxu1  ;;  %v3259_v45 = vadd.f32 1.0, %v3258_v9  ;;  %v3261_v43 = vand.u32 2147483647, %v5513_v17 }
 0x28f   :  { %v2542_v22 = vpop.f32.mrf.mxu0  ;;  %v3264_v42 = vadd.f32 1.0, %v5521_v60  ;;  %v3189_v25 = vmul.f32 1.442695, %v3146_v19  ;;  %v2541_v16 = vadd.f32 %v2540_v48, %v2318_v51  ;;  %v2320_v7 = vadd.f32 %v2319_v0, %v5449_v29  ;;  %v6896_v0 = vld [vmem:[#allocation15_spill] sm:$0xff] }
 0x290   :  { %v3109_v26 = vand.u32 2147483647, %v5526_v28  ;;  %v2323_v12 = vpop.f32.mrf.mxu1  ;;  %2800 = vmatmul.mubr.bf16.gmra.mxu1 %v6892_v41  ;;  %2985 = vmatmul.mubr.bf16.gmra.mxu0 %v6893_v52  ;;  %v3267_v49 = vmul.f32 -0.5, %v5521_v60  ;;  %v3069_v24 = vmax.f32 %v5500_v54, 0.0  ;;  %vm3262_vm2 = vcmp.lt.f32.partialorder %v3261_v43, 0.0004427343 }
 0x291   :  { %v2546_v35 = vpop.f32.mrf.mxu0  ;;  %4180 = vlog2.f32 %v3264_v42  ;;  %2807 = vmatprep.mubr.bf16.mxu1 %v6894_v34  ;;  %2992 = vmatprep.mubr.bf16.mxu0 %v6895_v61  ;;  %3642 = vst [vmem:[%s6813_s5 + $0xa8] sm:$0xff] %v2541_v16  ;;  %v2324_v55 = vadd.f32 %v2323_v12, %v5446_v46  ;;  %v5542_v20 = vadd.f32 %v2542_v22, %v2320_v7  ;;  %v6897_v22 = vld [vmem:[#allocation16_spill] sm:$0xff]  ;;  %v6898_v16 = vld [vmem:[#allocation17_spill] sm:$0xff]  ;;  %v6899_v12 = vld [vmem:[#allocation18_spill] sm:$0xff]  ;;  %v3270_v9 = vand.u32 2147483647, %v5521_v60 }
 0x292   :  { %4182 = vpow2.f32 %v3189_v25  ;;  %v3147_v27 = vsub.f32 0.0, %v3109_v26  ;;  %v2325_v63 = vpop.f32.mrf.mxu1  ;;  %v5539_v13 = vpop.eup %4172  ;;  %v3268_v53 = vadd.f32 1.0, %v3267_v49  ;;  %v3070_v25 = vmax.f32 %v5515_v37, 0.0 }
 0x293   :  { %v2548_v36 = vpop.f32.mrf.mxu0  ;;  %v2326_v21 = vadd.f32 %v2325_v63, %v5449_v29  ;;  %v3273_v50 = vadd.f32 1.0, %v5539_v13  ;;  %v3110_v32 = vand.u32 2147483647, %v5542_v20  ;;  %v2547_v33 = vadd.f32 %v2546_v35, %v2324_v55 }
 0x294   :  { %v3191_v44 = vmul.f32 1.442695, %v3147_v27  ;;  %v2327_v5 = vpop.f32.mrf.mxu1  ;;  %v3276_v42 = vmul.f32 -0.5, %v5539_v13  ;;  %v3279_v43 = vand.u32 2147483647, %v5539_v13 }
 0x295   :  { %v2550_v10 = vpop.f32.mrf.mxu0  ;;  %v5550_v15 = vadd.f32 %v2548_v36, %v2326_v21  ;;  %4184 = vlog2.f32 %v3273_v50  ;;  %v2328_v14 = vadd.f32 %v2327_v5, %v5446_v46  ;;  %3643 = vst [vmem:[%s6813_s5 + $0xc0] sm:$0xff] %v2547_v33  ;;  %v3148_v40 = vsub.f32 0.0, %v3110_v32 }
 0x296   :  { %v5552_v1 = vpop.eup %4174  ;;  %v2329_v11 = vpop.f32.mrf.mxu1  ;;  %4186 = vpow2.f32 %v3191_v44  ;;  %v3260_v36 = vmul.f32 %v5513_v17, %v3259_v45  ;;  %v3269_v21 = vmul.f32 %v5521_v60, %v3268_v53  ;;  %v3277_v45 = vadd.f32 1.0, %v3276_v42  ;;  %v6900_v42 = vld [vmem:[#allocation19_spill] sm:$0xff] }
 0x297   :  { %v2552_v58 = vpop.f32.mrf.mxu0  ;;  %v3282_v23 = vadd.f32 1.0, %v5552_v1  ;;  %v3111_v48 = vand.u32 2147483647, %v5550_v15  ;;  %v2551_v26 = vadd.f32 %v2550_v10, %v2328_v14  ;;  %v3193_v41 = vmul.f32 1.442695, %v3148_v40 }
 0x298   :  { %v2333_v51 = vpop.f32.mrf.mxu1  ;;  %2808 = vmatmul.mubr.bf16.gmra.mxu1 %v6896_v0  ;;  %2993 = vmatmul.mubr.bf16.gmra.mxu0 %v6897_v22  ;;  %v2330_v7 = vadd.f32 %v2329_v11, %v5449_v29  ;;  %vm3271_vm3 = vcmp.lt.f32.partialorder %v3270_v9, 0.0004427343  ;;  %vm5608_vm4 = vcmp.lt.f32.partialorder %v3279_v43, 0.0004427343 }
 0x299   :  { %v2556_v19 = vpop.f32.mrf.mxu0  ;;  %4188 = vlog2.f32 %v3282_v23  ;;  %2815 = vmatprep.mubr.bf16.mxu1 %v6898_v16  ;;  %3000 = vmatprep.mubr.bf16.mxu0 %v6899_v12  ;;  %v3149_v52 = vsub.f32 0.0, %v3111_v48  ;;  %v2334_v34 = vadd.f32 %v2333_v51, %v5446_v46  ;;  %3644 = vst [vmem:[%s6813_s5 + $0xd8] sm:$0xff] %v2551_v26  ;;  %v3285_v48 = vmul.f32 -0.5, %v5552_v1  ;;  %v6901_v26 = vld [vmem:[#allocation20_spill] sm:$0xff] }
 0x29a   :  { %v4177_v35 = vpop.eup %4176  ;;  %v2335_v61 = vpop.f32.mrf.mxu1  ;;  %4190 = vpow2.f32 %v3193_v41  ;;  %v5582_v33 = vadd.f32 %v2552_v58, %v2330_v7  ;;  %v6903_v7 = vld [vmem:[#allocation22_spill] sm:$0xff] }
 0x29b   :  { %v2558_v27 = vpop.f32.mrf.mxu0  ;;  %v5572_v55 = vpop.eup %4178  ;;  %v3257_v63 = vmul.f32 0.6931472, %v4177_v35  ;;  %v2336_v50 = vadd.f32 %v2335_v61, %v5449_v29  ;;  %v3195_v32 = vmul.f32 1.442695, %v3149_v52  ;;  %v2557_v17 = vadd.f32 %v2556_v19, %v2334_v34  ;;  %v6902_v52 = vld [vmem:[#allocation21_spill] sm:$0xff] }
 0x29c   :  { %v3291_v49 = vadd.f32 1.0, %v5572_v55  ;;  %v2337_v44 = vpop.f32.mrf.mxu1  ;;  %v3112_v51 = vand.u32 2147483647, %v5582_v33  ;;  %v3071_v19 = vmax.f32 %v5526_v28, 0.0  ;;  %v3278_v61 = vmul.f32 %v5539_v13, %v3277_v45 }
 0x29d   :  { %v2560_v5 = vpop.f32.mrf.mxu0  ;;  %v3263_v10 = vsel %vm3262_vm2, %v3260_v36, %v3257_v63  ;;  %3645 = vst [vmem:[%s6813_s5 + $0xf0] sm:$0xff] %v2557_v17  ;;  %v5600_v35 = vadd.f32 %v2558_v27, %v2336_v50  ;;  %v2338_v41 = vadd.f32 %v2337_v44, %v5446_v46  ;;  %v3294_v13 = vmul.f32 -0.5, %v5572_v55 }
 0x29e   :  { %v4181_v14 = vpop.eup %4180  ;;  %v3597_v11 = vadd.f32 %v3263_v10, %v3065_v2  ;;  %4192 = vlog2.f32 %v3291_v49  ;;  %v2339_v23 = vpop.f32.mrf.mxu1  ;;  %v3288_v2 = vand.u32 2147483647, %v5552_v1  ;;  %v3150_v12 = vsub.f32 0.0, %v3112_v51 }
 0x29f   :  { %v2562_v60 = vpop.f32.mrf.mxu0  ;;  %v5585_v53 = vpop.eup %4182  ;;  %v3266_v40 = vmul.f32 0.6931472, %v4181_v14  ;;  %4194 = vpow2.f32 %v3195_v32  ;;  %v3113_v50 = vand.u32 2147483647, %v5600_v35  ;;  %v2561_v44 = vadd.f32 %v2560_v5, %v2338_v41 }
 0x2a0   :  { %3673 = vst [vmem:[%s6813_s5 + $0x8] sm:$0xff] %v3597_v11  ;;  %v3300_v58 = vadd.f32 1.0, %v5585_v53  ;;  %v2343_v0 = vpop.f32.mrf.mxu1  ;;  %2816 = vmatmul.mubr.bf16.gmra.mxu1 %v6900_v42  ;;  %3001 = vmatmul.mubr.bf16.gmra.mxu0 %v6901_v26  ;;  %v3197_v49 = vmul.f32 1.442695, %v3150_v12  ;;  %vm5621_vm5 = vcmp.lt.f32.partialorder %v3288_v2, 0.0004427343 }
 0x2a1   :  { %v2566_v22 = vpop.f32.mrf.mxu0  ;;  %v3272_v16 = vsel %vm3271_vm3, %v3269_v21, %v3266_v40  ;;  %2823 = vmatprep.mubr.bf16.mxu1 %v6902_v52  ;;  %3008 = vmatprep.mubr.bf16.mxu0 %v6903_v7  ;;  %v3286_v21 = vadd.f32 1.0, %v3285_v48  ;;  %v2344_v32 = vadd.f32 %v2343_v0, %v5446_v46  ;;  %v3303_v5 = vmul.f32 -0.5, %v5585_v53  ;;  %3646 = vst [vmem:[%s6813_s5 + $0x108] sm:$0xff] %v2561_v44  ;;  %v6908_v7 = vld [vmem:[#allocation23_spill] sm:$0xff] }
 0x2a2   :  { %v3598_v34 = vadd.f32 %v3272_v16, %v3066_v4  ;;  %4196 = vlog2.f32 %v3300_v58  ;;  %v2345_v36 = vpop.f32.mrf.mxu1  ;;  %v4185_v27 = vpop.eup %4184  ;;  %v2340_v4 = vadd.f32 %v2339_v23, %v5449_v29  ;;  %v3151_v40 = vsub.f32 0.0, %v3113_v50 }
 0x2a3   :  { %v2568_v9 = vpop.f32.mrf.mxu0  ;;  %v5613_v10 = vpop.eup %4186  ;;  %v3275_v57 = vmul.f32 0.6931472, %v4185_v27  ;;  %4198 = vpow2.f32 %v3197_v49  ;;  %v2567_v51 = vadd.f32 %v2566_v22, %v2344_v32  ;;  %v3287_v26 = vmul.f32 %v5552_v1, %v3286_v21  ;;  %v6911_v27 = vld [vmem:[#allocation26_spill] sm:$0xff] }
 0x2a4   :  { %3674 = vst [vmem:[%s6813_s5 + $0x20] sm:$0xff] %v3598_v34  ;;  %v2347_v17 = vpop.f32.mrf.mxu1  ;;  %v3309_v45 = vadd.f32 1.0, %v5613_v10  ;;  %v5632_v48 = vadd.f32 %v2562_v60, %v2340_v4  ;;  %v3295_v16 = vadd.f32 1.0, %v3294_v13  ;;  %v3297_v12 = vand.u32 2147483647, %v5572_v55 }
 0x2a5   :  { %v2570_v14 = vpop.f32.mrf.mxu0  ;;  %v3281_v23 = vsel %vm5608_vm4, %v3278_v61, %v3275_v57  ;;  %v3199_v41 = vmul.f32 1.442695, %v3151_v40  ;;  %3647 = vst [vmem:[%s6813_s5 + $0x120] sm:$0xff] %v2567_v51  ;;  %v2346_v60 = vadd.f32 %v2345_v36, %v5449_v29  ;;  %v3306_v34 = vand.u32 2147483647, %v5585_v53  ;;  %v6910_v36 = vld [vmem:[#allocation25_spill] sm:$0xff] }
 0x2a6   :  { %v4189_v43 = vpop.eup %4188  ;;  %v2349_v2 = vpop.f32.mrf.mxu1  ;;  %v3599_v0 = vadd.f32 %v3281_v23, %v3067_v6  ;;  %4200 = vlog2.f32 %v3309_v45  ;;  %v3114_v61 = vand.u32 2147483647, %v5632_v48  ;;  %v2348_v63 = vadd.f32 %v2347_v17, %v5446_v46 }
 0x2a7   :  { %v5634_v58 = vpop.f32.mrf.mxu0  ;;  %v3284_v42 = vmul.f32 0.6931472, %v4189_v43  ;;  %v5648_v6 = vpop.eup %4190  ;;  %v3304_v49 = vadd.f32 1.0, %v3303_v5  ;;  %v3312_v50 = vmul.f32 -0.5, %v5613_v10  ;;  %4202 = vpow2.f32 %v3199_v41 }
 0x2a8   :  { %v2353_v22 = vpop.f32.mrf.mxu1  ;;  %2824 = vmatmul.mubr.bf16.gmra.mxu1 %v6908_v7  ;;  %3009 = vmatmul.mubr.bf16.gmra.mxu0 %v6909_v3  ;;  %3675 = vst [vmem:[%s6813_s5 + $0x38] sm:$0xff] %v3599_v0  ;;  %v3318_v44 = vadd.f32 1.0, %v5648_v6  ;;  %v3152_v32 = vsub.f32 0.0, %v3114_v61  ;;  %v5666_v11 = vadd.f32 %v2568_v9, %v2346_v60  ;;  %v2571_v17 = vadd.f32 %v2570_v14, %v2348_v63  ;;  %v6914_v63 = vld [vmem:[#allocation27_spill] sm:$0xff] }
 0x2a9   :  { %v5644_v52 = vpop.f32.mrf.mxu0  ;;  %v3290_v1 = vsel %vm5621_vm5, %v3287_v26, %v3284_v42  ;;  %2831 = vmatprep.mubr.bf16.mxu1 %v6910_v36  ;;  %3016 = vmatprep.mubr.bf16.mxu0 %v6911_v27  ;;  %v3072_v5 = vmax.f32 %v5542_v20, 0.0  ;;  %vm3298_vm6 = vcmp.lt.f32.partialorder %v3297_v12, 0.0004427343  ;;  %v3073_v40 = vmax.f32 %v5550_v15, 0.0  ;;  %v6915_v36 = vld [vmem:[#allocation28_spill] sm:$0xff] }
 0x2aa   :  { %v3600_v21 = vadd.f32 %v3290_v1, %v3068_v30  ;;  %v2355_v57 = vpop.f32.mrf.mxu1  ;;  %v3296_v30 = vmul.f32 %v5572_v55, %v3295_v16  ;;  %4204 = vlog2.f32 %v3318_v44  ;;  %v3201_v14 = vmul.f32 1.442695, %v3152_v32  ;;  %3648 = vst [vmem:[%s6813_s5 + $0x138] sm:$0xff] %v2571_v17  ;;  %v6917_v17 = vld [vmem:[#allocation30_spill] sm:$0xff] }
 0x2ab   :  { %v5664_v13 = vpop.f32.mrf.mxu0  ;;  %v4193_v4 = vpop.eup %4192  ;;  %v3305_v0 = vmul.f32 %v5585_v53, %v3304_v49  ;;  %vm5681_vm7 = vcmp.lt.f32.partialorder %v3306_v34, 0.0004427343  ;;  %v3115_v42 = vand.u32 2147483647, %v5666_v11  ;;  %v3313_v60 = vadd.f32 1.0, %v3312_v50 }
 0x2ac   :  { %v5668_v45 = vpop.eup %4194  ;;  %3676 = vst [vmem:[%s6813_s5 + $0x50] sm:$0xff] %v3600_v21  ;;  %v3293_v62 = vmul.f32 0.6931472, %v4193_v4  ;;  %v2357_v43 = vpop.f32.mrf.mxu1  ;;  %v3315_v7 = vand.u32 2147483647, %v5613_v10  ;;  %v2350_v53 = vadd.f32 %v2349_v2, %v5449_v29  ;;  %v3321_v54 = vmul.f32 -0.5, %v5648_v6 }
 0x2ad   :  { %v2580_v23 = vpop.f32.mrf.mxu0  ;;  %v3327_v9 = vadd.f32 1.0, %v5668_v45  ;;  %v3153_v1 = vsub.f32 0.0, %v3115_v42  ;;  %v2356_v27 = vadd.f32 %v2355_v57, %v5449_v29  ;;  %v2358_v21 = vadd.f32 %v2357_v43, %v5446_v46  ;;  %v6916_v2 = vld [vmem:[#allocation29_spill] sm:$0xff] }
 0x2ae   :  { %v3299_v51 = vsel %vm3298_vm6, %v3296_v30, %v3293_v62  ;;  %v2359_v26 = vpop.f32.mrf.mxu1  ;;  %v5707_v4 = vadd.f32 %v5634_v58, %v2350_v53  ;;  %vm5713_vm8 = vcmp.lt.f32.partialorder %v3315_v7, 0.0004427343  ;;  %v3074_v43 = vmax.f32 %v5582_v33, 0.0 }
 0x2af   :  { %v2582_v16 = vpop.f32.mrf.mxu0  ;;  %v4197_v12 = vpop.eup %4196  ;;  %v3601_v41 = vadd.f32 %v3299_v51, %v3069_v24  ;;  %4206 = vlog2.f32 %v3327_v9  ;;  %v2354_v24 = vadd.f32 %v2353_v22, %v5446_v46  ;;  %v3203_v44 = vmul.f32 1.442695, %v3153_v1 }
 0x2b0   :  { %v3302_v3 = vmul.f32 0.6931472, %v4197_v12  ;;  %4208 = vpow2.f32 %v3201_v14  ;;  %v2363_v34 = vpop.f32.mrf.mxu1  ;;  %2832 = vmatmul.mubr.bf16.gmra.mxu1 %v6914_v63  ;;  %3017 = vmatmul.mubr.bf16.gmra.mxu0 %v6915_v36  ;;  %v5702_v49 = vpop.eup %4198  ;;  %v2360_v32 = vadd.f32 %v2359_v26, %v5449_v29  ;;  %v3314_v58 = vmul.f32 %v5613_v10, %v3313_v60 }
 0x2b1   :  { %v5690_v61 = vpop.f32.mrf.mxu0  ;;  %3677 = vst [vmem:[%s6813_s5 + $0x68] sm:$0xff] %v3601_v41  ;;  %2839 = vmatprep.mubr.bf16.mxu1 %v6916_v2  ;;  %3024 = vmatprep.mubr.bf16.mxu0 %v6917_v17  ;;  %v3336_v9 = vadd.f32 1.0, %v5702_v49  ;;  %4210 = vpow2.f32 %v3203_v44  ;;  %v3116_v51 = vand.u32 2147483647, %v5707_v4  ;;  %v3330_v26 = vmul.f32 -0.5, %v5668_v45  ;;  %v6923_v17 = vld [vmem:[#allocation34_spill] sm:$0xff] }
 0x2b2   :  { %v3308_v50 = vsel %vm5681_vm7, %v3305_v0, %v3302_v3  ;;  %v2365_v22 = vpop.f32.mrf.mxu1  ;;  %v2577_v0 = vadd.f32 %v5644_v52, %v2354_v24  ;;  %v5732_v10 = vadd.f32 %v5664_v13, %v2356_v27  ;;  %v2581_v52 = vadd.f32 %v2580_v23, %v2358_v21  ;;  %v6920_v21 = vld [vmem:[#allocation31_spill] sm:$0xff] }
 0x2b3   :  { %v2588_v62 = vpop.f32.mrf.mxu0  ;;  %v3602_v57 = vadd.f32 %v3308_v50, %v3070_v25  ;;  %v4201_v14 = vpop.eup %4200  ;;  %v3322_v25 = vadd.f32 1.0, %v3321_v54  ;;  %4212 = vlog2.f32 %v3336_v9  ;;  %v3154_v12 = vsub.f32 0.0, %v3116_v51 }
 0x2b4   :  { %v2367_v55 = vpop.f32.mrf.mxu1  ;;  %v3311_v37 = vmul.f32 0.6931472, %v4201_v14  ;;  %3649 = vst [vmem:[%s6813_s5 + $0x150] sm:$0xff] %v2577_v0  ;;  %v5734_v41 = vadd.f32 %v2582_v16, %v2360_v32  ;;  %v3324_v1 = vand.u32 2147483647, %v5648_v6  ;;  %v2364_v63 = vadd.f32 %v2363_v34, %v5446_v46  ;;  %v5745_v36 = vpop.eup %4202  ;;  %3650 = vst [vmem:[%s6813_s5 + $0x168] sm:$0xff] %v2581_v52 }
 0x2b5   :  { %v5722_v42 = vpop.f32.mrf.mxu0  ;;  %3678 = vst [vmem:[%s6813_s5 + $0x80] sm:$0xff] %v3602_v57  ;;  %v3333_v53 = vand.u32 2147483647, %v5668_v45  ;;  %v3205_v23 = vmul.f32 1.442695, %v3154_v12  ;;  %v2366_v54 = vadd.f32 %v2365_v22, %v5449_v29  ;;  %v6921_v34 = vld [vmem:[#allocation32_spill] sm:$0xff]  ;;  %v3323_v28 = vmul.f32 %v5648_v6, %v3322_v25 }
 0x2b6   :  { %v5736_v60 = vpop.f32.mrf.mxu1  ;;  %v3317_v3 = vsel %vm5713_vm8, %v3314_v58, %v3311_v37  ;;  %v3117_v16 = vand.u32 2147483647, %v5732_v10  ;;  %v3339_v50 = vmul.f32 -0.5, %v5702_v49  ;;  %v3345_v44 = vadd.f32 1.0, %v5745_v36  ;;  %v6922_v32 = vld [vmem:[#allocation33_spill] sm:$0xff] }
 0x2b7   :  { %v5738_v7 = vpop.f32.mrf.mxu0  ;;  %v3603_v13 = vadd.f32 %v3317_v3, %v3071_v19  ;;  %v4205_v2 = vpop.eup %4204  ;;  %v3331_v19 = vadd.f32 1.0, %v3330_v26  ;;  %4214 = vpow2.f32 %v3205_v23  ;;  %v3118_v30 = vand.u32 2147483647, %v5734_v41 }
 0x2b8   :  { %v5754_v24 = vpop.f32.mrf.mxu1  ;;  %2840 = vmatmul.mubr.bf16.gmra.mxu1 %v6920_v21  ;;  %3025 = vmatmul.mubr.bf16.gmra.mxu0 %v6921_v34  ;;  %v3320_v22 = vmul.f32 0.6931472, %v4205_v2  ;;  %v3155_v57 = vsub.f32 0.0, %v3117_v16  ;;  %vm3325_vm9 = vcmp.lt.f32.partialorder %v3324_v1, 0.0004427343  ;;  %4216 = vlog2.f32 %v3345_v44  ;;  %v6927_v44 = vld [vmem:[#allocation36_spill] sm:$0xff] }
 0x2b9   :  { %v5756_v27 = vpop.f32.mrf.mxu0  ;;  %2847 = vmatprep.mubr.bf16.mxu1 %v6922_v32  ;;  %3032 = vmatprep.mubr.bf16.mxu0 %v6923_v17  ;;  %3679 = vst [vmem:[%s6813_s5 + $0x98] sm:$0xff] %v3603_v13  ;;  %vm5771_vm10 = vcmp.lt.f32.partialorder %v3333_v53, 0.0004427343  ;;  %v2587_v58 = vadd.f32 %v5690_v61, %v2364_v63  ;;  %v3156_v25 = vsub.f32 0.0, %v3118_v30  ;;  %v5776_v26 = vadd.f32 %v2588_v62, %v2366_v54 }
 0x2ba   :  { %v2375_v9 = vpop.f32.mrf.mxu1  ;;  %v3326_v0 = vsel %vm3325_vm9, %v3323_v28, %v3320_v22  ;;  %v3207_v37 = vmul.f32 1.442695, %v3155_v57  ;;  %v3332_v13 = vmul.f32 %v5668_v45, %v3331_v19  ;;  %v2368_v61 = vadd.f32 %v2367_v55, %v5446_v46  ;;  %v6929_v57 = vld [vmem:[#allocation38_spill] sm:$0xff] }
 0x2bb   :  { %v5769_v6 = vpop.f32.mrf.mxu0  ;;  %v3604_v1 = vadd.f32 %v3326_v0, %v3072_v5  ;;  %3651 = vst [vmem:[%s6813_s5 + $0x180] sm:$0xff] %v2587_v58  ;;  %v3340_v62 = vadd.f32 1.0, %v3339_v50  ;;  %v3342_v63 = vand.u32 2147483647, %v5702_v49  ;;  %v3075_v45 = vmax.f32 %v5600_v35, 0.0  ;;  %v6926_v50 = vld [vmem:[#allocation35_spill] sm:$0xff] }
 0x2bc   :  { %v4207_v51 = vpop.eup %4206  ;;  %v5778_v12 = vpop.f32.mrf.mxu1  ;;  %4218 = vpow2.f32 %v3207_v37  ;;  %v3209_v5 = vmul.f32 1.442695, %v3156_v25  ;;  %v3119_v55 = vand.u32 2147483647, %v5776_v26  ;;  %v3348_v34 = vmul.f32 -0.5, %v5745_v36 }
 0x2bd   :  { %v5780_v52 = vpop.f32.mrf.mxu0  ;;  %v5782_v3 = vpop.eup %4208  ;;  %v3329_v53 = vmul.f32 0.6931472, %v4207_v51  ;;  %3680 = vst [vmem:[%s6813_s5 + $0xb0] sm:$0xff] %v3604_v1  ;;  %v3076_v2 = vmax.f32 %v5632_v48, 0.0  ;;  %v2591_v22 = vadd.f32 %v5722_v42, %v2368_v61  ;;  %v2370_v15 = vadd.f32 %v5736_v60, %v5449_v29 }
 0x2be   :  { %v3354_v23 = vadd.f32 1.0, %v5782_v3  ;;  %v2379_v16 = vpop.f32.mrf.mxu1  ;;  %v5810_v32 = vpop.eup %4210  ;;  %v3157_v17 = vsub.f32 0.0, %v3119_v55  ;;  %v3341_v14 = vmul.f32 %v5702_v49, %v3340_v62  ;;  %vm5821_vm11 = vcmp.lt.f32.partialorder %v3342_v63, 0.0004427343 }
 0x2bf   :  { %v5793_v54 = vpop.f32.mrf.mxu0  ;;  %v3335_v20 = vsel %vm5771_vm10, %v3332_v13, %v3329_v53  ;;  %v3077_v42 = vmax.f32 %v5666_v11, 0.0  ;;  %v3363_v51 = vadd.f32 1.0, %v5810_v32  ;;  %3652 = vst [vmem:[%s6813_s5 + $0x198] sm:$0xff] %v2591_v22  ;;  %v5835_v49 = vadd.f32 %v5738_v7, %v2370_v15 }
 0x2c0   :  { %v3605_v21 = vadd.f32 %v3335_v20, %v3073_v40  ;;  %4220 = vlog2.f32 %v3354_v23  ;;  %v2383_v28 = vpop.f32.mrf.mxu1  ;;  %2848 = vmatmul.mubr.bf16.gmra.mxu1 %v6926_v50  ;;  %3033 = vmatmul.mubr.bf16.gmra.mxu0 %v6927_v44  ;;  %v6928_v40 = vld [vmem:[#allocation37_spill] sm:$0xff]  ;;  %v4213_v30 = vpop.eup %4212  ;;  %v3211_v25 = vmul.f32 1.442695, %v3157_v17  ;;  %v2374_v1 = vadd.f32 %v5754_v24, %v5446_v46 }
 0x2c1   :  { %v5806_v19 = vpop.f32.mrf.mxu0  ;;  %4222 = vpow2.f32 %v3209_v5  ;;  %2855 = vmatprep.mubr.bf16.mxu1 %v6928_v40  ;;  %3040 = vmatprep.mubr.bf16.mxu0 %v6929_v57  ;;  %v3338_v37 = vmul.f32 0.6931472, %v4213_v30  ;;  %v3349_v53 = vadd.f32 1.0, %v3348_v34  ;;  %v3357_v13 = vmul.f32 -0.5, %v5782_v3  ;;  %v6933_v57 = vld [vmem:[#allocation40_spill] sm:$0xff] }
 0x2c2   :  { %3681 = vst [vmem:[%s6813_s5 + $0xc8] sm:$0xff] %v3605_v21  ;;  %v5827_v60 = vpop.f32.mrf.mxu1  ;;  %4224 = vlog2.f32 %v3363_v51  ;;  %v2376_v61 = vadd.f32 %v2375_v9, %v5449_v29  ;;  %v3078_v20 = vmax.f32 %v5707_v4, 0.0  ;;  %v3120_v7 = vand.u32 2147483647, %v5835_v49 }
 0x2c3   :  { %v5829_v0 = vpop.f32.mrf.mxu0  ;;  %v3344_v23 = vsel %vm5821_vm11, %v3341_v14, %v3338_v37  ;;  %4226 = vpow2.f32 %v3211_v25  ;;  %v3351_v5 = vand.u32 2147483647, %v5745_v36  ;;  %v2597_v55 = vadd.f32 %v5756_v27, %v2374_v1 }
 0x2c4   :  { %v5841_v62 = vpop.f32.mrf.mxu1  ;;  %v3606_v24 = vadd.f32 %v3344_v23, %v3074_v43  ;;  %v5854_v9 = vadd.f32 %v5769_v6, %v2376_v61  ;;  %v5860_v50 = vpop.eup %4214  ;;  %v3158_v44 = vsub.f32 0.0, %v3120_v7  ;;  %v2378_v17 = vadd.f32 %v5778_v12, %v5446_v46 }
 0x2c5   :  { %v5843_v63 = vpop.f32.mrf.mxu0  ;;  %v2380_v33 = vadd.f32 %v2379_v16, %v5449_v29  ;;  %v2384_v43 = vadd.f32 %v2383_v28, %v5446_v46  ;;  %v4217_v22 = vpop.eup %4216  ;;  %v3350_v27 = vmul.f32 %v5745_v36, %v3349_v53  ;;  %v3358_v6 = vadd.f32 1.0, %v3357_v13  ;;  %3653 = vst [vmem:[%s6813_s5 + $0x1b0] sm:$0xff] %v2597_v55  ;;  %v6932_v28 = vld [vmem:[#allocation39_spill] sm:$0xff] }
 0x2c6   :  { %v5856_v21 = vpop.f32.mrf.mxu1  ;;  %3682 = vst [vmem:[%s6813_s5 + $0xe0] sm:$0xff] %v3606_v24  ;;  %v3366_v15 = vmul.f32 -0.5, %v5810_v32  ;;  %v3372_v40 = vadd.f32 1.0, %v5860_v50  ;;  %v3347_v30 = vmul.f32 0.6931472, %v4217_v22  ;;  %v2601_v58 = vadd.f32 %v5780_v52, %v2378_v17 }
 0x2c7   :  { %v5858_v34 = vpop.f32.mrf.mxu0  ;;  %v3213_v14 = vmul.f32 1.442695, %v3158_v44  ;;  %v3121_v36 = vand.u32 2147483647, %v5854_v9  ;;  %vm3352_vm12 = vcmp.lt.f32.partialorder %v3351_v5, 0.0004427343  ;;  %v5887_v37 = vadd.f32 %v5793_v54, %v2380_v33 }
 0x2c8   :  { %v5875_v12 = vpop.f32.mrf.mxu1  ;;  %2856 = vmatmul.mubr.bf16.gmra.mxu1 %v6932_v28  ;;  %3041 = vmatmul.mubr.bf16.gmra.mxu0 %v6933_v57  ;;  %v3360_v51 = vand.u32 2147483647, %v5782_v3  ;;  %4228 = vlog2.f32 %v3372_v40  ;;  %v3353_v13 = vsel %vm3352_vm12, %v3350_v27, %v3347_v30  ;;  %3654 = vst [vmem:[%s6813_s5 + $0x1c8] sm:$0xff] %v2601_v58  ;;  %v3367_v54 = vadd.f32 1.0, %v3366_v15 }
 0x2c9   :  { %v5877_v16 = vpop.f32.mrf.mxu0  ;;  %2863 = vmatprep.mubr.bf16.mxu1 %v5388_v56  ;;  %3048 = vmatprep.mubr.bf16.mxu0 %v5390_v31  ;;  %v5893_v53 = vpop.eup %4218  ;;  %4230 = vpow2.f32 %v3213_v14  ;;  %v3159_v52 = vsub.f32 0.0, %v3121_v36  ;;  %v2607_v56 = vadd.f32 %v5806_v19, %v2384_v43  ;;  %v3607_v31 = vadd.f32 %v3353_v13, %v3075_v45 }
 0x2ca   :  { %v5889_v25 = vpop.f32.mrf.mxu1  ;;  %v3079_v61 = vmax.f32 %v5732_v10, 0.0  ;;  %v3381_v23 = vadd.f32 1.0, %v5893_v53  ;;  %v3359_v55 = vmul.f32 %v5782_v3, %v3358_v6  ;;  %v3375_v44 = vmul.f32 -0.5, %v5860_v50 }
 0x2cb   :  { %v5891_v1 = vpop.f32.mrf.mxu0  ;;  %v3080_v17 = vmax.f32 %v5734_v41, 0.0  ;;  %v3215_v19 = vmul.f32 1.442695, %v3159_v52  ;;  %3655 = vst [vmem:[%s6813_s5 + $0x1e0] sm:$0xff] %v2607_v56  ;;  %3683 = vst [vmem:[%s6813_s5 + $0xf8] sm:$0xff] %v3607_v31  ;;  %v2386_v3 = vadd.f32 %v5827_v60, %v5449_v29  ;;  %v3081_v15 = vmax.f32 %v5776_v26, 0.0 }
 0x2cc   :  { %v5903_v7 = vpop.f32.mrf.mxu1  ;;  %4232 = vlog2.f32 %v3381_v23  ;;  %v3122_v33 = vand.u32 2147483647, %v5887_v37  ;;  %vm3361_vm13 = vcmp.lt.f32.partialorder %v3360_v51, 0.0004427343  ;;  %v3369_v27 = vand.u32 2147483647, %v5810_v32 }
 0x2cd   :  { %v5905_v24 = vpop.f32.mrf.mxu0  ;;  %v4221_v5 = vpop.eup %4220  ;;  %v3368_v28 = vmul.f32 %v5810_v32, %v3367_v54  ;;  %4234 = vpow2.f32 %v3215_v19  ;;  %v3376_v58 = vadd.f32 1.0, %v3375_v44  ;;  %v3378_v51 = vand.u32 2147483647, %v5860_v50 }
 0x2ce   :  { %v5913_v35 = vpop.eup %4222  ;;  %v3356_v45 = vmul.f32 0.6931472, %v4221_v5  ;;  %v5921_v43 = vpop.f32.mrf.mxu1  ;;  %v3160_v57 = vsub.f32 0.0, %v3122_v33  ;;  %vm3370_vm14 = vcmp.lt.f32.partialorder %v3369_v27, 0.0004427343  ;;  %v3082_v31 = vmax.f32 %v5835_v49, 0.0 }
 0x2cf   :  { %v5923_v22 = vpop.f32.mrf.mxu0  ;;  %v3390_v6 = vadd.f32 1.0, %v5913_v35  ;;  %v4225_v60 = vpop.eup %4224  ;;  %vm5966_vm15 = vcmp.lt.f32.partialorder %v3378_v51, 0.0004427343  ;;  %v2390_v33 = vadd.f32 %v5856_v21, %v5449_v29 }
 0x2d0   :  { %v3362_v40 = vsel %vm3361_vm13, %v3359_v55, %v3356_v45  ;;  %v5929_v30 = vpop.f32.mrf.mxu1  ;;  %2864 = vmatmul.mubr.bf16.gmra.mxu1 %v5392_v59  ;;  %3049 = vmatmul.mubr.bf16.gmra.mxu0 %v5394_v39  ;;  %v5940_v32 = vpop.eup %4226  ;;  %v3365_v13 = vmul.f32 0.6931472, %v4225_v60  ;;  %v3217_v52 = vmul.f32 1.442695, %v3160_v57  ;;  %v5943_v59 = vadd.f32 %v5829_v0, %v2386_v3 }
 0x2d1   :  { %v5931_v14 = vpop.f32.mrf.mxu0  ;;  %v3608_v36 = vadd.f32 %v3362_v40, %v3076_v2  ;;  %4236 = vlog2.f32 %v3390_v6  ;;  %2871 = vmatprep.mubr.bf16.mxu1 %v5408_v38  ;;  %3056 = vmatprep.mubr.bf16.mxu0 %v5410_v47  ;;  %v2388_v39 = vadd.f32 %v5841_v62, %v5446_v46  ;;  %v3384_v38 = vmul.f32 -0.5, %v5893_v53 }
 0x2d2   :  { %v5947_v48 = vpop.f32.mrf.mxu1  ;;  %v3393_v47 = vmul.f32 -0.5, %v5913_v35  ;;  %v3399_v56 = vadd.f32 1.0, %v5940_v32  ;;  %v3371_v0 = vsel %vm3370_vm14, %v3368_v28, %v3365_v13  ;;  %4238 = vpow2.f32 %v3217_v52 }
 0x2d3   :  { %v5949_v2 = vpop.f32.mrf.mxu0  ;;  %3684 = vst [vmem:[%s6813_s5 + $0x110] sm:$0xff] %v3608_v36  ;;  %v3123_v62 = vand.u32 2147483647, %v5943_v59  ;;  %v3609_v5 = vadd.f32 %v3371_v0, %v3077_v42  ;;  %v3377_v55 = vmul.f32 %v5860_v50, %v3376_v58  ;;  %v2611_v45 = vadd.f32 %v5843_v63, %v2388_v39 }
 0x2d4   :  { %v5959_v54 = vpop.f32.mrf.mxu1  ;;  %4240 = vlog2.f32 %v3399_v56  ;;  %v2394_v3 = vadd.f32 %v5875_v12, %v5446_v46  ;;  %v3385_v50 = vadd.f32 1.0, %v3384_v38  ;;  %v3387_v6 = vand.u32 2147483647, %v5893_v53 }
 0x2d5   :  { %v5961_v23 = vpop.f32.mrf.mxu0  ;;  %v3161_v19 = vsub.f32 0.0, %v3123_v62  ;;  %v4229_v42 = vpop.eup %4228  ;;  %3685 = vst [vmem:[%s6813_s5 + $0x128] sm:$0xff] %v3609_v5  ;;  %v3394_v40 = vadd.f32 1.0, %v3393_v47  ;;  %v2396_v63 = vadd.f32 %v5889_v25, %v5449_v29  ;;  %3656 = vst [vmem:[%s6813_s5 + $0x1f8] sm:$0xff] %v2611_v45  ;;  %v5991_v57 = vadd.f32 %v5858_v34, %v2390_v33 }
 0x2d6   :  { %v5975_v27 = vpop.f32.mrf.mxu1  ;;  %v5985_v21 = vpop.eup %4230  ;;  %v3374_v28 = vmul.f32 0.6931472, %v4229_v42  ;;  %v2617_v60 = vadd.f32 %v5877_v16, %v2394_v3  ;;  %v2398_v13 = vadd.f32 %v5903_v7, %v5446_v46  ;;  %v2400_v34 = vadd.f32 %v5921_v43, %v5449_v29 }
 0x2d7   :  { %v5977_v11 = vpop.f32.mrf.mxu0  ;;  %v3219_v12 = vmul.f32 1.442695, %v3161_v19  ;;  %v3408_v25 = vadd.f32 1.0, %v5985_v21  ;;  %v6002_v51 = vadd.f32 %v5891_v1, %v2396_v63  ;;  %v3402_v52 = vmul.f32 -0.5, %v5940_v32 }
 0x2d8   :  { %v5994_v36 = vpop.f32.mrf.mxu1  ;;  %2872 = vmatmul.mubr.bf16.gmra.mxu1 %v5412_v18  ;;  %3057 = vmatmul.mubr.bf16.gmra.mxu0 %v5414_v8  ;;  %v3380_v16 = vsel %vm5966_vm15, %v3377_v55, %v3374_v28  ;;  %v3124_v18 = vand.u32 2147483647, %v5991_v57  ;;  %3657 = vst [vmem:[%s6813_s5 + $0x210] sm:$0xff] %v2617_v60  ;;  %v3396_v39 = vand.u32 2147483647, %v5913_v35  ;;  %v3083_v38 = vmax.f32 %v5854_v9, 0.0 }
 0x2d9   :  { %v5996_v58 = vpop.f32.mrf.mxu0  ;;  %4242 = vpow2.f32 %v3219_v12  ;;  %v4233_v7 = vpop.eup %4232  ;;  %v3610_v43 = vadd.f32 %v3380_v16, %v3078_v20  ;;  %v3386_v56 = vmul.f32 %v5893_v53, %v3385_v50  ;;  %v3125_v62 = vand.u32 2147483647, %v6002_v51 }
 0x2da   :  { %v6015_v8 = vpop.f32.mrf.mxu1  ;;  %4244 = vlog2.f32 %v3408_v25  ;;  %v3383_v47 = vmul.f32 0.6931472, %v4233_v7  ;;  %v3162_v0 = vsub.f32 0.0, %v3124_v18  ;;  %v6029_v44 = vpop.eup %4234  ;;  %vm3388_vm0 = vcmp.lt.f32.partialorder %v3387_v6, 0.0004427343 }
 0x2db   :  { %v6017_v1 = vpop.f32.mrf.mxu0  ;;  %3686 = vst [vmem:[%s6813_s5 + $0x140] sm:$0xff] %v3610_v43  ;;  %v3395_v4 = vmul.f32 %v5913_v35, %v3394_v40  ;;  %v2621_v20 = vadd.f32 %v5905_v24, %v2398_v13  ;;  %v6037_v53 = vadd.f32 %v5923_v22, %v2400_v34  ;;  %v3403_v33 = vadd.f32 1.0, %v3402_v52 }
 0x2dc   :  { %v6025_v5 = vpop.f32.mrf.mxu1  ;;  %v3389_v45 = vsel %vm3388_vm0, %v3386_v56, %v3383_v47  ;;  %v3405_v3 = vand.u32 2147483647, %v5940_v32  ;;  %v3417_v42 = vadd.f32 1.0, %v6029_v44  ;;  %v3221_v40 = vmul.f32 1.442695, %v3162_v0 }
 0x2dd   :  { %v6027_v55 = vpop.f32.mrf.mxu0  ;;  %v3611_v6 = vadd.f32 %v3389_v45, %v3079_v61  ;;  %v3163_v24 = vsub.f32 0.0, %v3125_v62  ;;  %3658 = vst [vmem:[%s6813_s5 + $0x228] sm:$0xff] %v2621_v20  ;;  %vm3397_vm1 = vcmp.lt.f32.partialorder %v3396_v39, 0.0004427343  ;;  %v3411_v22 = vmul.f32 -0.5, %v5985_v21 }
 0x2de   :  { %v4237_v19 = vpop.eup %4236  ;;  %v6041_v50 = vpop.f32.mrf.mxu1  ;;  %4246 = vlog2.f32 %v3417_v42  ;;  %v2404_v28 = vadd.f32 %v5929_v30, %v5446_v46  ;;  %v3126_v13 = vand.u32 2147483647, %v6037_v53  ;;  %vm6065_vm2 = vcmp.lt.f32.partialorder %v3405_v3, 0.0004427343 }
 0x2df   :  { %v6043_v63 = vpop.f32.mrf.mxu0  ;;  %v3392_v35 = vmul.f32 0.6931472, %v4237_v19  ;;  %v6057_v10 = vpop.eup %4238  ;;  %3687 = vst [vmem:[%s6813_s5 + $0x158] sm:$0xff] %v3611_v6  ;;  %4248 = vpow2.f32 %v3221_v40  ;;  %v3223_v25 = vmul.f32 1.442695, %v3163_v24  ;;  %v3084_v52 = vmax.f32 %v5887_v37, 0.0 }
 0x2e0   :  { %v6053_v12 = vpop.f32.mrf.mxu1  ;;  %v3426_v18 = vadd.f32 1.0, %v6057_v10  ;;  %v3404_v47 = vmul.f32 %v5940_v32, %v3403_v33  ;;  %v3164_v56 = vsub.f32 0.0, %v3126_v13  ;;  %v3412_v41 = vadd.f32 1.0, %v3411_v22 }
 0x2e1   :  { %v6055_v60 = vpop.f32.mrf.mxu0  ;;  %v3398_v61 = vsel %vm3397_vm1, %v3395_v4, %v3392_v35  ;;  %v4241_v34 = vpop.eup %4240  ;;  %4250 = vpow2.f32 %v3223_v25  ;;  %v2406_v0 = vadd.f32 %v5947_v48, %v5449_v29  ;;  %v3414_v20 = vand.u32 2147483647, %v5985_v21 }
 0x2e2   :  { %v3612_v16 = vadd.f32 %v3398_v61, %v3080_v17  ;;  %v6071_v7 = vpop.f32.mrf.mxu1  ;;  %v3401_v39 = vmul.f32 0.6931472, %v4241_v34  ;;  %4252 = vlog2.f32 %v3426_v18  ;;  %v2627_v17 = vadd.f32 %v5931_v14, %v2404_v28 }
 0x2e3   :  { %v6073_v43 = vpop.f32.mrf.mxu0  ;;  %v3225_v19 = vmul.f32 1.442695, %v3164_v56  ;;  %v2408_v45 = vadd.f32 %v5959_v54, %v5446_v46  ;;  %v3420_v14 = vmul.f32 -0.5, %v6029_v44  ;;  %v6098_v48 = vadd.f32 %v5949_v2, %v2406_v0 }
 0x2e4   :  { %3688 = vst [vmem:[%s6813_s5 + $0x170] sm:$0xff] %v3612_v16  ;;  %v6082_v62 = vpop.f32.mrf.mxu1  ;;  %v3407_v32 = vsel %vm6065_vm2, %v3404_v47, %v3401_v39  ;;  %3659 = vst [vmem:[%s6813_s5 + $0x240] sm:$0xff] %v2627_v17  ;;  %v2410_v3 = vadd.f32 %v5975_v27, %v5449_v29  ;;  %v2416_v35 = vadd.f32 %v6015_v8, %v5449_v29  ;;  %v3423_v40 = vand.u32 2147483647, %v6029_v44 }
 0x2e5   :  { %v6084_v4 = vpop.f32.mrf.mxu0  ;;  %v3613_v33 = vadd.f32 %v3407_v32, %v3081_v15  ;;  %4254 = vpow2.f32 %v3225_v19  ;;  %v2631_v26 = vadd.f32 %v5961_v23, %v2408_v45  ;;  %v2414_v15 = vadd.f32 %v5994_v36, %v5446_v46 }
 0x2e6   :  { %v6102_v42 = vpop.f32.mrf.mxu1  ;;  %v6106_v54 = vpop.eup %4242  ;;  %v3413_v27 = vmul.f32 %v5985_v21, %v3412_v41  ;;  %v3429_v24 = vmul.f32 -0.5, %v6057_v10  ;;  %v3127_v8 = vand.u32 2147483647, %v6098_v48  ;;  %v6129_v61 = vadd.f32 %v5977_v11, %v2410_v3 }
 0x2e7   :  { %v6104_v6 = vpop.f32.mrf.mxu0  ;;  %v4245_v2 = vpop.eup %4244  ;;  %3689 = vst [vmem:[%s6813_s5 + $0x188] sm:$0xff] %v3613_v33  ;;  %v3435_v22 = vadd.f32 1.0, %v6106_v54  ;;  %3660 = vst [vmem:[%s6813_s5 + $0x258] sm:$0xff] %v2631_v26  ;;  %v2637_v21 = vadd.f32 %v5996_v58, %v2414_v15  ;;  %vm3415_vm3 = vcmp.lt.f32.partialorder %v3414_v20, 0.0004427343  ;;  %v3421_v25 = vadd.f32 1.0, %v3420_v14 }
 0x2e8   :  { %v6120_v23 = vpop.f32.mrf.mxu1  ;;  %v3410_v36 = vmul.f32 0.6931472, %v4245_v2  ;;  %v6133_v13 = vadd.f32 %v6017_v1, %v2416_v35  ;;  %v3085_v18 = vmax.f32 %v5943_v59, 0.0  ;;  %v3165_v39 = vsub.f32 0.0, %v3127_v8 }
 0x2e9   :  { %v6122_v28 = vpop.f32.mrf.mxu0  ;;  %4256 = vlog2.f32 %v3435_v22  ;;  %v3128_v47 = vand.u32 2147483647, %v6129_v61  ;;  %3661 = vst [vmem:[%s6813_s5 + $0x270] sm:$0xff] %v2637_v21  ;;  %vm6146_vm4 = vcmp.lt.f32.partialorder %v3423_v40, 0.0004427343  ;;  %v3430_v32 = vadd.f32 1.0, %v3429_v24 }
 0x2ea   :  { %v6135_v34 = vpop.f32.mrf.mxu1  ;;  %v3416_v30 = vsel %vm3415_vm3, %v3413_v27, %v3410_v36  ;;  %v3432_v1 = vand.u32 2147483647, %v6057_v10  ;;  %v3129_v56 = vand.u32 2147483647, %v6133_v13  ;;  %v3227_v20 = vmul.f32 1.442695, %v3165_v39 }
 0x2eb   :  { %v6137_v16 = vpop.f32.mrf.mxu0  ;;  %v3614_v11 = vadd.f32 %v3416_v30, %v3082_v31  ;;  %v4247_v0 = vpop.eup %4246  ;;  %v3166_v19 = vsub.f32 0.0, %v3128_v47  ;;  %v2418_v49 = vadd.f32 %v6025_v5, %v5446_v46  ;;  %v3422_v33 = vmul.f32 %v6029_v44, %v3421_v25 }
 0x2ec   :  { %v6152_v41 = vpop.f32.mrf.mxu1  ;;  %v6158_v31 = vpop.eup %4248  ;;  %v3419_v45 = vmul.f32 0.6931472, %v4247_v0  ;;  %v3438_v14 = vmul.f32 -0.5, %v6106_v54  ;;  %v3167_v3 = vsub.f32 0.0, %v3129_v56  ;;  %4258 = vpow2.f32 %v3227_v20 }
 0x2ed   :  { %v6154_v17 = vpop.f32.mrf.mxu0  ;;  %3690 = vst [vmem:[%s6813_s5 + $0x1a0] sm:$0xff] %v3614_v11  ;;  %v3444_v35 = vadd.f32 1.0, %v6158_v31  ;;  %v2420_v5 = vadd.f32 %v6041_v50, %v5449_v29  ;;  %v2424_v2 = vadd.f32 %v6053_v12, %v5446_v46  ;;  %vm6178_vm5 = vcmp.lt.f32.partialorder %v3432_v1, 0.0004427343 }
 0x2ee   :  { %v6165_v26 = vpop.f32.mrf.mxu1  ;;  %v6174_v27 = vpop.eup %4250  ;;  %v3425_v44 = vsel %vm6146_vm4, %v3422_v33, %v3419_v45  ;;  %v3229_v24 = vmul.f32 1.442695, %v3166_v19  ;;  %v2641_v22 = vadd.f32 %v6027_v55, %v2418_v49  ;;  %v3431_v21 = vmul.f32 %v6057_v10, %v3430_v32 }
 0x2ef   :  { %v6167_v15 = vpop.f32.mrf.mxu0  ;;  %v4253_v50 = vpop.eup %4252  ;;  %v3615_v12 = vadd.f32 %v3425_v44, %v3083_v38  ;;  %v3441_v25 = vand.u32 2147483647, %v6106_v54  ;;  %4260 = vlog2.f32 %v3444_v35  ;;  %v3439_v39 = vadd.f32 1.0, %v3438_v14 }
 0x2f0   :  { %v6183_v36 = vpop.f32.mrf.mxu1  ;;  %v3428_v30 = vmul.f32 0.6931472, %v4253_v50  ;;  %v3453_v47 = vadd.f32 1.0, %v6174_v27  ;;  %v3231_v11 = vmul.f32 1.442695, %v3167_v3  ;;  %3662 = vst [vmem:[%s6813_s5 + $0x288] sm:$0xff] %v2641_v22  ;;  %4262 = vpow2.f32 %v3229_v24 }
 0x2f1   :  { %v6185_v8 = vpop.f32.mrf.mxu0  ;;  %3691 = vst [vmem:[%s6813_s5 + $0x1b8] sm:$0xff] %v3615_v12  ;;  %v6203_v9 = vadd.f32 %v6043_v63, %v2420_v5  ;;  %v2647_v38 = vadd.f32 %v6055_v60, %v2424_v2  ;;  %v2426_v10 = vadd.f32 %v6071_v7, %v5449_v29  ;;  %v3086_v0 = vmax.f32 %v5991_v57, 0.0 }
 0x2f2   :  { %v6195_v55 = vpop.f32.mrf.mxu1  ;;  %v6208_v1 = vpop.eup %4254  ;;  %v3434_v56 = vsel %vm6178_vm5, %v3431_v21, %v3428_v30  ;;  %v3087_v32 = vmax.f32 %v6002_v51, 0.0  ;;  %4264 = vlog2.f32 %v3453_v47  ;;  %v3447_v60 = vmul.f32 -0.5, %v6158_v31 }
 0x2f3   :  { %v6197_v58 = vpop.f32.mrf.mxu0  ;;  %v3616_v63 = vadd.f32 %v3434_v56, %v3084_v52  ;;  %v3088_v7 = vmax.f32 %v6037_v53, 0.0  ;;  %v3462_v49 = vadd.f32 1.0, %v6208_v1  ;;  %3663 = vst [vmem:[%s6813_s5 + $0x2a0] sm:$0xff] %v2647_v38  ;;  %vm6226_vm6 = vcmp.lt.f32.partialorder %v3441_v25, 0.0004427343 }
 0x2f4   :  { %v6214_v20 = vpop.f32.mrf.mxu1  ;;  %v3089_v33 = vmax.f32 %v6098_v48, 0.0  ;;  %4266 = vpow2.f32 %v3231_v11  ;;  %v3130_v37 = vand.u32 2147483647, %v6203_v9  ;;  %v3440_v35 = vmul.f32 %v6106_v54, %v3439_v39 }
 0x2f5   :  { %v6216_v19 = vpop.f32.mrf.mxu0  ;;  %3692 = vst [vmem:[%s6813_s5 + $0x1d0] sm:$0xff] %v3616_v63  ;;  %v3450_v5 = vand.u32 2147483647, %v6158_v31  ;;  %4268 = vlog2.f32 %v3462_v49  ;;  %v6242_v2 = vadd.f32 %v6073_v43, %v2426_v10  ;;  %v2428_v24 = vadd.f32 %v6082_v62, %v5446_v46 }
 0x2f6   :  { %v6232_v52 = vpop.f32.mrf.mxu1  ;;  %v4257_v3 = vpop.eup %4256  ;;  %v3168_v40 = vsub.f32 0.0, %v3130_v37  ;;  %v2430_v22 = vadd.f32 %v6102_v42, %v5449_v29  ;;  %v3448_v21 = vadd.f32 1.0, %v3447_v60  ;;  %v3456_v54 = vmul.f32 -0.5, %v6174_v27 }
 0x2f7   :  { %v6234_v14 = vpop.f32.mrf.mxu0  ;;  %v3437_v44 = vmul.f32 0.6931472, %v4257_v3  ;;  %v3131_v25 = vand.u32 2147483647, %v6242_v2  ;;  %v2434_v43 = vadd.f32 %v6120_v23, %v5446_v46  ;;  %v2651_v62 = vadd.f32 %v6084_v4, %v2428_v24 }
 0x2f8   :  { %v6248_v50 = vpop.f32.mrf.mxu1  ;;  %v3233_v39 = vmul.f32 1.442695, %v3168_v40  ;;  %v6260_v42 = vadd.f32 %v6104_v6, %v2430_v22  ;;  %v2436_v23 = vadd.f32 %v6135_v34, %v5449_v29  ;;  %vm6273_vm7 = vcmp.lt.f32.partialorder %v3450_v5, 0.0004427343 }
 0x2f9   :  { %v6250_v12 = vpop.f32.mrf.mxu0  ;;  %v3443_v30 = vsel %vm6226_vm6, %v3440_v35, %v3437_v44  ;;  %v3169_v10 = vsub.f32 0.0, %v3131_v25  ;;  %v2657_v56 = vadd.f32 %v6122_v28, %v2434_v43  ;;  %v6271_v63 = vpop.eup %4258  ;;  %3664 = vst [vmem:[%s6813_s5 + $0x2b8] sm:$0xff] %v2651_v62  ;;  %v2438_v6 = vadd.f32 %v6152_v41, %v5446_v46 }
 0x2fa   :  { %v6262_v47 = vpop.f32.mrf.mxu1  ;;  %v3617_v38 = vadd.f32 %v3443_v30, %v3085_v18  ;;  %4270 = vpow2.f32 %v3233_v39  ;;  %v3132_v59 = vand.u32 2147483647, %v6260_v42  ;;  %v3457_v34 = vadd.f32 1.0, %v3456_v54 }
 0x2fb   :  { %v6264_v11 = vpop.f32.mrf.mxu0  ;;  %v3465_v60 = vmul.f32 -0.5, %v6208_v1  ;;  %v3471_v49 = vadd.f32 1.0, %v6271_v63  ;;  %v3235_v45 = vmul.f32 1.442695, %v3169_v10  ;;  %3665 = vst [vmem:[%s6813_s5 + $0x2d0] sm:$0xff] %v2657_v56  ;;  %v6297_v35 = vadd.f32 %v6137_v16, %v2436_v23 }
 0x2fc   :  { %v6283_v28 = vpop.f32.mrf.mxu1  ;;  %3693 = vst [vmem:[%s6813_s5 + $0x1e8] sm:$0xff] %v3617_v38  ;;  %v4261_v37 = vpop.eup %4260  ;;  %v3459_v41 = vand.u32 2147483647, %v6174_v27  ;;  %v3170_v3 = vsub.f32 0.0, %v3132_v59  ;;  %v2661_v5 = vadd.f32 %v6154_v17, %v2438_v6  ;;  %v3449_v22 = vmul.f32 %v6158_v31, %v3448_v21 }
 0x2fd   :  { %v6285_v18 = vpop.f32.mrf.mxu0  ;;  %v3446_v24 = vmul.f32 0.6931472, %v4261_v37  ;;  %4272 = vlog2.f32 %v3471_v49  ;;  %v2440_v54 = vadd.f32 %v6165_v26, %v5449_v29  ;;  %v6307_v25 = vpop.eup %4262  ;;  %v3468_v43 = vand.u32 2147483647, %v6208_v1 }
 0x2fe   :  { %v6300_v44 = vpop.f32.mrf.mxu1  ;;  %4274 = vpow2.f32 %v3235_v45  ;;  %v3237_v16 = vmul.f32 1.442695, %v3170_v3  ;;  %v3133_v30 = vand.u32 2147483647, %v6297_v35  ;;  %3666 = vst [vmem:[%s6813_s5 + $0x2e8] sm:$0xff] %v2661_v5  ;;  %v3458_v21 = vmul.f32 %v6174_v27, %v3457_v34 }
 0x2ff   :  { %v6302_v40 = vpop.f32.mrf.mxu0  ;;  %v4265_v31 = vpop.eup %4264  ;;  %v3452_v26 = vsel %vm6273_vm7, %v3449_v22, %v3446_v24  ;;  %v3466_v62 = vadd.f32 1.0, %v3465_v60  ;;  %v3480_v38 = vadd.f32 1.0, %v6307_v25  ;;  %v3474_v23 = vmul.f32 -0.5, %v6271_v63 }
 0x300   :  { %v6314_v17 = vpop.f32.mrf.mxu1  ;;  %v3618_v10 = vadd.f32 %v3452_v26, %v3086_v0  ;;  %v3455_v56 = vmul.f32 0.6931472, %v4265_v31  ;;  %4276 = vpow2.f32 %v3237_v16  ;;  %vm3460_vm8 = vcmp.lt.f32.partialorder %v3459_v41, 0.0004427343 }
 0x301   :  { %v6316_v39 = vpop.f32.mrf.mxu0  ;;  %v6329_v49 = vpop.eup %4266  ;;  %4278 = vlog2.f32 %v3480_v38  ;;  %v3171_v4 = vsub.f32 0.0, %v3133_v30  ;;  %v6332_v27 = vadd.f32 %v6167_v15, %v2440_v54  ;;  %v3090_v0 = vmax.f32 %v6129_v61, 0.0 }
 0x302   :  { %v6325_v59 = vpop.f32.mrf.mxu1  ;;  %v4269_v34 = vpop.eup %4268  ;;  %3694 = vst [vmem:[%s6813_s5 + $0x200] sm:$0xff] %v3618_v10  ;;  %v3461_v57 = vsel %vm3460_vm8, %v3458_v21, %v3455_v56  ;;  %v3091_v60 = vmax.f32 %v6133_v13, 0.0  ;;  %v3489_v45 = vadd.f32 1.0, %v6329_v49  ;;  %v3467_v5 = vmul.f32 %v6208_v1, %v3466_v62 }
 0x303   :  { %v6327_v6 = vpop.f32.mrf.mxu0  ;;  %v3619_v15 = vadd.f32 %v3461_v57, %v3087_v32  ;;  %v3464_v3 = vmul.f32 0.6931472, %v4269_v34  ;;  %v3092_v24 = vmax.f32 %v6203_v9, 0.0  ;;  %vm3469_vm9 = vcmp.lt.f32.partialorder %v3468_v43, 0.0004427343 }
 0x304   :  { %v6340_v37 = vpop.f32.mrf.mxu1  ;;  %v3475_v22 = vadd.f32 1.0, %v3474_v23  ;;  %4280 = vlog2.f32 %v3489_v45  ;;  %v3239_v54 = vmul.f32 1.442695, %v3171_v4  ;;  %v3483_v51 = vmul.f32 -0.5, %v6307_v25 }
 0x305   :  { %v6342_v41 = vpop.f32.mrf.mxu0  ;;  %3695 = vst [vmem:[%s6813_s5 + $0x218] sm:$0xff] %v3619_v15  ;;  %v3470_v31 = vsel %vm3469_vm9, %v3467_v5, %v3464_v3  ;;  %v3134_v32 = vand.u32 2147483647, %v6332_v27  ;;  %v2444_v1 = vadd.f32 %v6183_v36, %v5446_v46  ;;  %v3492_v26 = vmul.f32 -0.5, %v6329_v49 }
 0x306   :  { %v6348_v16 = vpop.f32.mrf.mxu1  ;;  %v3620_v43 = vadd.f32 %v3470_v31, %v3088_v7  ;;  %4282 = vpow2.f32 %v3239_v54  ;;  %v2446_v21 = vadd.f32 %v6195_v55, %v5449_v29  ;;  %v2448_v36 = vadd.f32 %v6214_v20, %v5446_v46 }
 0x307   :  { %v6350_v30 = vpop.f32.mrf.mxu0  ;;  %v6368_v10 = vpop.eup %4270  ;;  %v3172_v56 = vsub.f32 0.0, %v3134_v32  ;;  %v2667_v23 = vadd.f32 %v6185_v8, %v2444_v1  ;;  %v2450_v53 = vadd.f32 %v6232_v52, %v5449_v29  ;;  %v3476_v55 = vmul.f32 %v6271_v63, %v3475_v22 }
 0x308   :  { %v6364_v62 = vpop.f32.mrf.mxu1  ;;  %3696 = vst [vmem:[%s6813_s5 + $0x230] sm:$0xff] %v3620_v43  ;;  %v3477_v7 = vand.u32 2147483647, %v6271_v63  ;;  %v3498_v4 = vadd.f32 1.0, %v6368_v10  ;;  %v6382_v34 = vadd.f32 %v6197_v58, %v2446_v21  ;;  %v2671_v20 = vadd.f32 %v6216_v19, %v2448_v36 }
 0x309   :  { %v6366_v38 = vpop.f32.mrf.mxu0  ;;  %v3241_v45 = vmul.f32 1.442695, %v3172_v56  ;;  %3667 = vst [vmem:[%s6813_s5 + $0x300] sm:$0xff] %v2667_v23  ;;  %v6389_v52 = vadd.f32 %v6234_v14, %v2450_v53  ;;  %v2454_v63 = vadd.f32 %v6248_v50, %v5446_v46  ;;  %v3484_v3 = vadd.f32 1.0, %v3483_v51 }
 0x30a   :  { %v2731_v8 = vpop.f32.mrf.mxu1  ;;  %v4273_v15 = vpop.eup %4272  ;;  %v3486_v58 = vand.u32 2147483647, %v6307_v25  ;;  %v3495_v5 = vand.u32 2147483647, %v6329_v49  ;;  %4284 = vlog2.f32 %v3498_v4  ;;  %v3493_v32 = vadd.f32 1.0, %v3492_v26  ;;  %3668 = vst [vmem:[%s6813_s5 + $0x318] sm:$0xff] %v2671_v20 }
 0x30b   :  { %v2916_v57 = vpop.f32.mrf.mxu0  ;;  %v6399_v31 = vpop.eup %4274  ;;  %v3473_v19 = vmul.f32 0.6931472, %v4273_v15  ;;  %4286 = vpow2.f32 %v3241_v45  ;;  %v3135_v14 = vand.u32 2147483647, %v6382_v34  ;;  %vm3478_vm10 = vcmp.lt.f32.partialorder %v3477_v7, 0.0004427343 }
 0x30c   :  { %v6395_v22 = vpop.f32.mrf.mxu1  ;;  %v3501_v50 = vmul.f32 -0.5, %v6368_v10  ;;  %v3093_v51 = vmax.f32 %v6242_v2, 0.0  ;;  %v3507_v1 = vadd.f32 1.0, %v6399_v31  ;;  %v3136_v36 = vand.u32 2147483647, %v6389_v52 }
 0x30d   :  { %v6397_v54 = vpop.f32.mrf.mxu0  ;;  %v6408_v56 = vpop.eup %4276  ;;  %v3479_v23 = vsel %vm3478_vm10, %v3476_v55, %v3473_v19  ;;  %v3173_v26 = vsub.f32 0.0, %v3135_v14  ;;  %v2677_v53 = vadd.f32 %v6250_v12, %v2454_v63  ;;  %v3485_v8 = vmul.f32 %v6307_v25, %v3484_v3 }
 0x30e   :  { %v2734_v43 = vpop.f32.mrf.mxu1  ;;  %v4279_v4 = vpop.eup %4278  ;;  %v3621_v7 = vadd.f32 %v3479_v23, %v3089_v33  ;;  %vm6415_vm11 = vcmp.lt.f32.partialorder %v3486_v58, 0.0004427343  ;;  %4288 = vlog2.f32 %v3507_v1  ;;  %v3494_v15 = vmul.f32 %v6329_v49, %v3493_v32 }
 0x30f   :  { %v2919_v21 = vpop.f32.mrf.mxu0  ;;  %v3482_v55 = vmul.f32 0.6931472, %v4279_v4  ;;  %vm6424_vm12 = vcmp.lt.f32.partialorder %v3495_v5, 0.0004427343  ;;  %v3516_v48 = vadd.f32 1.0, %v6408_v56  ;;  %3669 = vst [vmem:[%s6813_s5 + $0x330] sm:$0xff] %v2677_v53  ;;  %v2456_v49 = vadd.f32 %v6262_v47, %v5449_v29 }
 0x310   :  { %v6419_v45 = vpop.f32.mrf.mxu1  ;;  %3697 = vst [vmem:[%s6813_s5 + $0x248] sm:$0xff] %v3621_v7  ;;  %v3510_v33 = vmul.f32 -0.5, %v6399_v31  ;;  %v3243_v25 = vmul.f32 1.442695, %v3173_v26  ;;  %v3174_v63 = vsub.f32 0.0, %v3136_v36  ;;  %v3502_v32 = vadd.f32 1.0, %v3501_v50 }
 0x311   :  { %v6421_v20 = vpop.f32.mrf.mxu0  ;;  %v4281_v5 = vpop.eup %4280  ;;  %v3488_v19 = vsel %vm6415_vm11, %v3485_v8, %v3482_v55  ;;  %v3504_v14 = vand.u32 2147483647, %v6368_v10  ;;  %4290 = vlog2.f32 %v3516_v48  ;;  %v3513_v36 = vand.u32 2147483647, %v6399_v31 }
 0x312   :  { %v2739_v3 = vpop.f32.mrf.mxu1  ;;  %v3622_v1 = vadd.f32 %v3488_v19, %v3090_v0  ;;  %v3491_v43 = vmul.f32 0.6931472, %v4281_v5  ;;  %4292 = vpow2.f32 %v3243_v25  ;;  %v3245_v21 = vmul.f32 1.442695, %v3174_v63 }
 0x313   :  { %v2924_v58 = vpop.f32.mrf.mxu0  ;;  %v6447_v47 = vpop.eup %4282  ;;  %v6451_v53 = vadd.f32 %v6264_v11, %v2456_v49  ;;  %v2458_v50 = vadd.f32 %v6283_v28, %v5446_v46  ;;  %v2460_v61 = vadd.f32 %v6300_v44, %v5449_v29  ;;  %v3511_v4 = vadd.f32 1.0, %v3510_v33 }
 0x314   :  { %v6443_v23 = vpop.f32.mrf.mxu1  ;;  %3698 = vst [vmem:[%s6813_s5 + $0x260] sm:$0xff] %v3622_v1  ;;  %v3497_v0 = vsel %vm6424_vm12, %v3494_v15, %v3491_v43  ;;  %v3094_v7 = vmax.f32 %v6260_v42, 0.0  ;;  %v3525_v8 = vadd.f32 1.0, %v6447_v47  ;;  %vm6466_vm13 = vcmp.lt.f32.partialorder %v3504_v14, 0.0004427343 }
 0x315   :  { %v6445_v26 = vpop.f32.mrf.mxu0  ;;  %v3623_v28 = vadd.f32 %v3497_v0, %v3091_v60  ;;  %4294 = vpow2.f32 %v3245_v21  ;;  %v3137_v44 = vand.u32 2147483647, %v6451_v53  ;;  %v3503_v12 = vmul.f32 %v6368_v10, %v3502_v32 }
 0x316   :  { %v2742_v11 = vpop.f32.mrf.mxu1  ;;  %v3519_v15 = vmul.f32 -0.5, %v6408_v56  ;;  %4296 = vlog2.f32 %v3525_v8  ;;  %v2681_v48 = vadd.f32 %v6285_v18, %v2458_v50  ;;  %vm6481_vm14 = vcmp.lt.f32.partialorder %v3513_v36, 0.0004427343 }
 0x317   :  { %v2927_v57 = vpop.f32.mrf.mxu0  ;;  %v4285_v13 = vpop.eup %4284  ;;  %3699 = vst [vmem:[%s6813_s5 + $0x278] sm:$0xff] %v3623_v28  ;;  %v3175_v63 = vsub.f32 0.0, %v3137_v44  ;;  %v6486_v10 = vadd.f32 %v6302_v40, %v2460_v61  ;;  %v2464_v18 = vadd.f32 %v6314_v17, %v5446_v46  ;;  %v3512_v58 = vmul.f32 %v6399_v31, %v3511_v4  ;;  %v6956_v28 = vld [vmem:[#allocation5_spill] sm:$0xff] }
 0x318   :  { %v6474_v33 = vpop.f32.mrf.mxu1  ;;  %v6490_v49 = vpop.eup %4286  ;;  %v3500_v3 = vmul.f32 0.6931472, %v4285_v13  ;;  %v3522_v5 = vand.u32 2147483647, %v6408_v56  ;;  %3670 = vst [vmem:[%s6813_s5 + $0x348] sm:$0xff] %v2681_v48  ;;  %v2466_v19 = vadd.f32 %v6325_v59, %v5449_v29  ;;  %v2468_v17 = vadd.f32 %v6340_v37, %v5446_v46 }
 0x319   :  { %v6476_v25 = vpop.f32.mrf.mxu0  ;;  %v3534_v14 = vadd.f32 1.0, %v6490_v49  ;;  %v3247_v1 = vmul.f32 1.442695, %v3175_v63  ;;  %v2470_v31 = vadd.f32 %v6348_v16, %v5449_v29  ;;  %v3520_v21 = vadd.f32 1.0, %v3519_v15 }
 0x31a   :  { %v2747_v32 = vpop.f32.mrf.mxu1  ;;  %v3506_v43 = vsel %vm6466_vm13, %v3503_v12, %v3500_v3  ;;  %v3138_v36 = vand.u32 2147483647, %v6486_v10  ;;  %v2687_v50 = vadd.f32 %v6316_v39, %v2464_v18  ;;  %v3528_v46 = vmul.f32 -0.5, %v6447_v47 }
 0x31b   :  { %v2932_v40 = vpop.f32.mrf.mxu0  ;;  %v4289_v0 = vpop.eup %4288  ;;  %v3624_v4 = vadd.f32 %v3506_v43, %v3092_v24  ;;  %4298 = vlog2.f32 %v3534_v14  ;;  %v3537_v29 = vmul.f32 -0.5, %v6490_v49  ;;  %v6520_v39 = vadd.f32 %v6327_v6, %v2466_v19  ;;  %v4320_v6 = vld [vmem:[%s6810_s2 + $0x6] sm:$0x7] }
 0x31c   :  { %v6508_v59 = vpop.f32.mrf.mxu1  ;;  %v3509_v37 = vmul.f32 0.6931472, %v4289_v0  ;;  %4300 = vpow2.f32 %v3247_v1  ;;  %v3176_v16 = vsub.f32 0.0, %v3138_v36  ;;  %3671 = vst [vmem:[%s6813_s5 + $0x360] sm:$0xff] %v2687_v50  ;;  %vm6525_vm15 = vcmp.lt.f32.partialorder %v3522_v5, 0.0004427343 }
 0x31d   :  { %v6510_v61 = vpop.f32.mrf.mxu0  ;;  %3700 = vst [vmem:[%s6813_s5 + $0x290] sm:$0xff] %v3624_v4  ;;  %v2691_v24 = vadd.f32 %v6342_v41, %v2468_v17  ;;  %v6531_v57 = vadd.f32 %v6350_v30, %v2470_v31  ;;  %v6957_v55 = vsub.s32 2, %v6956_v28  ;;  %v3521_v48 = vmul.f32 %v6408_v56, %v3520_v21 }
 0x31e   :  { %v2750_v8 = vpop.f32.mrf.mxu1  ;;  %v4291_v12 = vpop.eup %4290  ;;  %v3515_v15 = vsel %vm6481_vm14, %v3512_v58, %v3509_v37  ;;  %v3249_v13 = vmul.f32 1.442695, %v3176_v16  ;;  %v3139_v41 = vand.u32 2147483647, %v6520_v39  ;;  %v3531_v19 = vand.u32 2147483647, %v6447_v47 }
 0x31f   :  { %v2935_v11 = vpop.f32.mrf.mxu0  ;;  %v6538_v44 = vrot.slane %v4320_v6, %v6957_v55  ;;  %v6548_v18 = vpop.eup %4292  ;;  %v3625_v3 = vadd.f32 %v3515_v15, %v3093_v51  ;;  %v3518_v5 = vmul.f32 0.6931472, %v4291_v12  ;;  %3672 = vst [vmem:[%s6813_s5 + $0x378] sm:$0xff] %v2691_v24  ;;  %v3140_v56 = vand.u32 2147483647, %v6531_v57 }
 0x320   :  { %v6544_v63 = vpop.f32.mrf.mxu1  ;;  %v3529_v60 = vadd.f32 1.0, %v3528_v46  ;;  %v3538_v58 = vadd.f32 1.0, %v3537_v29  ;;  %v3543_v32 = vadd.f32 1.0, %v6548_v18  ;;  %4302 = vpow2.f32 %v3249_v13 }
 0x321   :  { %v6546_v30 = vpop.f32.mrf.mxu0  ;;  %3701 = vst [vmem:[%s6813_s5 + $0x2a8] sm:$0xff] %v3625_v3  ;;  %v3524_v2 = vsel %vm6525_vm15, %v3521_v48, %v3518_v5  ;;  %v3177_v51 = vsub.f32 0.0, %v3139_v41  ;;  %v3178_v1 = vsub.f32 0.0, %v3140_v56  ;;  %v2730_v17 = vadd.f32 %v6364_v62, %v6538_v44 }
 0x322   :  { %v2755_v40 = vpop.f32.mrf.mxu1  ;;  %v6565_v31 = vpop.eup %4294  ;;  %v3626_v43 = vadd.f32 %v3524_v2, %v3094_v7  ;;  %v3095_v21 = vmax.f32 %v6297_v35, 0.0  ;;  %4304 = vlog2.f32 %v3543_v32  ;;  %vm6570_vm0 = vcmp.lt.f32.partialorder %v3531_v19, 0.0004427343 }
 0x323   :  { %v2940_v14 = vpop.f32.mrf.mxu0  ;;  %v4297_v0 = vpop.eup %4296  ;;  %v3096_v46 = vmax.f32 %v6332_v27, 0.0  ;;  %v3552_v29 = vadd.f32 1.0, %v6565_v31  ;;  %v3251_v62 = vmul.f32 1.442695, %v3177_v51  ;;  %v3530_v35 = vmul.f32 %v6447_v47, %v3529_v60 }
 0x324   :  { %v2756_v36 = vpop.f32.mrf.mxu1  ;;  %3702 = vst [vmem:[%s6813_s5 + $0x2c0] sm:$0xff] %v3626_v43  ;;  %v3527_v42 = vmul.f32 0.6931472, %v4297_v0  ;;  %v3253_v7 = vmul.f32 1.442695, %v3178_v1  ;;  %v2915_v37 = vadd.f32 %v6366_v38, %v2730_v17  ;;  %v3539_v11 = vmul.f32 %v6490_v49, %v3538_v58 }
 0x325   :  { %v2941_v50 = vpop.f32.mrf.mxu0  ;;  %v3540_v9 = vand.u32 2147483647, %v6490_v49  ;;  %4306 = vlog2.f32 %v3552_v29  ;;  %v2733_v27 = vadd.f32 %v6395_v22, %v6538_v44  ;;  %v2738_v38 = vadd.f32 %v6419_v45, %v6538_v44 }
 0x326   :  { %v2758_v16 = vpop.f32.mrf.mxu1  ;;  %v3533_v24 = vsel %vm6570_vm0, %v3530_v35, %v3527_v42  ;;  %4308 = vpow2.f32 %v3251_v62  ;;  %3711 = vst [vmem:[%s6813_s5 + $0x10] sm:$0xff] %v2915_v37  ;;  %v2741_v47 = vadd.f32 %v6443_v23, %v6538_v44  ;;  %v3546_v55 = vmul.f32 -0.5, %v6548_v18 }
 0x327   :  { %v2943_v8 = vpop.f32.mrf.mxu0  ;;  %v3627_v28 = vadd.f32 %v3533_v24, %v3095_v21  ;;  %4310 = vpow2.f32 %v3253_v7  ;;  %v2918_v22 = vadd.f32 %v6397_v54, %v2733_v27  ;;  %v2923_v15 = vadd.f32 %v6421_v20, %v2738_v38 }
 0x328   :  { %v2761_v6 = vpop.f32.mrf.mxu1  ;;  %v4299_v12 = vpop.eup %4298  ;;  %v2926_v48 = vadd.f32 %v6445_v26, %v2741_v47  ;;  %v2746_v13 = vadd.f32 %v6474_v33, %v6538_v44  ;;  %v2749_v45 = vadd.f32 %v6508_v59, %v6538_v44  ;;  %v2754_v20 = vadd.f32 %v6544_v63, %v6538_v44 }
 0x329   :  { %v2946_v49 = vpop.f32.mrf.mxu0  ;;  %v6602_v3 = vpop.eup %4300  ;;  %3703 = vst [vmem:[%s6813_s5 + $0x2d8] sm:$0xff] %v3627_v28  ;;  %v3536_v54 = vmul.f32 0.6931472, %v4299_v12  ;;  %3712 = vst [vmem:[%s6813_s5 + $0x28] sm:$0xff] %v2918_v22  ;;  %v2757_v26 = vadd.f32 %v2756_v36, %v6538_v44  ;;  %v2762_v33 = vadd.f32 %v2761_v6, %v6538_v44  ;;  %vm3541_vm1 = vcmp.lt.f32.partialorder %v3540_v9, 0.0004427343 }
 0x32a   :  { %v2763_v23 = vpop.f32.mrf.mxu1  ;;  %v3555_v59 = vmul.f32 -0.5, %v6565_v31  ;;  %v3561_v5 = vadd.f32 1.0, %v6602_v3  ;;  %3713 = vst [vmem:[%s6813_s5 + $0x40] sm:$0xff] %v2923_v15  ;;  %3714 = vst [vmem:[%s6813_s5 + $0x58] sm:$0xff] %v2926_v48  ;;  %v2931_v19 = vadd.f32 %v6476_v25, %v2746_v13  ;;  %v2934_v58 = vadd.f32 %v6510_v61, %v2749_v45 }
 0x32b   :  { %v2948_v41 = vpop.f32.mrf.mxu0  ;;  %v3542_v60 = vsel %vm3541_vm1, %v3539_v11, %v3536_v54  ;;  %v2939_v32 = vadd.f32 %v6546_v30, %v2754_v20  ;;  %v2942_v40 = vadd.f32 %v2941_v50, %v2757_v26  ;;  %v3547_v2 = vadd.f32 1.0, %v3546_v55 }
 0x32c   :  { %v2764_v63 = vpop.f32.mrf.mxu1  ;;  %v3628_v14 = vadd.f32 %v3542_v60, %v3096_v46  ;;  %4312 = vlog2.f32 %v3561_v5  ;;  %3715 = vst [vmem:[%s6813_s5 + $0x70] sm:$0xff] %v2931_v19  ;;  %v3549_v25 = vand.u32 2147483647, %v6548_v18  ;;  %3716 = vst [vmem:[%s6813_s5 + $0x88] sm:$0xff] %v2934_v58  ;;  %v2947_v61 = vadd.f32 %v2946_v49, %v2762_v33 }
 0x32d   :  { %v2949_v56 = vpop.f32.mrf.mxu0  ;;  %v6628_v17 = vpop.eup %4302  ;;  %3717 = vst [vmem:[%s6813_s5 + $0xa0] sm:$0xff] %v2939_v32  ;;  %3718 = vst [vmem:[%s6813_s5 + $0xb8] sm:$0xff] %v2942_v40  ;;  %v2765_v30 = vadd.f32 %v2764_v63, %v6538_v44  ;;  %v3556_v0 = vadd.f32 1.0, %v3555_v59  ;;  %v3548_v62 = vmul.f32 %v6548_v18, %v3547_v2  ;;  %v3558_v42 = vand.u32 2147483647, %v6565_v31 }
 0x32e   :  { %v2766_v51 = vpop.f32.mrf.mxu1  ;;  %3704 = vst [vmem:[%s6813_s5 + $0x2f0] sm:$0xff] %v3628_v14  ;;  %v3570_v43 = vadd.f32 1.0, %v6628_v17  ;;  %3719 = vst [vmem:[%s6813_s5 + $0xd0] sm:$0xff] %v2947_v61  ;;  %v3097_v37 = vmax.f32 %v6382_v34, 0.0  ;;  %vm3550_vm2 = vcmp.lt.f32.partialorder %v3549_v25, 0.0004427343 }
 0x32f   :  { %v2951_v1 = vpop.f32.mrf.mxu0  ;;  %v4305_v50 = vpop.eup %4304  ;;  %v2950_v4 = vadd.f32 %v2949_v56, %v2765_v30  ;;  %v3564_v9 = vmul.f32 -0.5, %v6602_v3  ;;  %v3557_v6 = vmul.f32 %v6565_v31, %v3556_v0  ;;  %v3098_v28 = vmax.f32 %v6389_v52, 0.0 }
 0x330   :  { %v2769_v21 = vpop.f32.mrf.mxu1  ;;  %v3545_v29 = vmul.f32 0.6931472, %v4305_v50  ;;  %4314 = vlog2.f32 %v3570_v43  ;;  %vm3559_vm3 = vcmp.lt.f32.partialorder %v3558_v42, 0.0004427343  ;;  %v3573_v45 = vmul.f32 -0.5, %v6628_v17 }
 0x331   :  { %v2954_v36 = vpop.f32.mrf.mxu0  ;;  %v2770_v46 = vadd.f32 %v2769_v21, %v6538_v44  ;;  %3720 = vst [vmem:[%s6813_s5 + $0xe8] sm:$0xff] %v2950_v4  ;;  %v3565_v13 = vadd.f32 1.0, %v3564_v9  ;;  %v3567_v52 = vand.u32 2147483647, %v6602_v3  ;;  %v3099_v32 = vmax.f32 %v6451_v53, 0.0 }
 0x332   :  { %v2771_v35 = vpop.f32.mrf.mxu1  ;;  %v4307_v8 = vpop.eup %4306  ;;  %v3551_v11 = vsel %vm3550_vm2, %v3548_v62, %v3545_v29  ;;  %v3574_v63 = vadd.f32 1.0, %v3573_v45  ;;  %v3576_v40 = vand.u32 2147483647, %v6628_v17  ;;  %v3100_v0 = vmax.f32 %v6486_v10, 0.0 }
 0x333   :  { %v2956_v7 = vpop.f32.mrf.mxu0  ;;  %v2955_v16 = vadd.f32 %v2954_v36, %v2770_v46  ;;  %v6656_v18 = vpop.eup %4308  ;;  %v3629_v38 = vadd.f32 %v3551_v11, %v3097_v37  ;;  %v3554_v47 = vmul.f32 0.6931472, %v4307_v8  ;;  %v3566_v19 = vmul.f32 %v6602_v3, %v3565_v13 }
 0x334   :  { %v2772_v27 = vpop.f32.mrf.mxu1  ;;  %v6663_v49 = vpop.eup %4310  ;;  %v3579_v55 = vadd.f32 1.0, %v6656_v18  ;;  %vm3568_vm4 = vcmp.lt.f32.partialorder %v3567_v52, 0.0004427343  ;;  %v3582_v51 = vmul.f32 -0.5, %v6656_v18  ;;  %v3575_v21 = vmul.f32 %v6628_v17, %v3574_v63 }
 0x335   :  { %v2957_v24 = vpop.f32.mrf.mxu0  ;;  %3721 = vst [vmem:[%s6813_s5 + $0x100] sm:$0xff] %v2955_v16  ;;  %v2773_v34 = vadd.f32 %v2772_v27, %v6538_v44  ;;  %3705 = vst [vmem:[%s6813_s5 + $0x308] sm:$0xff] %v3629_v38  ;;  %v3560_v31 = vsel %vm3559_vm3, %v3557_v6, %v3554_v47  ;;  %v3588_v15 = vadd.f32 1.0, %v6663_v49  ;;  %v3591_v30 = vmul.f32 -0.5, %v6663_v49 }
 0x336   :  { %v2774_v22 = vpop.f32.mrf.mxu1  ;;  %v3630_v48 = vadd.f32 %v3560_v31, %v3098_v28  ;;  %4316 = vlog2.f32 %v3579_v55  ;;  %vm3577_vm5 = vcmp.lt.f32.partialorder %v3576_v40, 0.0004427343  ;;  %v3583_v29 = vadd.f32 1.0, %v3582_v51 }
 0x337   :  { %v2959_v12 = vpop.f32.mrf.mxu0  ;;  %4318 = vlog2.f32 %v3588_v15  ;;  %v2958_v54 = vadd.f32 %v2957_v24, %v2773_v34  ;;  %v3585_v35 = vand.u32 2147483647, %v6656_v18  ;;  %v3592_v7 = vadd.f32 1.0, %v3591_v30 }
 0x338   :  { %v2777_v23 = vpop.f32.mrf.mxu1  ;;  %3706 = vst [vmem:[%s6813_s5 + $0x320] sm:$0xff] %v3630_v48  ;;  %v3594_v16 = vand.u32 2147483647, %v6663_v49  ;;  %v3101_v24 = vmax.f32 %v6520_v39, 0.0  ;;  %v3584_v47 = vmul.f32 %v6656_v18, %v3583_v29  ;;  %v3102_v31 = vmax.f32 %v6531_v57, 0.0 }
 0x339   :  { %v2962_v41 = vpop.f32.mrf.mxu0  ;;  %v2778_v20 = vadd.f32 %v2777_v23, %v6538_v44  ;;  %v4313_v59 = vpop.eup %4312  ;;  %3722 = vst [vmem:[%s6813_s5 + $0x118] sm:$0xff] %v2958_v54  ;;  %vm3586_vm6 = vcmp.lt.f32.partialorder %v3585_v35, 0.0004427343  ;;  %v3593_v55 = vmul.f32 %v6663_v49, %v3592_v7 }
 0x33a   :  { %v2779_v26 = vpop.f32.mrf.mxu1  ;;  %v3563_v5 = vmul.f32 0.6931472, %v4313_v59  ;;  %vm3595_vm7 = vcmp.lt.f32.partialorder %v3594_v16, 0.0004427343 }
 0x33b   :  { %v2964_v33 = vpop.f32.mrf.mxu0  ;;  %v2963_v56 = vadd.f32 %v2962_v41, %v2778_v20 }
 0x33c   :  { %v2780_v60 = vpop.f32.mrf.mxu1  ;;  %v3569_v2 = vsel %vm3568_vm4, %v3566_v19, %v3563_v5 }
 0x33d   :  { %v2965_v58 = vpop.f32.mrf.mxu0  ;;  %v2781_v14 = vadd.f32 %v2780_v60, %v6538_v44  ;;  %3723 = vst [vmem:[%s6813_s5 + $0x130] sm:$0xff] %v2963_v56  ;;  %v4315_v25 = vpop.eup %4314  ;;  %v3631_v61 = vadd.f32 %v3569_v2, %v3099_v32 }
 0x33e   :  { %v2782_v1 = vpop.f32.mrf.mxu1  ;;  %v3572_v53 = vmul.f32 0.6931472, %v4315_v25 }
 0x33f   :  { %v2967_v3 = vpop.f32.mrf.mxu0  ;;  %v2966_v43 = vadd.f32 %v2965_v58, %v2781_v14  ;;  %3707 = vst [vmem:[%s6813_s5 + $0x338] sm:$0xff] %v3631_v61 }
 0x340   :  { %v2785_v36 = vpop.f32.mrf.mxu1  ;;  %v3578_v46 = vsel %vm3577_vm5, %v3575_v21, %v3572_v53 }
 0x341   :  { %v2970_v50 = vpop.f32.mrf.mxu0  ;;  %3724 = vst [vmem:[%s6813_s5 + $0x148] sm:$0xff] %v2966_v43  ;;  %v2786_v4 = vadd.f32 %v2785_v36, %v6538_v44  ;;  %v3632_v17 = vadd.f32 %v3578_v46, %v3100_v0 }
 0x342   :  { %v2787_v62 = vpop.f32.mrf.mxu1 }
 0x343   :  { %v2972_v42 = vpop.f32.mrf.mxu0  ;;  %v2971_v37 = vadd.f32 %v2970_v50, %v2786_v4  ;;  %v4317_v11 = vpop.eup %4316  ;;  %3708 = vst [vmem:[%s6813_s5 + $0x350] sm:$0xff] %v3632_v17 }
 0x344   :  { %v2788_v8 = vpop.f32.mrf.mxu1  ;;  %v4319_v27 = vpop.eup %4318  ;;  %v3581_v38 = vmul.f32 0.6931472, %v4317_v11 }
 0x345   :  { %v2973_v10 = vpop.f32.mrf.mxu0  ;;  %3725 = vst [vmem:[%s6813_s5 + $0x160] sm:$0xff] %v2971_v37  ;;  %v2789_v9 = vadd.f32 %v2788_v8, %v6538_v44  ;;  %v3590_v28 = vmul.f32 0.6931472, %v4319_v27 }
 0x346   :  { %v2790_v6 = vpop.f32.mrf.mxu1  ;;  %v3587_v12 = vsel %vm3586_vm6, %v3584_v47, %v3581_v38 }
 0x347   :  { %v2975_v34 = vpop.f32.mrf.mxu0  ;;  %v2974_v22 = vadd.f32 %v2973_v10, %v2789_v9  ;;  %v3633_v13 = vadd.f32 %v3587_v12, %v3101_v24  ;;  %v3596_v45 = vsel %vm3595_vm7, %v3593_v55, %v3590_v28 }
 0x348   :  { %v2793_v15 = vpop.f32.mrf.mxu1  ;;  %v3634_v18 = vadd.f32 %v3596_v45, %v3102_v31 }
 0x349   :  { %v2978_v48 = vpop.f32.mrf.mxu0  ;;  %3726 = vst [vmem:[%s6813_s5 + $0x178] sm:$0xff] %v2974_v22  ;;  %v2794_v39 = vadd.f32 %v2793_v15, %v6538_v44  ;;  %3709 = vst [vmem:[%s6813_s5 + $0x368] sm:$0xff] %v3633_v13 }
 0x34a   :  { %v2795_v23 = vpop.f32.mrf.mxu1  ;;  %3710 = vst [vmem:[%s6813_s5 + $0x380] sm:$0xff] %v3634_v18 }
 0x34b   :  { %v2980_v41 = vpop.f32.mrf.mxu0  ;;  %v2979_v49 = vadd.f32 %v2978_v48, %v2794_v39 }
 0x34c   :  { %v2796_v57 = vpop.f32.mrf.mxu1 }
 0x34d   :  { %v2981_v52 = vpop.f32.mrf.mxu0  ;;  %3727 = vst [vmem:[%s6813_s5 + $0x190] sm:$0xff] %v2979_v49  ;;  %v2797_v54 = vadd.f32 %v2796_v57, %v6538_v44 }
 0x34e   :  { %v2798_v20 = vpop.f32.mrf.mxu1 }
 0x34f   :  { %v2983_v26 = vpop.f32.mrf.mxu0  ;;  %v2982_v33 = vadd.f32 %v2981_v52, %v2797_v54 }
 0x350   :  { %v2801_v59 = vpop.f32.mrf.mxu1 }
 0x351   :  { %v2986_v5 = vpop.f32.mrf.mxu0  ;;  %3728 = vst [vmem:[%s6813_s5 + $0x1a8] sm:$0xff] %v2982_v33  ;;  %v2802_v19 = vadd.f32 %v2801_v59, %v6538_v44 }
 0x352   :  { %v2803_v63 = vpop.f32.mrf.mxu1 }
 0x353   :  { %v2988_v56 = vpop.f32.mrf.mxu0  ;;  %v2987_v60 = vadd.f32 %v2986_v5, %v2802_v19 }
 0x354   :  { %v2804_v58 = vpop.f32.mrf.mxu1 }
 0x355   :  { %v2989_v32 = vpop.f32.mrf.mxu0  ;;  %3729 = vst [vmem:[%s6813_s5 + $0x1c0] sm:$0xff] %v2987_v60  ;;  %v2805_v40 = vadd.f32 %v2804_v58, %v6538_v44 }
 0x356   :  { %v2806_v14 = vpop.f32.mrf.mxu1 }
 0x357   :  { %v2991_v2 = vpop.f32.mrf.mxu0  ;;  %v2990_v51 = vadd.f32 %v2989_v32, %v2805_v40 }
 0x358   :  { %v2809_v1 = vpop.f32.mrf.mxu1 }
 0x359   :  { %v2994_v3 = vpop.f32.mrf.mxu0  ;;  %3730 = vst [vmem:[%s6813_s5 + $0x1d8] sm:$0xff] %v2990_v51  ;;  %v2810_v25 = vadd.f32 %v2809_v1, %v6538_v44 }
 0x35a   :  { %v2811_v61 = vpop.f32.mrf.mxu1 }
 0x35b   :  { %v2996_v30 = vpop.f32.mrf.mxu0  ;;  %v2995_v43 = vadd.f32 %v2994_v3, %v2810_v25 }
 0x35c   :  { %v2812_v53 = vpop.f32.mrf.mxu1 }
 0x35d   :  { %v2997_v21 = vpop.f32.mrf.mxu0  ;;  %3731 = vst [vmem:[%s6813_s5 + $0x1f0] sm:$0xff] %v2995_v43  ;;  %v2813_v36 = vadd.f32 %v2812_v53, %v6538_v44 }
 0x35e   :  { %v2814_v50 = vpop.f32.mrf.mxu1 }
 0x35f   :  { %v2999_v0 = vpop.f32.mrf.mxu0  ;;  %v2998_v4 = vadd.f32 %v2997_v21, %v2813_v36 }
 0x360   :  { %v2817_v46 = vpop.f32.mrf.mxu1 }
 0x361   :  { %v3002_v29 = vpop.f32.mrf.mxu0  ;;  %3732 = vst [vmem:[%s6813_s5 + $0x208] sm:$0xff] %v2998_v4  ;;  %v2818_v62 = vadd.f32 %v2817_v46, %v6538_v44 }
 0x362   :  { %v2819_v42 = vpop.f32.mrf.mxu1 }
 0x363   :  { %v3004_v17 = vpop.f32.mrf.mxu0  ;;  %v3003_v35 = vadd.f32 %v3002_v29, %v2818_v62 }
 0x364   :  { %v2820_v7 = vpop.f32.mrf.mxu1 }
 0x365   :  { %v3005_v37 = vpop.f32.mrf.mxu0  ;;  %3733 = vst [vmem:[%s6813_s5 + $0x220] sm:$0xff] %v3003_v35  ;;  %v2821_v16 = vadd.f32 %v2820_v7, %v6538_v44 }
 0x366   :  { %v2822_v8 = vpop.f32.mrf.mxu1 }
 0x367   :  { %v3007_v10 = vpop.f32.mrf.mxu0  ;;  %v3006_v11 = vadd.f32 %v3005_v37, %v2821_v16 }
 0x368   :  { %v2825_v9 = vpop.f32.mrf.mxu1 }
 0x369   :  { %v3010_v27 = vpop.f32.mrf.mxu0  ;;  %3734 = vst [vmem:[%s6813_s5 + $0x238] sm:$0xff] %v3006_v11  ;;  %v2826_v24 = vadd.f32 %v2825_v9, %v6538_v44 }
 0x36a   :  { %v2827_v38 = vpop.f32.mrf.mxu1 }
 0x36b   :  { %v3012_v47 = vpop.f32.mrf.mxu0  ;;  %v3011_v6 = vadd.f32 %v3010_v27, %v2826_v24 }
 0x36c   :  { %v2828_v34 = vpop.f32.mrf.mxu1 }
 0x36d   :  { %v3013_v28 = vpop.f32.mrf.mxu0  ;;  %3735 = vst [vmem:[%s6813_s5 + $0x250] sm:$0xff] %v3011_v6  ;;  %v2829_v55 = vadd.f32 %v2828_v34, %v6538_v44 }
 0x36e   :  { %v2830_v22 = vpop.f32.mrf.mxu1 }
 0x36f   :  { %v3015_v12 = vpop.f32.mrf.mxu0  ;;  %v3014_v31 = vadd.f32 %v3013_v28, %v2829_v55 }
 0x370   :  { %v2833_v15 = vpop.f32.mrf.mxu1 }
 0x371   :  { %v3018_v48 = vpop.f32.mrf.mxu0  ;;  %3736 = vst [vmem:[%s6813_s5 + $0x268] sm:$0xff] %v3014_v31  ;;  %v2834_v13 = vadd.f32 %v2833_v15, %v6538_v44 }
 0x372   :  { %v2835_v45 = vpop.f32.mrf.mxu1 }
 0x373   :  { %v3020_v39 = vpop.f32.mrf.mxu0  ;;  %v3019_v18 = vadd.f32 %v3018_v48, %v2834_v13 }
 0x374   :  { %v2836_v23 = vpop.f32.mrf.mxu1 }
 0x375   :  { %v3021_v41 = vpop.f32.mrf.mxu0  ;;  %3737 = vst [vmem:[%s6813_s5 + $0x280] sm:$0xff] %v3019_v18  ;;  %v2837_v49 = vadd.f32 %v2836_v23, %v6538_v44 }
 0x376   :  { %v2838_v57 = vpop.f32.mrf.mxu1 }
 0x377   :  { %v3023_v52 = vpop.f32.mrf.mxu0  ;;  %v3022_v54 = vadd.f32 %v3021_v41, %v2837_v49 }
 0x378   :  { %v2841_v20 = vpop.f32.mrf.mxu1 }
 0x379   :  { %v3026_v26 = vpop.f32.mrf.mxu0  ;;  %3738 = vst [vmem:[%s6813_s5 + $0x298] sm:$0xff] %v3022_v54  ;;  %v2842_v33 = vadd.f32 %v2841_v20, %v6538_v44 }
 0x37a   :  { %v2843_v59 = vpop.f32.mrf.mxu1 }
 0x37b   :  { %v3028_v5 = vpop.f32.mrf.mxu0  ;;  %v3027_v19 = vadd.f32 %v3026_v26, %v2842_v33 }
 0x37c   :  { %v2844_v63 = vpop.f32.mrf.mxu1 }
 0x37d   :  { %v3029_v56 = vpop.f32.mrf.mxu0  ;;  %3739 = vst [vmem:[%s6813_s5 + $0x2b0] sm:$0xff] %v3027_v19  ;;  %v2845_v60 = vadd.f32 %v2844_v63, %v6538_v44 }
 0x37e   :  { %v2846_v58 = vpop.f32.mrf.mxu1 }
 0x37f   :  { %v3031_v32 = vpop.f32.mrf.mxu0  ;;  %v3030_v40 = vadd.f32 %v3029_v56, %v2845_v60 }
 0x380   :  { %v2849_v14 = vpop.f32.mrf.mxu1 }
 0x381   :  { %v3034_v2 = vpop.f32.mrf.mxu0  ;;  %3740 = vst [vmem:[%s6813_s5 + $0x2c8] sm:$0xff] %v3030_v40  ;;  %v2850_v51 = vadd.f32 %v2849_v14, %v6538_v44 }
 0x382   :  { %v2851_v1 = vpop.f32.mrf.mxu1 }
 0x383   :  { %v3036_v3 = vpop.f32.mrf.mxu0  ;;  %v3035_v25 = vadd.f32 %v3034_v2, %v2850_v51 }
 0x384   :  { %v2852_v61 = vpop.f32.mrf.mxu1 }
 0x385   :  { %v3037_v30 = vpop.f32.mrf.mxu0  ;;  %3741 = vst [vmem:[%s6813_s5 + $0x2e0] sm:$0xff] %v3035_v25  ;;  %v2853_v43 = vadd.f32 %v2852_v61, %v6538_v44 }
 0x386   :  { %v2854_v53 = vpop.f32.mrf.mxu1 }
 0x387   :  { %v3039_v21 = vpop.f32.mrf.mxu0  ;;  %v3038_v36 = vadd.f32 %v3037_v30, %v2853_v43 }
 0x388   :  { %v2857_v50 = vpop.f32.mrf.mxu1 }
 0x389   :  { %v3042_v0 = vpop.f32.mrf.mxu0  ;;  %3742 = vst [vmem:[%s6813_s5 + $0x2f8] sm:$0xff] %v3038_v36  ;;  %v2858_v4 = vadd.f32 %v2857_v50, %v6538_v44 }
 0x38a   :  { %v2859_v46 = vpop.f32.mrf.mxu1 }
 0x38b   :  { %v3044_v29 = vpop.f32.mrf.mxu0  ;;  %v3043_v62 = vadd.f32 %v3042_v0, %v2858_v4 }
 0x38c   :  { %v2860_v42 = vpop.f32.mrf.mxu1 }
 0x38d   :  { %v3045_v17 = vpop.f32.mrf.mxu0  ;;  %3743 = vst [vmem:[%s6813_s5 + $0x310] sm:$0xff] %v3043_v62  ;;  %v2861_v35 = vadd.f32 %v2860_v42, %v6538_v44 }
 0x38e   :  { %v2862_v7 = vpop.f32.mrf.mxu1 }
 0x38f   :  { %v3047_v37 = vpop.f32.mrf.mxu0  ;;  %v3046_v16 = vadd.f32 %v3045_v17, %v2861_v35 }
 0x390   :  { %v2865_v8 = vpop.f32.mrf.mxu1 }
 0x391   :  { %v3050_v10 = vpop.f32.mrf.mxu0  ;;  %3744 = vst [vmem:[%s6813_s5 + $0x328] sm:$0xff] %v3046_v16  ;;  %v2866_v11 = vadd.f32 %v2865_v8, %v6538_v44 }
 0x392   :  { %v2867_v9 = vpop.f32.mrf.mxu1 }
 0x393   :  { %v3052_v27 = vpop.f32.mrf.mxu0  ;;  %v3051_v24 = vadd.f32 %v3050_v10, %v2866_v11 }
 0x394   :  { %v2868_v38 = vpop.f32.mrf.mxu1 }
 0x395   :  { %v3053_v47 = vpop.f32.mrf.mxu0  ;;  %3745 = vst [vmem:[%s6813_s5 + $0x340] sm:$0xff] %v3051_v24  ;;  %v2869_v6 = vadd.f32 %v2868_v38, %v6538_v44 }
 0x396   :  { %v2870_v34 = vpop.f32.mrf.mxu1 }
 0x397   :  { %v3055_v28 = vpop.f32.mrf.mxu0  ;;  %v3054_v55 = vadd.f32 %v3053_v47, %v2869_v6 }
 0x398   :  { %v2873_v22 = vpop.f32.mrf.mxu1 }
 0x399   :  { %v3058_v12 = vpop.f32.mrf.mxu0  ;;  %3746 = vst [vmem:[%s6813_s5 + $0x358] sm:$0xff] %v3054_v55  ;;  %v2874_v31 = vadd.f32 %v2873_v22, %v6538_v44 }
 0x39a   :  { %v2875_v15 = vpop.f32.mrf.mxu1 }
 0x39b   :  { %v3060_v48 = vpop.f32.mrf.mxu0  ;;  %v3059_v13 = vadd.f32 %v3058_v12, %v2874_v31 }
 0x39c   :  { %v2876_v45 = vpop.f32.mrf.mxu1 }
 0x39d   :  { %v3061_v39 = vpop.f32.mrf.mxu0  ;;  %3747 = vst [vmem:[%s6813_s5 + $0x370] sm:$0xff] %v3059_v13  ;;  %v2877_v18 = vadd.f32 %v2876_v45, %v6538_v44 }
 0x39e   :  { %v2878_v23 = vpop.f32.mrf.mxu1 }
 0x39f   :  { %v3063_v41 = vpop.f32.mrf.mxu0  ;;  %v3062_v49 = vadd.f32 %v3061_v39, %v2877_v18 }
 0x3a1   :  { %3748 = vst [vmem:[%s6813_s5 + $0x388] sm:$0xff] %v3062_v49 }
 0x3a2   :  { %3753 = vsyncpa [#allocation3], 1 }

</bundles_post_ra>
